<compile_context>
chip_gen: v6e
topology: v6e:2x2x1
jax: 0.10.0
libtpu: 0.0.40
codegen_flags: <defaults>
</compile_context>

<pallas_src>
import jax
import jax.numpy as jnp
from jax.experimental import pallas as pl
from jax.experimental.pallas import tpu as pltpu

# ---- KAN spline configuration (KANLinear defaults) --------------------------
GRID_SIZE = 5
SPLINE_ORDER = 3
GRID_RANGE = (-1.0, 1.0)
_H = (GRID_RANGE[1] - GRID_RANGE[0]) / GRID_SIZE
# Knot vector of length grid_size + 2*spline_order + 1 = 12 (shared by all features).
KNOTS = tuple(GRID_RANGE[0] + (i - SPLINE_ORDER) * _H
              for i in range(GRID_SIZE + 2 * SPLINE_ORDER + 1))
NUM_BASES = GRID_SIZE + SPLINE_ORDER          # 8 cubic B-spline bases
NUM_GROUPS = 1 + NUM_BASES                    # silu + 8 bases
LANE = 128

# For large, MXU-bound batches set to jnp.bfloat16 (operands only; accumulation
# stays f32 via preferred_element_type).  Valid on v5e/v6e/v7x.  Kept f32 here:
# at B=2 the model is launch/glue-bound and the dots are tiny.
MXU_DTYPE = jnp.float32


def _round_up(n, m):
    return (n + m - 1) // m * m


# ---- KAN feature expansion (elementwise; spill-free on dense (R,128) tiles) --
def _kan_features_list(x):
    """Returns [silu(x), B_0(x), ..., B_7(x)] as NUM_GROUPS arrays shaped like x."""
    silu = x / (1.0 + jnp.exp(-x))                     # exact sigmoid (cheap here)
    # Order-0 indicator bases, right-open intervals (efficient-kan convention).
    b = [jnp.where((x >= KNOTS[i]) & (x < KNOTS[i + 1]), 1.0, 0.0)
         for i in range(len(KNOTS) - 1)]
    # Cox-de Boor recursion up to cubic order; uniform grid -> denominators are
    # compile-time constant reciprocals.
    for k in range(1, SPLINE_ORDER + 1):
        inv = 1.0 / (k * _H)
        xs = x * inv
        b = [(xs - KNOTS[i] * inv) * b[i] + (KNOTS[i + k + 1] * inv - xs) * b[i + 1]
             for i in range(len(b) - 1)]
    return [silu] + b


# ---- Pallas kernels -----------------------------------------------------------
def _expand_kernel(x_ref, o_ref):
    """Per-pixel KAN expansion on densely packed values (optionally fused max-pool).

    x_ref: (W, R, 128) — W "window views" of the same flattened (pixel, ch)
           values; their elementwise max is the pooled value (W=1: no pool).
    o_ref: (NUM_GROUPS, R, 128) — one lane-dense plane per feature group.
    """
    x = x_ref[0]
    for w in range(1, x_ref.shape[0]):          # static; W is 1 or 4
        x = jnp.maximum(x, x_ref[w])            # fused 2x2 max-pool
    feats = _kan_features_list(x)
    for g in range(NUM_GROUPS):
        o_ref[g] = feats[g]


def _conv_matmul_kernel(x_ref, w_ref, o_ref):
    """One MXU matmul per row tile: (TM, K_pad) x (K_pad, 128) -> (TM, 128)."""
    o_ref[...] = jnp.dot(x_ref[...].astype(MXU_DTYPE), w_ref[...].astype(MXU_DTYPE),
                         preferred_element_type=jnp.float32)


def _mlp_kernel(x_ref, w1_ref, b1_ref, w2_ref, b2_ref, o_ref):
    h = jnp.dot(x_ref[...].astype(MXU_DTYPE), w1_ref[...].astype(MXU_DTYPE),
                preferred_element_type=jnp.float32) + b1_ref[...]
    h = jnp.maximum(h, 0.0)
    o_ref[...] = jnp.dot(h.astype(MXU_DTYPE), w2_ref[...].astype(MXU_DTYPE),
                         preferred_element_type=jnp.float32) + b2_ref[...]


# ---- Wrappers ------------------------------------------------------------------
def kan_expand_pixels(x_windows):
    """Per-pixel [silu | 8 B-spline bases] expansion, with optional fused max-pool.

    x_windows: (W, B, H, Wsp, C) float32.  The W views are elementwise max-ed
    before expansion (W=1: plain expansion; W=4: fused 2x2 max-pool).
    Returns (B, H, Wsp, NUM_GROUPS*C) with channel order (group, c).
    """
    Wn, B, H, Wsp, C = x_windows.shape
    n_vals = B * H * Wsp * C
    R = _round_up(pl.cdiv(n_vals, LANE), 8)               # dense, 8-aligned rows
    flat = x_windows.reshape(Wn, n_vals)
    flat = jnp.pad(flat, ((0, 0), (0, R * LANE - n_vals))).reshape(Wn, R, LANE)

    out = pl.pallas_call(
        _expand_kernel,
        out_shape=jax.ShapeDtypeStruct((NUM_GROUPS, R, LANE), jnp.float32),
        grid_spec=pltpu.PrefetchScalarGridSpec(
            num_scalar_prefetch=0,
            grid=(1,),
            in_specs=[pl.BlockSpec((Wn, R, LANE), lambda i: (0, 0, 0))],
            out_specs=pl.BlockSpec((NUM_GROUPS, R, LANE), lambda i: (0, 0, 0)),
        ),
    )(flat)

    out = out.reshape(NUM_GROUPS, R * LANE)[:, :n_vals]
    out = out.reshape(NUM_GROUPS, B, H, Wsp, C)
    # Channel order (group, c) to match the fused weight row order (g, c_in, kpos).
    return jnp.transpose(out, (1, 2, 3, 0, 4)).reshape(B, H, Wsp, NUM_GROUPS * C)


def kan_conv2d(x_nhwc, w2d, c_out):
    """KAN 3x3 'valid' convolution (stride 1) as one fused matmul per row tile.

    x_nhwc: (B, H, W, C) — already feature-expanded channels (NUM_GROUPS*C_prev).
    w2d:    (C*9, c_out) fused 2D weight, rows ordered (group, c_in, kpos).
    Returns (B, H-2, W-2, c_out).
    """
    B, H, W, C = x_nhwc.shape
    Ho, Wo = H - 2, W - 2
    # im2col (XLA glue, pure data movement): rows (b, y, x); cols (channel, kpos).
    cols = jnp.stack(
        [x_nhwc[:, kh:kh + Ho, kw:kw + Wo, :] for kh in range(3) for kw in range(3)],
        axis=4)                                                  # (B, Ho, Wo, C, 9)
    patches = cols.reshape(B * Ho * Wo, C * 9)
    n_rows, K = patches.shape
    assert w2d.shape == (K, c_out)

    K_pad = _round_up(K, 8)                  # (8,128)-clean contraction operands
    N_pad = _round_up(c_out, LANE)           # lane-dense output stores
    w_pad = jnp.pad(w2d, ((0, K_pad - K), (0, N_pad - c_out)))

    # Two balanced row tiles when the conv is big enough (even v7x megacore
    # split with near-zero pad rows); otherwise a single step (optimal on
    # single-TC v5e/v6e, where the extra step for the big conv costs ~0.35us).
    grid_m = 2 if n_rows >= 1024 else 1
    tile_m = _round_up(pl.cdiv(n_rows, grid_m), 8)
    rows_pad = tile_m * grid_m
    patches = jnp.pad(patches, ((0, rows_pad - n_rows), (0, K_pad - K)))

    out = pl.pallas_call(
        _conv_matmul_kernel,
        out_shape=jax.ShapeDtypeStruct((rows_pad, N_pad), jnp.float32),
        grid_spec=pltpu.PrefetchScalarGridSpec(
            num_scalar_prefetch=0,
            grid=(grid_m,),
            in_specs=[
                pl.BlockSpec((tile_m, K_pad), lambda i: (i, 0)),
                pl.BlockSpec((K_pad, N_pad), lambda i: (0, 0)),   # weight resident
            ],
            out_specs=pl.BlockSpec((tile_m, N_pad), lambda i: (i, 0)),
        ),
        compiler_params=pltpu.CompilerParams(
            dimension_semantics=("parallel",)),
    )(patches, w_pad)

    return out[:n_rows, :c_out].reshape(B, Ho, Wo, c_out)


def mlp_head(x, w1, b1, w2, b2, n_out):
    """Linear(162,500) -> ReLU -> Linear(500,10), lane-dense padded (512 / 128)."""
    B, F = x.shape
    H_pad = _round_up(w1.shape[1], LANE)     # 500 -> 512
    O_pad = _round_up(n_out, LANE)           # 10  -> 128
    w1p = jnp.pad(w1, ((0, 0), (0, H_pad - w1.shape[1])))
    b1p = jnp.pad(b1, ((0, 0), (0, H_pad - b1.shape[1])))
    w2p = jnp.pad(w2, ((0, H_pad - w2.shape[0]), (0, O_pad - w2.shape[1])))
    b2p = jnp.pad(b2, ((0, 0), (0, O_pad - b2.shape[1])))
    # At B=2 a single full-block step; for realistic batch, tile rows (128-512)
    # with weights resident and dimension_semantics=("parallel",).
    out = pl.pallas_call(
        _mlp_kernel,
        out_shape=jax.ShapeDtypeStruct((B, O_pad), jnp.float32),
        grid_spec=pltpu.PrefetchScalarGridSpec(
            num_scalar_prefetch=0,
            grid=(1,),
            in_specs=[
                pl.BlockSpec((B, F), lambda i: (0, 0)),
                pl.BlockSpec(w1p.shape, lambda i: (0, 0)),
                pl.BlockSpec(b1p.shape, lambda i: (0, 0)),
                pl.BlockSpec(w2p.shape, lambda i: (0, 0)),
                pl.BlockSpec(b2p.shape, lambda i: (0, 0)),
            ],
            out_specs=pl.BlockSpec((B, O_pad), lambda i: (0, 0)),
        ),
    )(x, w1p, b1p, w2p, b2p)
    return out[:, :n_out]


# ---- Deterministic synthetic parameters -----------------------------------------
def init_kan_conv_params(key, c_in, c_out, scale=0.1):
    """Fused 2D weight (NUM_GROUPS*c_in*9, c_out), row order (group, c_in, kpos),
    built from per-(c_out, c_in) KANLinear params: base_weight, spline_weight,
    spline_scaler (standalone scaling)."""
    k1, k2, k3 = jax.random.split(key, 3)
    base_w = scale * jax.random.normal(k1, (c_out, c_in, 9), jnp.float32)
    spline_w = scale * jax.random.normal(k2, (c_out, c_in, 9, NUM_BASES), jnp.float32)
    spline_scaler = 1.0 + scale * jax.random.normal(k3, (c_out, c_in, 9), jnp.float32)
    scaled_spline = spline_w * spline_scaler[..., None]
    K = c_in * 9
    base_part = base_w.transpose(1, 2, 0).reshape(1, K, c_out)
    spline_part = scaled_spline.transpose(3, 1, 2, 0).reshape(NUM_BASES, K, c_out)
    w = jnp.concatenate([base_part, spline_part], axis=0)        # (NUM_GROUPS, K, c_out)
    return w.reshape(NUM_GROUPS * K, c_out)


def _torch_flatten_perm(c, h, w):
    """Row permutation folding torch's NCHW Flatten into w1 so NHWC reshape feeds it."""
    idx = jnp.arange(h * w * c)
    y = idx // (w * c)
    rem = idx % (w * c)
    xx = rem // c
    ch = rem % c
    return ch * (h * w) + y * w + xx        # NHWC flat index -> NCHW flat index


# ---- Full forward pass (matches KANC_MLP.forward) --------------------------------
def kanc_mlp_forward(x, params):
    B = x.shape[0]
    x_nhwc = jnp.transpose(x, (0, 2, 3, 1))                          # (B, 28, 28, 1)
    f0 = kan_expand_pixels(x_nhwc[None])                             # (B, 28, 28, 9)
    a1 = kan_conv2d(f0, params["conv1"], 5)                          # (B, 26, 26, 5)
    # Fused 2x2 max-pool + per-pixel expansion (four shifted views, max in-kernel).
    wins = jnp.stack([a1[:, di::2, dj::2, :] for di in (0, 1) for dj in (0, 1)], axis=0)
    f1 = kan_expand_pixels(wins)                                     # (B, 13, 13, 45)
    a2 = kan_conv2d(f1, params["conv2"], 5)                          # (B, 11, 11, 5)
    f2 = kan_expand_pixels(a2[None])                                 # (B, 11, 11, 45)
    a3 = kan_conv2d(f2, params["conv3"], 2)                          # (B, 9, 9, 2)
    flat = a3.reshape(B, -1)          # NHWC flatten; torch (C,H,W) order folded into w1
    return mlp_head(flat, params["w1"], params["b1"], params["w2"], params["b2"], 10)


if __name__ == "__main__":
    key = jax.random.PRNGKey(0)
    kx, k1, k2, k3, k4, k5, k6, k7 = jax.random.split(key, 8)
    # Input shape implied by the module: Flatten dim 162 = 2*9*9 -> 1x28x28 input.
    x = jax.random.normal(kx, (2, 1, 28, 28), jnp.float32)
    w1_torch = 0.05 * jax.random.normal(k4, (162, 500), jnp.float32)  # Linear(162,500) W.T
    params = {
        "conv1": init_kan_conv_params(k1, 1, 5),                      # (81, 5)
        "conv2": init_kan_conv_params(k2, 5, 5),                      # (405, 5)
        "conv3": init_kan_conv_params(k3, 5, 2),                      # (405, 2)
        # Fold the torch channel-major Flatten permutation into w1's rows (item 7).
        "w1": w1_torch[_torch_flatten_perm(2, 9, 9)],
        "b1": 0.05 * jax.random.normal(k5, (1, 500), jnp.float32),
        "w2": 0.05 * jax.random.normal(k6, (500, 10), jnp.float32),   # Linear(500,10) W.T
        "b2": 0.05 * jax.random.normal(k7, (1, 10), jnp.float32),
    }
    out = jax.jit(kanc_mlp_forward)(x, params)
    jax.block_until_ready(out)
    assert out.shape == (2, 10) and out.dtype == jnp.float32
    print("KERNEL_OK")
</pallas_src>

<mosaic_0001>
module attributes {stable_mosaic.version = 11 : i64} {
  func.func @_expand_kernel(%arg0: i32, %arg1: memref<1x16x128xf32, #tpu.memory_space<vmem>>, %arg2: memref<9x16x128xf32, #tpu.memory_space<vmem>>) attributes {dimension_semantics = [#tpu.dimension_semantics<arbitrary>], iteration_bounds = array<i64: 1>, scalar_prefetch = 0 : i64, scratch_operands = 0 : i64, tpu.core_type = #tpu.core_type<tc>, window_params = [{pipeline_mode = #tpu.pipeline_mode<synchronous>, transform_indices = @transform_0, window_bounds = array<i64: 1, 16, 128>}, {pipeline_mode = #tpu.pipeline_mode<synchronous>, transform_indices = @transform_1, window_bounds = array<i64: 9, 16, 128>}]} {
    %c0 = arith.constant 0 : index
    %c0_0 = arith.constant 0 : index
    %c0_1 = arith.constant 0 : index
    %0 = vector.load %arg1[%c0, %c0_0, %c0_1] : memref<1x16x128xf32, #tpu.memory_space<vmem>>, vector<1x16x128xf32>
    %1 = vector.shape_cast %0 : vector<1x16x128xf32> to vector<16x128xf32>
    %cst = arith.constant 0.000000e+00 : f32
    %2 = vector.broadcast %cst : f32 to vector<16x128xf32>
    %3 = arith.subf %2, %1 : vector<16x128xf32>
    %4 = math.exp %3 : vector<16x128xf32>
    %cst_2 = arith.constant 1.000000e+00 : f32
    %5 = vector.broadcast %cst_2 : f32 to vector<16x128xf32>
    %6 = arith.addf %5, %4 : vector<16x128xf32>
    %7 = arith.divf %1, %6 : vector<16x128xf32>
    %cst_3 = arith.constant -2.200000e+00 : f32
    %8 = vector.broadcast %cst_3 : f32 to vector<16x128xf32>
    %9 = arith.cmpf oge, %1, %8 : vector<16x128xf32>
    %cst_4 = arith.constant -1.800000e+00 : f32
    %10 = vector.broadcast %cst_4 : f32 to vector<16x128xf32>
    %11 = arith.cmpf olt, %1, %10 : vector<16x128xf32>
    %12 = arith.andi %9, %11 : vector<16x128xi1>
    %cst_5 = arith.constant 1.000000e+00 : f32
    %cst_6 = arith.constant 0.000000e+00 : f32
    %13 = vector.broadcast %cst_5 : f32 to vector<16x128xf32>
    %14 = vector.broadcast %cst_6 : f32 to vector<16x128xf32>
    %15 = arith.select %12, %13, %14 : vector<16x128xi1>, vector<16x128xf32>
    %cst_7 = arith.constant -1.800000e+00 : f32
    %16 = vector.broadcast %cst_7 : f32 to vector<16x128xf32>
    %17 = arith.cmpf oge, %1, %16 : vector<16x128xf32>
    %cst_8 = arith.constant -1.400000e+00 : f32
    %18 = vector.broadcast %cst_8 : f32 to vector<16x128xf32>
    %19 = arith.cmpf olt, %1, %18 : vector<16x128xf32>
    %20 = arith.andi %17, %19 : vector<16x128xi1>
    %cst_9 = arith.constant 1.000000e+00 : f32
    %cst_10 = arith.constant 0.000000e+00 : f32
    %21 = vector.broadcast %cst_9 : f32 to vector<16x128xf32>
    %22 = vector.broadcast %cst_10 : f32 to vector<16x128xf32>
    %23 = arith.select %20, %21, %22 : vector<16x128xi1>, vector<16x128xf32>
    %cst_11 = arith.constant -1.400000e+00 : f32
    %24 = vector.broadcast %cst_11 : f32 to vector<16x128xf32>
    %25 = arith.cmpf oge, %1, %24 : vector<16x128xf32>
    %cst_12 = arith.constant -1.000000e+00 : f32
    %26 = vector.broadcast %cst_12 : f32 to vector<16x128xf32>
    %27 = arith.cmpf olt, %1, %26 : vector<16x128xf32>
    %28 = arith.andi %25, %27 : vector<16x128xi1>
    %cst_13 = arith.constant 1.000000e+00 : f32
    %cst_14 = arith.constant 0.000000e+00 : f32
    %29 = vector.broadcast %cst_13 : f32 to vector<16x128xf32>
    %30 = vector.broadcast %cst_14 : f32 to vector<16x128xf32>
    %31 = arith.select %28, %29, %30 : vector<16x128xi1>, vector<16x128xf32>
    %cst_15 = arith.constant -1.000000e+00 : f32
    %32 = vector.broadcast %cst_15 : f32 to vector<16x128xf32>
    %33 = arith.cmpf oge, %1, %32 : vector<16x128xf32>
    %cst_16 = arith.constant -6.000000e-01 : f32
    %34 = vector.broadcast %cst_16 : f32 to vector<16x128xf32>
    %35 = arith.cmpf olt, %1, %34 : vector<16x128xf32>
    %36 = arith.andi %33, %35 : vector<16x128xi1>
    %cst_17 = arith.constant 1.000000e+00 : f32
    %cst_18 = arith.constant 0.000000e+00 : f32
    %37 = vector.broadcast %cst_17 : f32 to vector<16x128xf32>
    %38 = vector.broadcast %cst_18 : f32 to vector<16x128xf32>
    %39 = arith.select %36, %37, %38 : vector<16x128xi1>, vector<16x128xf32>
    %cst_19 = arith.constant -6.000000e-01 : f32
    %40 = vector.broadcast %cst_19 : f32 to vector<16x128xf32>
    %41 = arith.cmpf oge, %1, %40 : vector<16x128xf32>
    %cst_20 = arith.constant -2.000000e-01 : f32
    %42 = vector.broadcast %cst_20 : f32 to vector<16x128xf32>
    %43 = arith.cmpf olt, %1, %42 : vector<16x128xf32>
    %44 = arith.andi %41, %43 : vector<16x128xi1>
    %cst_21 = arith.constant 1.000000e+00 : f32
    %cst_22 = arith.constant 0.000000e+00 : f32
    %45 = vector.broadcast %cst_21 : f32 to vector<16x128xf32>
    %46 = vector.broadcast %cst_22 : f32 to vector<16x128xf32>
    %47 = arith.select %44, %45, %46 : vector<16x128xi1>, vector<16x128xf32>
    %cst_23 = arith.constant -2.000000e-01 : f32
    %48 = vector.broadcast %cst_23 : f32 to vector<16x128xf32>
    %49 = arith.cmpf oge, %1, %48 : vector<16x128xf32>
    %cst_24 = arith.constant 2.000000e-01 : f32
    %50 = vector.broadcast %cst_24 : f32 to vector<16x128xf32>
    %51 = arith.cmpf olt, %1, %50 : vector<16x128xf32>
    %52 = arith.andi %49, %51 : vector<16x128xi1>
    %cst_25 = arith.constant 1.000000e+00 : f32
    %cst_26 = arith.constant 0.000000e+00 : f32
    %53 = vector.broadcast %cst_25 : f32 to vector<16x128xf32>
    %54 = vector.broadcast %cst_26 : f32 to vector<16x128xf32>
    %55 = arith.select %52, %53, %54 : vector<16x128xi1>, vector<16x128xf32>
    %cst_27 = arith.constant 2.000000e-01 : f32
    %56 = vector.broadcast %cst_27 : f32 to vector<16x128xf32>
    %57 = arith.cmpf oge, %1, %56 : vector<16x128xf32>
    %cst_28 = arith.constant 6.000000e-01 : f32
    %58 = vector.broadcast %cst_28 : f32 to vector<16x128xf32>
    %59 = arith.cmpf olt, %1, %58 : vector<16x128xf32>
    %60 = arith.andi %57, %59 : vector<16x128xi1>
    %cst_29 = arith.constant 1.000000e+00 : f32
    %cst_30 = arith.constant 0.000000e+00 : f32
    %61 = vector.broadcast %cst_29 : f32 to vector<16x128xf32>
    %62 = vector.broadcast %cst_30 : f32 to vector<16x128xf32>
    %63 = arith.select %60, %61, %62 : vector<16x128xi1>, vector<16x128xf32>
    %cst_31 = arith.constant 6.000000e-01 : f32
    %64 = vector.broadcast %cst_31 : f32 to vector<16x128xf32>
    %65 = arith.cmpf oge, %1, %64 : vector<16x128xf32>
    %cst_32 = arith.constant 1.000000e+00 : f32
    %66 = vector.broadcast %cst_32 : f32 to vector<16x128xf32>
    %67 = arith.cmpf olt, %1, %66 : vector<16x128xf32>
    %68 = arith.andi %65, %67 : vector<16x128xi1>
    %cst_33 = arith.constant 1.000000e+00 : f32
    %cst_34 = arith.constant 0.000000e+00 : f32
    %69 = vector.broadcast %cst_33 : f32 to vector<16x128xf32>
    %70 = vector.broadcast %cst_34 : f32 to vector<16x128xf32>
    %71 = arith.select %68, %69, %70 : vector<16x128xi1>, vector<16x128xf32>
    %cst_35 = arith.constant 1.000000e+00 : f32
    %72 = vector.broadcast %cst_35 : f32 to vector<16x128xf32>
    %73 = arith.cmpf oge, %1, %72 : vector<16x128xf32>
    %cst_36 = arith.constant 1.400000e+00 : f32
    %74 = vector.broadcast %cst_36 : f32 to vector<16x128xf32>
    %75 = arith.cmpf olt, %1, %74 : vector<16x128xf32>
    %76 = arith.andi %73, %75 : vector<16x128xi1>
    %cst_37 = arith.constant 1.000000e+00 : f32
    %cst_38 = arith.constant 0.000000e+00 : f32
    %77 = vector.broadcast %cst_37 : f32 to vector<16x128xf32>
    %78 = vector.broadcast %cst_38 : f32 to vector<16x128xf32>
    %79 = arith.select %76, %77, %78 : vector<16x128xi1>, vector<16x128xf32>
    %cst_39 = arith.constant 1.400000e+00 : f32
    %80 = vector.broadcast %cst_39 : f32 to vector<16x128xf32>
    %81 = arith.cmpf oge, %1, %80 : vector<16x128xf32>
    %cst_40 = arith.constant 1.800000e+00 : f32
    %82 = vector.broadcast %cst_40 : f32 to vector<16x128xf32>
    %83 = arith.cmpf olt, %1, %82 : vector<16x128xf32>
    %84 = arith.andi %81, %83 : vector<16x128xi1>
    %cst_41 = arith.constant 1.000000e+00 : f32
    %cst_42 = arith.constant 0.000000e+00 : f32
    %85 = vector.broadcast %cst_41 : f32 to vector<16x128xf32>
    %86 = vector.broadcast %cst_42 : f32 to vector<16x128xf32>
    %87 = arith.select %84, %85, %86 : vector<16x128xi1>, vector<16x128xf32>
    %cst_43 = arith.constant 1.800000e+00 : f32
    %88 = vector.broadcast %cst_43 : f32 to vector<16x128xf32>
    %89 = arith.cmpf oge, %1, %88 : vector<16x128xf32>
    %cst_44 = arith.constant 2.200000e+00 : f32
    %90 = vector.broadcast %cst_44 : f32 to vector<16x128xf32>
    %91 = arith.cmpf olt, %1, %90 : vector<16x128xf32>
    %92 = arith.andi %89, %91 : vector<16x128xi1>
    %cst_45 = arith.constant 1.000000e+00 : f32
    %cst_46 = arith.constant 0.000000e+00 : f32
    %93 = vector.broadcast %cst_45 : f32 to vector<16x128xf32>
    %94 = vector.broadcast %cst_46 : f32 to vector<16x128xf32>
    %95 = arith.select %92, %93, %94 : vector<16x128xi1>, vector<16x128xf32>
    %cst_47 = arith.constant 2.500000e+00 : f32
    %96 = vector.broadcast %cst_47 : f32 to vector<16x128xf32>
    %97 = arith.mulf %1, %96 : vector<16x128xf32>
    %cst_48 = arith.constant -5.500000e+00 : f32
    %98 = vector.broadcast %cst_48 : f32 to vector<16x128xf32>
    %99 = arith.subf %97, %98 : vector<16x128xf32>
    %100 = arith.mulf %99, %15 : vector<16x128xf32>
    %cst_49 = arith.constant -3.500000e+00 : f32
    %101 = vector.broadcast %cst_49 : f32 to vector<16x128xf32>
    %102 = arith.subf %101, %97 : vector<16x128xf32>
    %103 = arith.mulf %102, %23 : vector<16x128xf32>
    %104 = arith.addf %100, %103 : vector<16x128xf32>
    %cst_50 = arith.constant -4.500000e+00 : f32
    %105 = vector.broadcast %cst_50 : f32 to vector<16x128xf32>
    %106 = arith.subf %97, %105 : vector<16x128xf32>
    %107 = arith.mulf %106, %23 : vector<16x128xf32>
    %cst_51 = arith.constant -2.500000e+00 : f32
    %108 = vector.broadcast %cst_51 : f32 to vector<16x128xf32>
    %109 = arith.subf %108, %97 : vector<16x128xf32>
    %110 = arith.mulf %109, %31 : vector<16x128xf32>
    %111 = arith.addf %107, %110 : vector<16x128xf32>
    %cst_52 = arith.constant -3.500000e+00 : f32
    %112 = vector.broadcast %cst_52 : f32 to vector<16x128xf32>
    %113 = arith.subf %97, %112 : vector<16x128xf32>
    %114 = arith.mulf %113, %31 : vector<16x128xf32>
    %cst_53 = arith.constant -1.500000e+00 : f32
    %115 = vector.broadcast %cst_53 : f32 to vector<16x128xf32>
    %116 = arith.subf %115, %97 : vector<16x128xf32>
    %117 = arith.mulf %116, %39 : vector<16x128xf32>
    %118 = arith.addf %114, %117 : vector<16x128xf32>
    %cst_54 = arith.constant -2.500000e+00 : f32
    %119 = vector.broadcast %cst_54 : f32 to vector<16x128xf32>
    %120 = arith.subf %97, %119 : vector<16x128xf32>
    %121 = arith.mulf %120, %39 : vector<16x128xf32>
    %cst_55 = arith.constant -5.000000e-01 : f32
    %122 = vector.broadcast %cst_55 : f32 to vector<16x128xf32>
    %123 = arith.subf %122, %97 : vector<16x128xf32>
    %124 = arith.mulf %123, %47 : vector<16x128xf32>
    %125 = arith.addf %121, %124 : vector<16x128xf32>
    %cst_56 = arith.constant -1.500000e+00 : f32
    %126 = vector.broadcast %cst_56 : f32 to vector<16x128xf32>
    %127 = arith.subf %97, %126 : vector<16x128xf32>
    %128 = arith.mulf %127, %47 : vector<16x128xf32>
    %cst_57 = arith.constant 5.000000e-01 : f32
    %129 = vector.broadcast %cst_57 : f32 to vector<16x128xf32>
    %130 = arith.subf %129, %97 : vector<16x128xf32>
    %131 = arith.mulf %130, %55 : vector<16x128xf32>
    %132 = arith.addf %128, %131 : vector<16x128xf32>
    %cst_58 = arith.constant -5.000000e-01 : f32
    %133 = vector.broadcast %cst_58 : f32 to vector<16x128xf32>
    %134 = arith.subf %97, %133 : vector<16x128xf32>
    %135 = arith.mulf %134, %55 : vector<16x128xf32>
    %cst_59 = arith.constant 1.500000e+00 : f32
    %136 = vector.broadcast %cst_59 : f32 to vector<16x128xf32>
    %137 = arith.subf %136, %97 : vector<16x128xf32>
    %138 = arith.mulf %137, %63 : vector<16x128xf32>
    %139 = arith.addf %135, %138 : vector<16x128xf32>
    %cst_60 = arith.constant 5.000000e-01 : f32
    %140 = vector.broadcast %cst_60 : f32 to vector<16x128xf32>
    %141 = arith.subf %97, %140 : vector<16x128xf32>
    %142 = arith.mulf %141, %63 : vector<16x128xf32>
    %cst_61 = arith.constant 2.500000e+00 : f32
    %143 = vector.broadcast %cst_61 : f32 to vector<16x128xf32>
    %144 = arith.subf %143, %97 : vector<16x128xf32>
    %145 = arith.mulf %144, %71 : vector<16x128xf32>
    %146 = arith.addf %142, %145 : vector<16x128xf32>
    %cst_62 = arith.constant 1.500000e+00 : f32
    %147 = vector.broadcast %cst_62 : f32 to vector<16x128xf32>
    %148 = arith.subf %97, %147 : vector<16x128xf32>
    %149 = arith.mulf %148, %71 : vector<16x128xf32>
    %cst_63 = arith.constant 3.500000e+00 : f32
    %150 = vector.broadcast %cst_63 : f32 to vector<16x128xf32>
    %151 = arith.subf %150, %97 : vector<16x128xf32>
    %152 = arith.mulf %151, %79 : vector<16x128xf32>
    %153 = arith.addf %149, %152 : vector<16x128xf32>
    %cst_64 = arith.constant 2.500000e+00 : f32
    %154 = vector.broadcast %cst_64 : f32 to vector<16x128xf32>
    %155 = arith.subf %97, %154 : vector<16x128xf32>
    %156 = arith.mulf %155, %79 : vector<16x128xf32>
    %cst_65 = arith.constant 4.500000e+00 : f32
    %157 = vector.broadcast %cst_65 : f32 to vector<16x128xf32>
    %158 = arith.subf %157, %97 : vector<16x128xf32>
    %159 = arith.mulf %158, %87 : vector<16x128xf32>
    %160 = arith.addf %156, %159 : vector<16x128xf32>
    %cst_66 = arith.constant 3.500000e+00 : f32
    %161 = vector.broadcast %cst_66 : f32 to vector<16x128xf32>
    %162 = arith.subf %97, %161 : vector<16x128xf32>
    %163 = arith.mulf %162, %87 : vector<16x128xf32>
    %cst_67 = arith.constant 5.500000e+00 : f32
    %164 = vector.broadcast %cst_67 : f32 to vector<16x128xf32>
    %165 = arith.subf %164, %97 : vector<16x128xf32>
    %166 = arith.mulf %165, %95 : vector<16x128xf32>
    %167 = arith.addf %163, %166 : vector<16x128xf32>
    %cst_68 = arith.constant 1.250000e+00 : f32
    %168 = vector.broadcast %cst_68 : f32 to vector<16x128xf32>
    %169 = arith.mulf %1, %168 : vector<16x128xf32>
    %cst_69 = arith.constant -2.750000e+00 : f32
    %170 = vector.broadcast %cst_69 : f32 to vector<16x128xf32>
    %171 = arith.subf %169, %170 : vector<16x128xf32>
    %172 = arith.mulf %171, %104 : vector<16x128xf32>
    %cst_70 = arith.constant -1.250000e+00 : f32
    %173 = vector.broadcast %cst_70 : f32 to vector<16x128xf32>
    %174 = arith.subf %173, %169 : vector<16x128xf32>
    %175 = arith.mulf %174, %111 : vector<16x128xf32>
    %176 = arith.addf %172, %175 : vector<16x128xf32>
    %cst_71 = arith.constant -2.250000e+00 : f32
    %177 = vector.broadcast %cst_71 : f32 to vector<16x128xf32>
    %178 = arith.subf %169, %177 : vector<16x128xf32>
    %179 = arith.mulf %178, %111 : vector<16x128xf32>
    %cst_72 = arith.constant -7.500000e-01 : f32
    %180 = vector.broadcast %cst_72 : f32 to vector<16x128xf32>
    %181 = arith.subf %180, %169 : vector<16x128xf32>
    %182 = arith.mulf %181, %118 : vector<16x128xf32>
    %183 = arith.addf %179, %182 : vector<16x128xf32>
    %cst_73 = arith.constant -1.750000e+00 : f32
    %184 = vector.broadcast %cst_73 : f32 to vector<16x128xf32>
    %185 = arith.subf %169, %184 : vector<16x128xf32>
    %186 = arith.mulf %185, %118 : vector<16x128xf32>
    %cst_74 = arith.constant -2.500000e-01 : f32
    %187 = vector.broadcast %cst_74 : f32 to vector<16x128xf32>
    %188 = arith.subf %187, %169 : vector<16x128xf32>
    %189 = arith.mulf %188, %125 : vector<16x128xf32>
    %190 = arith.addf %186, %189 : vector<16x128xf32>
    %cst_75 = arith.constant -1.250000e+00 : f32
    %191 = vector.broadcast %cst_75 : f32 to vector<16x128xf32>
    %192 = arith.subf %169, %191 : vector<16x128xf32>
    %193 = arith.mulf %192, %125 : vector<16x128xf32>
    %cst_76 = arith.constant 2.500000e-01 : f32
    %194 = vector.broadcast %cst_76 : f32 to vector<16x128xf32>
    %195 = arith.subf %194, %169 : vector<16x128xf32>
    %196 = arith.mulf %195, %132 : vector<16x128xf32>
    %197 = arith.addf %193, %196 : vector<16x128xf32>
    %cst_77 = arith.constant -7.500000e-01 : f32
    %198 = vector.broadcast %cst_77 : f32 to vector<16x128xf32>
    %199 = arith.subf %169, %198 : vector<16x128xf32>
    %200 = arith.mulf %199, %132 : vector<16x128xf32>
    %cst_78 = arith.constant 7.500000e-01 : f32
    %201 = vector.broadcast %cst_78 : f32 to vector<16x128xf32>
    %202 = arith.subf %201, %169 : vector<16x128xf32>
    %203 = arith.mulf %202, %139 : vector<16x128xf32>
    %204 = arith.addf %200, %203 : vector<16x128xf32>
    %cst_79 = arith.constant -2.500000e-01 : f32
    %205 = vector.broadcast %cst_79 : f32 to vector<16x128xf32>
    %206 = arith.subf %169, %205 : vector<16x128xf32>
    %207 = arith.mulf %206, %139 : vector<16x128xf32>
    %cst_80 = arith.constant 1.250000e+00 : f32
    %208 = vector.broadcast %cst_80 : f32 to vector<16x128xf32>
    %209 = arith.subf %208, %169 : vector<16x128xf32>
    %210 = arith.mulf %209, %146 : vector<16x128xf32>
    %211 = arith.addf %207, %210 : vector<16x128xf32>
    %cst_81 = arith.constant 2.500000e-01 : f32
    %212 = vector.broadcast %cst_81 : f32 to vector<16x128xf32>
    %213 = arith.subf %169, %212 : vector<16x128xf32>
    %214 = arith.mulf %213, %146 : vector<16x128xf32>
    %cst_82 = arith.constant 1.750000e+00 : f32
    %215 = vector.broadcast %cst_82 : f32 to vector<16x128xf32>
    %216 = arith.subf %215, %169 : vector<16x128xf32>
    %217 = arith.mulf %216, %153 : vector<16x128xf32>
    %218 = arith.addf %214, %217 : vector<16x128xf32>
    %cst_83 = arith.constant 7.500000e-01 : f32
    %219 = vector.broadcast %cst_83 : f32 to vector<16x128xf32>
    %220 = arith.subf %169, %219 : vector<16x128xf32>
    %221 = arith.mulf %220, %153 : vector<16x128xf32>
    %cst_84 = arith.constant 2.250000e+00 : f32
    %222 = vector.broadcast %cst_84 : f32 to vector<16x128xf32>
    %223 = arith.subf %222, %169 : vector<16x128xf32>
    %224 = arith.mulf %223, %160 : vector<16x128xf32>
    %225 = arith.addf %221, %224 : vector<16x128xf32>
    %cst_85 = arith.constant 1.250000e+00 : f32
    %226 = vector.broadcast %cst_85 : f32 to vector<16x128xf32>
    %227 = arith.subf %169, %226 : vector<16x128xf32>
    %228 = arith.mulf %227, %160 : vector<16x128xf32>
    %cst_86 = arith.constant 2.750000e+00 : f32
    %229 = vector.broadcast %cst_86 : f32 to vector<16x128xf32>
    %230 = arith.subf %229, %169 : vector<16x128xf32>
    %231 = arith.mulf %230, %167 : vector<16x128xf32>
    %232 = arith.addf %228, %231 : vector<16x128xf32>
    %cst_87 = arith.constant 0.833333313 : f32
    %233 = vector.broadcast %cst_87 : f32 to vector<16x128xf32>
    %234 = arith.mulf %1, %233 : vector<16x128xf32>
    %cst_88 = arith.constant -1.83333337 : f32
    %235 = vector.broadcast %cst_88 : f32 to vector<16x128xf32>
    %236 = arith.subf %234, %235 : vector<16x128xf32>
    %237 = arith.mulf %236, %176 : vector<16x128xf32>
    %cst_89 = arith.constant -5.000000e-01 : f32
    %238 = vector.broadcast %cst_89 : f32 to vector<16x128xf32>
    %239 = arith.subf %238, %234 : vector<16x128xf32>
    %240 = arith.mulf %239, %183 : vector<16x128xf32>
    %241 = arith.addf %237, %240 : vector<16x128xf32>
    %cst_90 = arith.constant -1.500000e+00 : f32
    %242 = vector.broadcast %cst_90 : f32 to vector<16x128xf32>
    %243 = arith.subf %234, %242 : vector<16x128xf32>
    %244 = arith.mulf %243, %183 : vector<16x128xf32>
    %cst_91 = arith.constant -0.166666672 : f32
    %245 = vector.broadcast %cst_91 : f32 to vector<16x128xf32>
    %246 = arith.subf %245, %234 : vector<16x128xf32>
    %247 = arith.mulf %246, %190 : vector<16x128xf32>
    %248 = arith.addf %244, %247 : vector<16x128xf32>
    %cst_92 = arith.constant -1.16666663 : f32
    %249 = vector.broadcast %cst_92 : f32 to vector<16x128xf32>
    %250 = arith.subf %234, %249 : vector<16x128xf32>
    %251 = arith.mulf %250, %190 : vector<16x128xf32>
    %cst_93 = arith.constant 0.166666672 : f32
    %252 = vector.broadcast %cst_93 : f32 to vector<16x128xf32>
    %253 = arith.subf %252, %234 : vector<16x128xf32>
    %254 = arith.mulf %253, %197 : vector<16x128xf32>
    %255 = arith.addf %251, %254 : vector<16x128xf32>
    %cst_94 = arith.constant -0.833333313 : f32
    %256 = vector.broadcast %cst_94 : f32 to vector<16x128xf32>
    %257 = arith.subf %234, %256 : vector<16x128xf32>
    %258 = arith.mulf %257, %197 : vector<16x128xf32>
    %cst_95 = arith.constant 5.000000e-01 : f32
    %259 = vector.broadcast %cst_95 : f32 to vector<16x128xf32>
    %260 = arith.subf %259, %234 : vector<16x128xf32>
    %261 = arith.mulf %260, %204 : vector<16x128xf32>
    %262 = arith.addf %258, %261 : vector<16x128xf32>
    %cst_96 = arith.constant -5.000000e-01 : f32
    %263 = vector.broadcast %cst_96 : f32 to vector<16x128xf32>
    %264 = arith.subf %234, %263 : vector<16x128xf32>
    %265 = arith.mulf %264, %204 : vector<16x128xf32>
    %cst_97 = arith.constant 0.833333313 : f32
    %266 = vector.broadcast %cst_97 : f32 to vector<16x128xf32>
    %267 = arith.subf %266, %234 : vector<16x128xf32>
    %268 = arith.mulf %267, %211 : vector<16x128xf32>
    %269 = arith.addf %265, %268 : vector<16x128xf32>
    %cst_98 = arith.constant -0.166666672 : f32
    %270 = vector.broadcast %cst_98 : f32 to vector<16x128xf32>
    %271 = arith.subf %234, %270 : vector<16x128xf32>
    %272 = arith.mulf %271, %211 : vector<16x128xf32>
    %cst_99 = arith.constant 1.16666663 : f32
    %273 = vector.broadcast %cst_99 : f32 to vector<16x128xf32>
    %274 = arith.subf %273, %234 : vector<16x128xf32>
    %275 = arith.mulf %274, %218 : vector<16x128xf32>
    %276 = arith.addf %272, %275 : vector<16x128xf32>
    %cst_100 = arith.constant 0.166666672 : f32
    %277 = vector.broadcast %cst_100 : f32 to vector<16x128xf32>
    %278 = arith.subf %234, %277 : vector<16x128xf32>
    %279 = arith.mulf %278, %218 : vector<16x128xf32>
    %cst_101 = arith.constant 1.500000e+00 : f32
    %280 = vector.broadcast %cst_101 : f32 to vector<16x128xf32>
    %281 = arith.subf %280, %234 : vector<16x128xf32>
    %282 = arith.mulf %281, %225 : vector<16x128xf32>
    %283 = arith.addf %279, %282 : vector<16x128xf32>
    %cst_102 = arith.constant 5.000000e-01 : f32
    %284 = vector.broadcast %cst_102 : f32 to vector<16x128xf32>
    %285 = arith.subf %234, %284 : vector<16x128xf32>
    %286 = arith.mulf %285, %225 : vector<16x128xf32>
    %cst_103 = arith.constant 1.83333337 : f32
    %287 = vector.broadcast %cst_103 : f32 to vector<16x128xf32>
    %288 = arith.subf %287, %234 : vector<16x128xf32>
    %289 = arith.mulf %288, %232 : vector<16x128xf32>
    %290 = arith.addf %286, %289 : vector<16x128xf32>
    %c0_104 = arith.constant 0 : index
    %c0_105 = arith.constant 0 : index
    %c0_106 = arith.constant 0 : index
    %291 = vector.load %arg2[%c0_104, %c0_105, %c0_106] : memref<9x16x128xf32, #tpu.memory_space<vmem>>, vector<1x16x128xf32>
    %292 = vector.shape_cast %291 : vector<1x16x128xf32> to vector<16x128xf32>
    %293 = vector.shape_cast %7 : vector<16x128xf32> to vector<1x16x128xf32>
    tpu.vector_store %arg2[%c0_104, %c0_105, %c0_106], %293 {strides = array<i32>} : memref<9x16x128xf32, #tpu.memory_space<vmem>>, vector<1x16x128xf32>,
    %c1 = arith.constant 1 : index
    %c0_107 = arith.constant 0 : index
    %c0_108 = arith.constant 0 : index
    %294 = vector.load %arg2[%c1, %c0_107, %c0_108] : memref<9x16x128xf32, #tpu.memory_space<vmem>>, vector<1x16x128xf32>
    %295 = vector.shape_cast %294 : vector<1x16x128xf32> to vector<16x128xf32>
    %296 = vector.shape_cast %241 : vector<16x128xf32> to vector<1x16x128xf32>
    tpu.vector_store %arg2[%c1, %c0_107, %c0_108], %296 {strides = array<i32>} : memref<9x16x128xf32, #tpu.memory_space<vmem>>, vector<1x16x128xf32>,
    %c2 = arith.constant 2 : index
    %c0_109 = arith.constant 0 : index
    %c0_110 = arith.constant 0 : index
    %297 = vector.load %arg2[%c2, %c0_109, %c0_110] : memref<9x16x128xf32, #tpu.memory_space<vmem>>, vector<1x16x128xf32>
    %298 = vector.shape_cast %297 : vector<1x16x128xf32> to vector<16x128xf32>
    %299 = vector.shape_cast %248 : vector<16x128xf32> to vector<1x16x128xf32>
    tpu.vector_store %arg2[%c2, %c0_109, %c0_110], %299 {strides = array<i32>} : memref<9x16x128xf32, #tpu.memory_space<vmem>>, vector<1x16x128xf32>,
    %c3 = arith.constant 3 : index
    %c0_111 = arith.constant 0 : index
    %c0_112 = arith.constant 0 : index
    %300 = vector.load %arg2[%c3, %c0_111, %c0_112] : memref<9x16x128xf32, #tpu.memory_space<vmem>>, vector<1x16x128xf32>
    %301 = vector.shape_cast %300 : vector<1x16x128xf32> to vector<16x128xf32>
    %302 = vector.shape_cast %255 : vector<16x128xf32> to vector<1x16x128xf32>
    tpu.vector_store %arg2[%c3, %c0_111, %c0_112], %302 {strides = array<i32>} : memref<9x16x128xf32, #tpu.memory_space<vmem>>, vector<1x16x128xf32>,
    %c4 = arith.constant 4 : index
    %c0_113 = arith.constant 0 : index
    %c0_114 = arith.constant 0 : index
    %303 = vector.load %arg2[%c4, %c0_113, %c0_114] : memref<9x16x128xf32, #tpu.memory_space<vmem>>, vector<1x16x128xf32>
    %304 = vector.shape_cast %303 : vector<1x16x128xf32> to vector<16x128xf32>
    %305 = vector.shape_cast %262 : vector<16x128xf32> to vector<1x16x128xf32>
    tpu.vector_store %arg2[%c4, %c0_113, %c0_114], %305 {strides = array<i32>} : memref<9x16x128xf32, #tpu.memory_space<vmem>>, vector<1x16x128xf32>,
    %c5 = arith.constant 5 : index
    %c0_115 = arith.constant 0 : index
    %c0_116 = arith.constant 0 : index
    %306 = vector.load %arg2[%c5, %c0_115, %c0_116] : memref<9x16x128xf32, #tpu.memory_space<vmem>>, vector<1x16x128xf32>
    %307 = vector.shape_cast %306 : vector<1x16x128xf32> to vector<16x128xf32>
    %308 = vector.shape_cast %269 : vector<16x128xf32> to vector<1x16x128xf32>
    tpu.vector_store %arg2[%c5, %c0_115, %c0_116], %308 {strides = array<i32>} : memref<9x16x128xf32, #tpu.memory_space<vmem>>, vector<1x16x128xf32>,
    %c6 = arith.constant 6 : index
    %c0_117 = arith.constant 0 : index
    %c0_118 = arith.constant 0 : index
    %309 = vector.load %arg2[%c6, %c0_117, %c0_118] : memref<9x16x128xf32, #tpu.memory_space<vmem>>, vector<1x16x128xf32>
    %310 = vector.shape_cast %309 : vector<1x16x128xf32> to vector<16x128xf32>
    %311 = vector.shape_cast %276 : vector<16x128xf32> to vector<1x16x128xf32>
    tpu.vector_store %arg2[%c6, %c0_117, %c0_118], %311 {strides = array<i32>} : memref<9x16x128xf32, #tpu.memory_space<vmem>>, vector<1x16x128xf32>,
    %c7 = arith.constant 7 : index
    %c0_119 = arith.constant 0 : index
    %c0_120 = arith.constant 0 : index
    %312 = vector.load %arg2[%c7, %c0_119, %c0_120] : memref<9x16x128xf32, #tpu.memory_space<vmem>>, vector<1x16x128xf32>
    %313 = vector.shape_cast %312 : vector<1x16x128xf32> to vector<16x128xf32>
    %314 = vector.shape_cast %283 : vector<16x128xf32> to vector<1x16x128xf32>
    tpu.vector_store %arg2[%c7, %c0_119, %c0_120], %314 {strides = array<i32>} : memref<9x16x128xf32, #tpu.memory_space<vmem>>, vector<1x16x128xf32>,
    %c8 = arith.constant 8 : index
    %c0_121 = arith.constant 0 : index
    %c0_122 = arith.constant 0 : index
    %315 = vector.load %arg2[%c8, %c0_121, %c0_122] : memref<9x16x128xf32, #tpu.memory_space<vmem>>, vector<1x16x128xf32>
    %316 = vector.shape_cast %315 : vector<1x16x128xf32> to vector<16x128xf32>
    %317 = vector.shape_cast %290 : vector<16x128xf32> to vector<1x16x128xf32>
    tpu.vector_store %arg2[%c8, %c0_121, %c0_122], %317 {strides = array<i32>} : memref<9x16x128xf32, #tpu.memory_space<vmem>>, vector<1x16x128xf32>,
    return
  }
  func.func @transform_0(%arg0: i32) -> (i32, i32, i32) {
    %c0_i32 = arith.constant 0 : i32
    %c0_i32_0 = arith.constant 0 : i32
    %c0_i32_1 = arith.constant 0 : i32
    %c0_i32_2 = arith.constant 0 : i32
    return %c0_i32, %c0_i32_0, %c0_i32_1 : i32, i32, i32
  }
  func.func @transform_1(%arg0: i32) -> (i32, i32, i32) {
    %c0_i32 = arith.constant 0 : i32
    %c0_i32_0 = arith.constant 0 : i32
    %c0_i32_1 = arith.constant 0 : i32
    %c0_i32_2 = arith.constant 0 : i32
    return %c0_i32, %c0_i32_0, %c0_i32_1 : i32, i32, i32
  }
}

module attributes {stable_mosaic.version = 11 : i64} {
  func.func @_conv_matmul_kernel(%arg0: i32, %arg1: memref<680x88xf32, #tpu.memory_space<vmem>>, %arg2: memref<88x128xf32, #tpu.memory_space<vmem>>, %arg3: memref<680x128xf32, #tpu.memory_space<vmem>>) attributes {dimension_semantics = [#tpu.dimension_semantics<parallel>], iteration_bounds = array<i64: 2>, scalar_prefetch = 0 : i64, scratch_operands = 0 : i64, tpu.core_type = #tpu.core_type<tc>, window_params = [{transform_indices = @transform_0, window_bounds = array<i64: 680, 88>}, {pipeline_mode = #tpu.pipeline_mode<synchronous>, transform_indices = @transform_1, window_bounds = array<i64: 88, 128>}, {transform_indices = @transform_2, window_bounds = array<i64: 680, 128>}]} {
    %c0 = arith.constant 0 : index
    %c0_0 = arith.constant 0 : index
    %0 = vector.load %arg1[%c0, %c0_0] : memref<680x88xf32, #tpu.memory_space<vmem>>, vector<680x88xf32>
    %c0_1 = arith.constant 0 : index
    %c0_2 = arith.constant 0 : index
    %1 = vector.load %arg2[%c0_1, %c0_2] : memref<88x128xf32, #tpu.memory_space<vmem>>, vector<88x128xf32>
    %cst = arith.constant dense<0.000000e+00> : vector<680x128xf32>
    %2 = tpu.matmul %0, %1, %cst {dimension_numbers = #tpu.dot_dimension_numbers<[1], [0], [0], [1], [0, 0, 1, 1], [], []>} : vector<680x88xf32>, vector<88x128xf32>, vector<680x128xf32> -> vector<680x128xf32>
    %c0_3 = arith.constant 0 : index
    %c0_4 = arith.constant 0 : index
    %3 = vector.load %arg3[%c0_3, %c0_4] : memref<680x128xf32, #tpu.memory_space<vmem>>, vector<680x128xf32>
    tpu.vector_store %arg3[%c0_3, %c0_4], %2 {strides = array<i32>} : memref<680x128xf32, #tpu.memory_space<vmem>>, vector<680x128xf32>,
    return
  }
  func.func @transform_0(%arg0: i32) -> (i32, i32) {
    %c0_i32 = arith.constant 0 : i32
    %c0_i32_0 = arith.constant 0 : i32
    return %arg0, %c0_i32 : i32, i32
  }
  func.func @transform_1(%arg0: i32) -> (i32, i32) {
    %c0_i32 = arith.constant 0 : i32
    %c0_i32_0 = arith.constant 0 : i32
    %c0_i32_1 = arith.constant 0 : i32
    return %c0_i32, %c0_i32_0 : i32, i32
  }
  func.func @transform_2(%arg0: i32) -> (i32, i32) {
    %c0_i32 = arith.constant 0 : i32
    %c0_i32_0 = arith.constant 0 : i32
    return %arg0, %c0_i32 : i32, i32
  }
}

module attributes {stable_mosaic.version = 11 : i64} {
  func.func @_expand_kernel(%arg0: i32, %arg1: memref<4x16x128xf32, #tpu.memory_space<vmem>>, %arg2: memref<9x16x128xf32, #tpu.memory_space<vmem>>) attributes {dimension_semantics = [#tpu.dimension_semantics<arbitrary>], iteration_bounds = array<i64: 1>, scalar_prefetch = 0 : i64, scratch_operands = 0 : i64, tpu.core_type = #tpu.core_type<tc>, window_params = [{pipeline_mode = #tpu.pipeline_mode<synchronous>, transform_indices = @transform_0, window_bounds = array<i64: 4, 16, 128>}, {pipeline_mode = #tpu.pipeline_mode<synchronous>, transform_indices = @transform_1, window_bounds = array<i64: 9, 16, 128>}]} {
    %c0 = arith.constant 0 : index
    %c0_0 = arith.constant 0 : index
    %c0_1 = arith.constant 0 : index
    %0 = vector.load %arg1[%c0, %c0_0, %c0_1] : memref<4x16x128xf32, #tpu.memory_space<vmem>>, vector<1x16x128xf32>
    %1 = vector.shape_cast %0 : vector<1x16x128xf32> to vector<16x128xf32>
    %c1 = arith.constant 1 : index
    %c0_2 = arith.constant 0 : index
    %c0_3 = arith.constant 0 : index
    %2 = vector.load %arg1[%c1, %c0_2, %c0_3] : memref<4x16x128xf32, #tpu.memory_space<vmem>>, vector<1x16x128xf32>
    %3 = vector.shape_cast %2 : vector<1x16x128xf32> to vector<16x128xf32>
    %4 = arith.maximumf %1, %3 : vector<16x128xf32>
    %c2 = arith.constant 2 : index
    %c0_4 = arith.constant 0 : index
    %c0_5 = arith.constant 0 : index
    %5 = vector.load %arg1[%c2, %c0_4, %c0_5] : memref<4x16x128xf32, #tpu.memory_space<vmem>>, vector<1x16x128xf32>
    %6 = vector.shape_cast %5 : vector<1x16x128xf32> to vector<16x128xf32>
    %7 = arith.maximumf %4, %6 : vector<16x128xf32>
    %c3 = arith.constant 3 : index
    %c0_6 = arith.constant 0 : index
    %c0_7 = arith.constant 0 : index
    %8 = vector.load %arg1[%c3, %c0_6, %c0_7] : memref<4x16x128xf32, #tpu.memory_space<vmem>>, vector<1x16x128xf32>
    %9 = vector.shape_cast %8 : vector<1x16x128xf32> to vector<16x128xf32>
    %10 = arith.maximumf %7, %9 : vector<16x128xf32>
    %cst = arith.constant 0.000000e+00 : f32
    %11 = vector.broadcast %cst : f32 to vector<16x128xf32>
    %12 = arith.subf %11, %10 : vector<16x128xf32>
    %13 = math.exp %12 : vector<16x128xf32>
    %cst_8 = arith.constant 1.000000e+00 : f32
    %14 = vector.broadcast %cst_8 : f32 to vector<16x128xf32>
    %15 = arith.addf %14, %13 : vector<16x128xf32>
    %16 = arith.divf %10, %15 : vector<16x128xf32>
    %cst_9 = arith.constant -2.200000e+00 : f32
    %17 = vector.broadcast %cst_9 : f32 to vector<16x128xf32>
    %18 = arith.cmpf oge, %10, %17 : vector<16x128xf32>
    %cst_10 = arith.constant -1.800000e+00 : f32
    %19 = vector.broadcast %cst_10 : f32 to vector<16x128xf32>
    %20 = arith.cmpf olt, %10, %19 : vector<16x128xf32>
    %21 = arith.andi %18, %20 : vector<16x128xi1>
    %cst_11 = arith.constant 1.000000e+00 : f32
    %cst_12 = arith.constant 0.000000e+00 : f32
    %22 = vector.broadcast %cst_11 : f32 to vector<16x128xf32>
    %23 = vector.broadcast %cst_12 : f32 to vector<16x128xf32>
    %24 = arith.select %21, %22, %23 : vector<16x128xi1>, vector<16x128xf32>
    %cst_13 = arith.constant -1.800000e+00 : f32
    %25 = vector.broadcast %cst_13 : f32 to vector<16x128xf32>
    %26 = arith.cmpf oge, %10, %25 : vector<16x128xf32>
    %cst_14 = arith.constant -1.400000e+00 : f32
    %27 = vector.broadcast %cst_14 : f32 to vector<16x128xf32>
    %28 = arith.cmpf olt, %10, %27 : vector<16x128xf32>
    %29 = arith.andi %26, %28 : vector<16x128xi1>
    %cst_15 = arith.constant 1.000000e+00 : f32
    %cst_16 = arith.constant 0.000000e+00 : f32
    %30 = vector.broadcast %cst_15 : f32 to vector<16x128xf32>
    %31 = vector.broadcast %cst_16 : f32 to vector<16x128xf32>
    %32 = arith.select %29, %30, %31 : vector<16x128xi1>, vector<16x128xf32>
    %cst_17 = arith.constant -1.400000e+00 : f32
    %33 = vector.broadcast %cst_17 : f32 to vector<16x128xf32>
    %34 = arith.cmpf oge, %10, %33 : vector<16x128xf32>
    %cst_18 = arith.constant -1.000000e+00 : f32
    %35 = vector.broadcast %cst_18 : f32 to vector<16x128xf32>
    %36 = arith.cmpf olt, %10, %35 : vector<16x128xf32>
    %37 = arith.andi %34, %36 : vector<16x128xi1>
    %cst_19 = arith.constant 1.000000e+00 : f32
    %cst_20 = arith.constant 0.000000e+00 : f32
    %38 = vector.broadcast %cst_19 : f32 to vector<16x128xf32>
    %39 = vector.broadcast %cst_20 : f32 to vector<16x128xf32>
    %40 = arith.select %37, %38, %39 : vector<16x128xi1>, vector<16x128xf32>
    %cst_21 = arith.constant -1.000000e+00 : f32
    %41 = vector.broadcast %cst_21 : f32 to vector<16x128xf32>
    %42 = arith.cmpf oge, %10, %41 : vector<16x128xf32>
    %cst_22 = arith.constant -6.000000e-01 : f32
    %43 = vector.broadcast %cst_22 : f32 to vector<16x128xf32>
    %44 = arith.cmpf olt, %10, %43 : vector<16x128xf32>
    %45 = arith.andi %42, %44 : vector<16x128xi1>
    %cst_23 = arith.constant 1.000000e+00 : f32
    %cst_24 = arith.constant 0.000000e+00 : f32
    %46 = vector.broadcast %cst_23 : f32 to vector<16x128xf32>
    %47 = vector.broadcast %cst_24 : f32 to vector<16x128xf32>
    %48 = arith.select %45, %46, %47 : vector<16x128xi1>, vector<16x128xf32>
    %cst_25 = arith.constant -6.000000e-01 : f32
    %49 = vector.broadcast %cst_25 : f32 to vector<16x128xf32>
    %50 = arith.cmpf oge, %10, %49 : vector<16x128xf32>
    %cst_26 = arith.constant -2.000000e-01 : f32
    %51 = vector.broadcast %cst_26 : f32 to vector<16x128xf32>
    %52 = arith.cmpf olt, %10, %51 : vector<16x128xf32>
    %53 = arith.andi %50, %52 : vector<16x128xi1>
    %cst_27 = arith.constant 1.000000e+00 : f32
    %cst_28 = arith.constant 0.000000e+00 : f32
    %54 = vector.broadcast %cst_27 : f32 to vector<16x128xf32>
    %55 = vector.broadcast %cst_28 : f32 to vector<16x128xf32>
    %56 = arith.select %53, %54, %55 : vector<16x128xi1>, vector<16x128xf32>
    %cst_29 = arith.constant -2.000000e-01 : f32
    %57 = vector.broadcast %cst_29 : f32 to vector<16x128xf32>
    %58 = arith.cmpf oge, %10, %57 : vector<16x128xf32>
    %cst_30 = arith.constant 2.000000e-01 : f32
    %59 = vector.broadcast %cst_30 : f32 to vector<16x128xf32>
    %60 = arith.cmpf olt, %10, %59 : vector<16x128xf32>
    %61 = arith.andi %58, %60 : vector<16x128xi1>
    %cst_31 = arith.constant 1.000000e+00 : f32
    %cst_32 = arith.constant 0.000000e+00 : f32
    %62 = vector.broadcast %cst_31 : f32 to vector<16x128xf32>
    %63 = vector.broadcast %cst_32 : f32 to vector<16x128xf32>
    %64 = arith.select %61, %62, %63 : vector<16x128xi1>, vector<16x128xf32>
    %cst_33 = arith.constant 2.000000e-01 : f32
    %65 = vector.broadcast %cst_33 : f32 to vector<16x128xf32>
    %66 = arith.cmpf oge, %10, %65 : vector<16x128xf32>
    %cst_34 = arith.constant 6.000000e-01 : f32
    %67 = vector.broadcast %cst_34 : f32 to vector<16x128xf32>
    %68 = arith.cmpf olt, %10, %67 : vector<16x128xf32>
    %69 = arith.andi %66, %68 : vector<16x128xi1>
    %cst_35 = arith.constant 1.000000e+00 : f32
    %cst_36 = arith.constant 0.000000e+00 : f32
    %70 = vector.broadcast %cst_35 : f32 to vector<16x128xf32>
    %71 = vector.broadcast %cst_36 : f32 to vector<16x128xf32>
    %72 = arith.select %69, %70, %71 : vector<16x128xi1>, vector<16x128xf32>
    %cst_37 = arith.constant 6.000000e-01 : f32
    %73 = vector.broadcast %cst_37 : f32 to vector<16x128xf32>
    %74 = arith.cmpf oge, %10, %73 : vector<16x128xf32>
    %cst_38 = arith.constant 1.000000e+00 : f32
    %75 = vector.broadcast %cst_38 : f32 to vector<16x128xf32>
    %76 = arith.cmpf olt, %10, %75 : vector<16x128xf32>
    %77 = arith.andi %74, %76 : vector<16x128xi1>
    %cst_39 = arith.constant 1.000000e+00 : f32
    %cst_40 = arith.constant 0.000000e+00 : f32
    %78 = vector.broadcast %cst_39 : f32 to vector<16x128xf32>
    %79 = vector.broadcast %cst_40 : f32 to vector<16x128xf32>
    %80 = arith.select %77, %78, %79 : vector<16x128xi1>, vector<16x128xf32>
    %cst_41 = arith.constant 1.000000e+00 : f32
    %81 = vector.broadcast %cst_41 : f32 to vector<16x128xf32>
    %82 = arith.cmpf oge, %10, %81 : vector<16x128xf32>
    %cst_42 = arith.constant 1.400000e+00 : f32
    %83 = vector.broadcast %cst_42 : f32 to vector<16x128xf32>
    %84 = arith.cmpf olt, %10, %83 : vector<16x128xf32>
    %85 = arith.andi %82, %84 : vector<16x128xi1>
    %cst_43 = arith.constant 1.000000e+00 : f32
    %cst_44 = arith.constant 0.000000e+00 : f32
    %86 = vector.broadcast %cst_43 : f32 to vector<16x128xf32>
    %87 = vector.broadcast %cst_44 : f32 to vector<16x128xf32>
    %88 = arith.select %85, %86, %87 : vector<16x128xi1>, vector<16x128xf32>
    %cst_45 = arith.constant 1.400000e+00 : f32
    %89 = vector.broadcast %cst_45 : f32 to vector<16x128xf32>
    %90 = arith.cmpf oge, %10, %89 : vector<16x128xf32>
    %cst_46 = arith.constant 1.800000e+00 : f32
    %91 = vector.broadcast %cst_46 : f32 to vector<16x128xf32>
    %92 = arith.cmpf olt, %10, %91 : vector<16x128xf32>
    %93 = arith.andi %90, %92 : vector<16x128xi1>
    %cst_47 = arith.constant 1.000000e+00 : f32
    %cst_48 = arith.constant 0.000000e+00 : f32
    %94 = vector.broadcast %cst_47 : f32 to vector<16x128xf32>
    %95 = vector.broadcast %cst_48 : f32 to vector<16x128xf32>
    %96 = arith.select %93, %94, %95 : vector<16x128xi1>, vector<16x128xf32>
    %cst_49 = arith.constant 1.800000e+00 : f32
    %97 = vector.broadcast %cst_49 : f32 to vector<16x128xf32>
    %98 = arith.cmpf oge, %10, %97 : vector<16x128xf32>
    %cst_50 = arith.constant 2.200000e+00 : f32
    %99 = vector.broadcast %cst_50 : f32 to vector<16x128xf32>
    %100 = arith.cmpf olt, %10, %99 : vector<16x128xf32>
    %101 = arith.andi %98, %100 : vector<16x128xi1>
    %cst_51 = arith.constant 1.000000e+00 : f32
    %cst_52 = arith.constant 0.000000e+00 : f32
    %102 = vector.broadcast %cst_51 : f32 to vector<16x128xf32>
    %103 = vector.broadcast %cst_52 : f32 to vector<16x128xf32>
    %104 = arith.select %101, %102, %103 : vector<16x128xi1>, vector<16x128xf32>
    %cst_53 = arith.constant 2.500000e+00 : f32
    %105 = vector.broadcast %cst_53 : f32 to vector<16x128xf32>
    %106 = arith.mulf %10, %105 : vector<16x128xf32>
    %cst_54 = arith.constant -5.500000e+00 : f32
    %107 = vector.broadcast %cst_54 : f32 to vector<16x128xf32>
    %108 = arith.subf %106, %107 : vector<16x128xf32>
    %109 = arith.mulf %108, %24 : vector<16x128xf32>
    %cst_55 = arith.constant -3.500000e+00 : f32
    %110 = vector.broadcast %cst_55 : f32 to vector<16x128xf32>
    %111 = arith.subf %110, %106 : vector<16x128xf32>
    %112 = arith.mulf %111, %32 : vector<16x128xf32>
    %113 = arith.addf %109, %112 : vector<16x128xf32>
    %cst_56 = arith.constant -4.500000e+00 : f32
    %114 = vector.broadcast %cst_56 : f32 to vector<16x128xf32>
    %115 = arith.subf %106, %114 : vector<16x128xf32>
    %116 = arith.mulf %115, %32 : vector<16x128xf32>
    %cst_57 = arith.constant -2.500000e+00 : f32
    %117 = vector.broadcast %cst_57 : f32 to vector<16x128xf32>
    %118 = arith.subf %117, %106 : vector<16x128xf32>
    %119 = arith.mulf %118, %40 : vector<16x128xf32>
    %120 = arith.addf %116, %119 : vector<16x128xf32>
    %cst_58 = arith.constant -3.500000e+00 : f32
    %121 = vector.broadcast %cst_58 : f32 to vector<16x128xf32>
    %122 = arith.subf %106, %121 : vector<16x128xf32>
    %123 = arith.mulf %122, %40 : vector<16x128xf32>
    %cst_59 = arith.constant -1.500000e+00 : f32
    %124 = vector.broadcast %cst_59 : f32 to vector<16x128xf32>
    %125 = arith.subf %124, %106 : vector<16x128xf32>
    %126 = arith.mulf %125, %48 : vector<16x128xf32>
    %127 = arith.addf %123, %126 : vector<16x128xf32>
    %cst_60 = arith.constant -2.500000e+00 : f32
    %128 = vector.broadcast %cst_60 : f32 to vector<16x128xf32>
    %129 = arith.subf %106, %128 : vector<16x128xf32>
    %130 = arith.mulf %129, %48 : vector<16x128xf32>
    %cst_61 = arith.constant -5.000000e-01 : f32
    %131 = vector.broadcast %cst_61 : f32 to vector<16x128xf32>
    %132 = arith.subf %131, %106 : vector<16x128xf32>
    %133 = arith.mulf %132, %56 : vector<16x128xf32>
    %134 = arith.addf %130, %133 : vector<16x128xf32>
    %cst_62 = arith.constant -1.500000e+00 : f32
    %135 = vector.broadcast %cst_62 : f32 to vector<16x128xf32>
    %136 = arith.subf %106, %135 : vector<16x128xf32>
    %137 = arith.mulf %136, %56 : vector<16x128xf32>
    %cst_63 = arith.constant 5.000000e-01 : f32
    %138 = vector.broadcast %cst_63 : f32 to vector<16x128xf32>
    %139 = arith.subf %138, %106 : vector<16x128xf32>
    %140 = arith.mulf %139, %64 : vector<16x128xf32>
    %141 = arith.addf %137, %140 : vector<16x128xf32>
    %cst_64 = arith.constant -5.000000e-01 : f32
    %142 = vector.broadcast %cst_64 : f32 to vector<16x128xf32>
    %143 = arith.subf %106, %142 : vector<16x128xf32>
    %144 = arith.mulf %143, %64 : vector<16x128xf32>
    %cst_65 = arith.constant 1.500000e+00 : f32
    %145 = vector.broadcast %cst_65 : f32 to vector<16x128xf32>
    %146 = arith.subf %145, %106 : vector<16x128xf32>
    %147 = arith.mulf %146, %72 : vector<16x128xf32>
    %148 = arith.addf %144, %147 : vector<16x128xf32>
    %cst_66 = arith.constant 5.000000e-01 : f32
    %149 = vector.broadcast %cst_66 : f32 to vector<16x128xf32>
    %150 = arith.subf %106, %149 : vector<16x128xf32>
    %151 = arith.mulf %150, %72 : vector<16x128xf32>
    %cst_67 = arith.constant 2.500000e+00 : f32
    %152 = vector.broadcast %cst_67 : f32 to vector<16x128xf32>
    %153 = arith.subf %152, %106 : vector<16x128xf32>
    %154 = arith.mulf %153, %80 : vector<16x128xf32>
    %155 = arith.addf %151, %154 : vector<16x128xf32>
    %cst_68 = arith.constant 1.500000e+00 : f32
    %156 = vector.broadcast %cst_68 : f32 to vector<16x128xf32>
    %157 = arith.subf %106, %156 : vector<16x128xf32>
    %158 = arith.mulf %157, %80 : vector<16x128xf32>
    %cst_69 = arith.constant 3.500000e+00 : f32
    %159 = vector.broadcast %cst_69 : f32 to vector<16x128xf32>
    %160 = arith.subf %159, %106 : vector<16x128xf32>
    %161 = arith.mulf %160, %88 : vector<16x128xf32>
    %162 = arith.addf %158, %161 : vector<16x128xf32>
    %cst_70 = arith.constant 2.500000e+00 : f32
    %163 = vector.broadcast %cst_70 : f32 to vector<16x128xf32>
    %164 = arith.subf %106, %163 : vector<16x128xf32>
    %165 = arith.mulf %164, %88 : vector<16x128xf32>
    %cst_71 = arith.constant 4.500000e+00 : f32
    %166 = vector.broadcast %cst_71 : f32 to vector<16x128xf32>
    %167 = arith.subf %166, %106 : vector<16x128xf32>
    %168 = arith.mulf %167, %96 : vector<16x128xf32>
    %169 = arith.addf %165, %168 : vector<16x128xf32>
    %cst_72 = arith.constant 3.500000e+00 : f32
    %170 = vector.broadcast %cst_72 : f32 to vector<16x128xf32>
    %171 = arith.subf %106, %170 : vector<16x128xf32>
    %172 = arith.mulf %171, %96 : vector<16x128xf32>
    %cst_73 = arith.constant 5.500000e+00 : f32
    %173 = vector.broadcast %cst_73 : f32 to vector<16x128xf32>
    %174 = arith.subf %173, %106 : vector<16x128xf32>
    %175 = arith.mulf %174, %104 : vector<16x128xf32>
    %176 = arith.addf %172, %175 : vector<16x128xf32>
    %cst_74 = arith.constant 1.250000e+00 : f32
    %177 = vector.broadcast %cst_74 : f32 to vector<16x128xf32>
    %178 = arith.mulf %10, %177 : vector<16x128xf32>
    %cst_75 = arith.constant -2.750000e+00 : f32
    %179 = vector.broadcast %cst_75 : f32 to vector<16x128xf32>
    %180 = arith.subf %178, %179 : vector<16x128xf32>
    %181 = arith.mulf %180, %113 : vector<16x128xf32>
    %cst_76 = arith.constant -1.250000e+00 : f32
    %182 = vector.broadcast %cst_76 : f32 to vector<16x128xf32>
    %183 = arith.subf %182, %178 : vector<16x128xf32>
    %184 = arith.mulf %183, %120 : vector<16x128xf32>
    %185 = arith.addf %181, %184 : vector<16x128xf32>
    %cst_77 = arith.constant -2.250000e+00 : f32
    %186 = vector.broadcast %cst_77 : f32 to vector<16x128xf32>
    %187 = arith.subf %178, %186 : vector<16x128xf32>
    %188 = arith.mulf %187, %120 : vector<16x128xf32>
    %cst_78 = arith.constant -7.500000e-01 : f32
    %189 = vector.broadcast %cst_78 : f32 to vector<16x128xf32>
    %190 = arith.subf %189, %178 : vector<16x128xf32>
    %191 = arith.mulf %190, %127 : vector<16x128xf32>
    %192 = arith.addf %188, %191 : vector<16x128xf32>
    %cst_79 = arith.constant -1.750000e+00 : f32
    %193 = vector.broadcast %cst_79 : f32 to vector<16x128xf32>
    %194 = arith.subf %178, %193 : vector<16x128xf32>
    %195 = arith.mulf %194, %127 : vector<16x128xf32>
    %cst_80 = arith.constant -2.500000e-01 : f32
    %196 = vector.broadcast %cst_80 : f32 to vector<16x128xf32>
    %197 = arith.subf %196, %178 : vector<16x128xf32>
    %198 = arith.mulf %197, %134 : vector<16x128xf32>
    %199 = arith.addf %195, %198 : vector<16x128xf32>
    %cst_81 = arith.constant -1.250000e+00 : f32
    %200 = vector.broadcast %cst_81 : f32 to vector<16x128xf32>
    %201 = arith.subf %178, %200 : vector<16x128xf32>
    %202 = arith.mulf %201, %134 : vector<16x128xf32>
    %cst_82 = arith.constant 2.500000e-01 : f32
    %203 = vector.broadcast %cst_82 : f32 to vector<16x128xf32>
    %204 = arith.subf %203, %178 : vector<16x128xf32>
    %205 = arith.mulf %204, %141 : vector<16x128xf32>
    %206 = arith.addf %202, %205 : vector<16x128xf32>
    %cst_83 = arith.constant -7.500000e-01 : f32
    %207 = vector.broadcast %cst_83 : f32 to vector<16x128xf32>
    %208 = arith.subf %178, %207 : vector<16x128xf32>
    %209 = arith.mulf %208, %141 : vector<16x128xf32>
    %cst_84 = arith.constant 7.500000e-01 : f32
    %210 = vector.broadcast %cst_84 : f32 to vector<16x128xf32>
    %211 = arith.subf %210, %178 : vector<16x128xf32>
    %212 = arith.mulf %211, %148 : vector<16x128xf32>
    %213 = arith.addf %209, %212 : vector<16x128xf32>
    %cst_85 = arith.constant -2.500000e-01 : f32
    %214 = vector.broadcast %cst_85 : f32 to vector<16x128xf32>
    %215 = arith.subf %178, %214 : vector<16x128xf32>
    %216 = arith.mulf %215, %148 : vector<16x128xf32>
    %cst_86 = arith.constant 1.250000e+00 : f32
    %217 = vector.broadcast %cst_86 : f32 to vector<16x128xf32>
    %218 = arith.subf %217, %178 : vector<16x128xf32>
    %219 = arith.mulf %218, %155 : vector<16x128xf32>
    %220 = arith.addf %216, %219 : vector<16x128xf32>
    %cst_87 = arith.constant 2.500000e-01 : f32
    %221 = vector.broadcast %cst_87 : f32 to vector<16x128xf32>
    %222 = arith.subf %178, %221 : vector<16x128xf32>
    %223 = arith.mulf %222, %155 : vector<16x128xf32>
    %cst_88 = arith.constant 1.750000e+00 : f32
    %224 = vector.broadcast %cst_88 : f32 to vector<16x128xf32>
    %225 = arith.subf %224, %178 : vector<16x128xf32>
    %226 = arith.mulf %225, %162 : vector<16x128xf32>
    %227 = arith.addf %223, %226 : vector<16x128xf32>
    %cst_89 = arith.constant 7.500000e-01 : f32
    %228 = vector.broadcast %cst_89 : f32 to vector<16x128xf32>
    %229 = arith.subf %178, %228 : vector<16x128xf32>
    %230 = arith.mulf %229, %162 : vector<16x128xf32>
    %cst_90 = arith.constant 2.250000e+00 : f32
    %231 = vector.broadcast %cst_90 : f32 to vector<16x128xf32>
    %232 = arith.subf %231, %178 : vector<16x128xf32>
    %233 = arith.mulf %232, %169 : vector<16x128xf32>
    %234 = arith.addf %230, %233 : vector<16x128xf32>
    %cst_91 = arith.constant 1.250000e+00 : f32
    %235 = vector.broadcast %cst_91 : f32 to vector<16x128xf32>
    %236 = arith.subf %178, %235 : vector<16x128xf32>
    %237 = arith.mulf %236, %169 : vector<16x128xf32>
    %cst_92 = arith.constant 2.750000e+00 : f32
    %238 = vector.broadcast %cst_92 : f32 to vector<16x128xf32>
    %239 = arith.subf %238, %178 : vector<16x128xf32>
    %240 = arith.mulf %239, %176 : vector<16x128xf32>
    %241 = arith.addf %237, %240 : vector<16x128xf32>
    %cst_93 = arith.constant 0.833333313 : f32
    %242 = vector.broadcast %cst_93 : f32 to vector<16x128xf32>
    %243 = arith.mulf %10, %242 : vector<16x128xf32>
    %cst_94 = arith.constant -1.83333337 : f32
    %244 = vector.broadcast %cst_94 : f32 to vector<16x128xf32>
    %245 = arith.subf %243, %244 : vector<16x128xf32>
    %246 = arith.mulf %245, %185 : vector<16x128xf32>
    %cst_95 = arith.constant -5.000000e-01 : f32
    %247 = vector.broadcast %cst_95 : f32 to vector<16x128xf32>
    %248 = arith.subf %247, %243 : vector<16x128xf32>
    %249 = arith.mulf %248, %192 : vector<16x128xf32>
    %250 = arith.addf %246, %249 : vector<16x128xf32>
    %cst_96 = arith.constant -1.500000e+00 : f32
    %251 = vector.broadcast %cst_96 : f32 to vector<16x128xf32>
    %252 = arith.subf %243, %251 : vector<16x128xf32>
    %253 = arith.mulf %252, %192 : vector<16x128xf32>
    %cst_97 = arith.constant -0.166666672 : f32
    %254 = vector.broadcast %cst_97 : f32 to vector<16x128xf32>
    %255 = arith.subf %254, %243 : vector<16x128xf32>
    %256 = arith.mulf %255, %199 : vector<16x128xf32>
    %257 = arith.addf %253, %256 : vector<16x128xf32>
    %cst_98 = arith.constant -1.16666663 : f32
    %258 = vector.broadcast %cst_98 : f32 to vector<16x128xf32>
    %259 = arith.subf %243, %258 : vector<16x128xf32>
    %260 = arith.mulf %259, %199 : vector<16x128xf32>
    %cst_99 = arith.constant 0.166666672 : f32
    %261 = vector.broadcast %cst_99 : f32 to vector<16x128xf32>
    %262 = arith.subf %261, %243 : vector<16x128xf32>
    %263 = arith.mulf %262, %206 : vector<16x128xf32>
    %264 = arith.addf %260, %263 : vector<16x128xf32>
    %cst_100 = arith.constant -0.833333313 : f32
    %265 = vector.broadcast %cst_100 : f32 to vector<16x128xf32>
    %266 = arith.subf %243, %265 : vector<16x128xf32>
    %267 = arith.mulf %266, %206 : vector<16x128xf32>
    %cst_101 = arith.constant 5.000000e-01 : f32
    %268 = vector.broadcast %cst_101 : f32 to vector<16x128xf32>
    %269 = arith.subf %268, %243 : vector<16x128xf32>
    %270 = arith.mulf %269, %213 : vector<16x128xf32>
    %271 = arith.addf %267, %270 : vector<16x128xf32>
    %cst_102 = arith.constant -5.000000e-01 : f32
    %272 = vector.broadcast %cst_102 : f32 to vector<16x128xf32>
    %273 = arith.subf %243, %272 : vector<16x128xf32>
    %274 = arith.mulf %273, %213 : vector<16x128xf32>
    %cst_103 = arith.constant 0.833333313 : f32
    %275 = vector.broadcast %cst_103 : f32 to vector<16x128xf32>
    %276 = arith.subf %275, %243 : vector<16x128xf32>
    %277 = arith.mulf %276, %220 : vector<16x128xf32>
    %278 = arith.addf %274, %277 : vector<16x128xf32>
    %cst_104 = arith.constant -0.166666672 : f32
    %279 = vector.broadcast %cst_104 : f32 to vector<16x128xf32>
    %280 = arith.subf %243, %279 : vector<16x128xf32>
    %281 = arith.mulf %280, %220 : vector<16x128xf32>
    %cst_105 = arith.constant 1.16666663 : f32
    %282 = vector.broadcast %cst_105 : f32 to vector<16x128xf32>
    %283 = arith.subf %282, %243 : vector<16x128xf32>
    %284 = arith.mulf %283, %227 : vector<16x128xf32>
    %285 = arith.addf %281, %284 : vector<16x128xf32>
    %cst_106 = arith.constant 0.166666672 : f32
    %286 = vector.broadcast %cst_106 : f32 to vector<16x128xf32>
    %287 = arith.subf %243, %286 : vector<16x128xf32>
    %288 = arith.mulf %287, %227 : vector<16x128xf32>
    %cst_107 = arith.constant 1.500000e+00 : f32
    %289 = vector.broadcast %cst_107 : f32 to vector<16x128xf32>
    %290 = arith.subf %289, %243 : vector<16x128xf32>
    %291 = arith.mulf %290, %234 : vector<16x128xf32>
    %292 = arith.addf %288, %291 : vector<16x128xf32>
    %cst_108 = arith.constant 5.000000e-01 : f32
    %293 = vector.broadcast %cst_108 : f32 to vector<16x128xf32>
    %294 = arith.subf %243, %293 : vector<16x128xf32>
    %295 = arith.mulf %294, %234 : vector<16x128xf32>
    %cst_109 = arith.constant 1.83333337 : f32
    %296 = vector.broadcast %cst_109 : f32 to vector<16x128xf32>
    %297 = arith.subf %296, %243 : vector<16x128xf32>
    %298 = arith.mulf %297, %241 : vector<16x128xf32>
    %299 = arith.addf %295, %298 : vector<16x128xf32>
    %c0_110 = arith.constant 0 : index
    %c0_111 = arith.constant 0 : index
    %c0_112 = arith.constant 0 : index
    %300 = vector.load %arg2[%c0_110, %c0_111, %c0_112] : memref<9x16x128xf32, #tpu.memory_space<vmem>>, vector<1x16x128xf32>
    %301 = vector.shape_cast %300 : vector<1x16x128xf32> to vector<16x128xf32>
    %302 = vector.shape_cast %16 : vector<16x128xf32> to vector<1x16x128xf32>
    tpu.vector_store %arg2[%c0_110, %c0_111, %c0_112], %302 {strides = array<i32>} : memref<9x16x128xf32, #tpu.memory_space<vmem>>, vector<1x16x128xf32>,
    %c1_113 = arith.constant 1 : index
    %c0_114 = arith.constant 0 : index
    %c0_115 = arith.constant 0 : index
    %303 = vector.load %arg2[%c1_113, %c0_114, %c0_115] : memref<9x16x128xf32, #tpu.memory_space<vmem>>, vector<1x16x128xf32>
    %304 = vector.shape_cast %303 : vector<1x16x128xf32> to vector<16x128xf32>
    %305 = vector.shape_cast %250 : vector<16x128xf32> to vector<1x16x128xf32>
    tpu.vector_store %arg2[%c1_113, %c0_114, %c0_115], %305 {strides = array<i32>} : memref<9x16x128xf32, #tpu.memory_space<vmem>>, vector<1x16x128xf32>,
    %c2_116 = arith.constant 2 : index
    %c0_117 = arith.constant 0 : index
    %c0_118 = arith.constant 0 : index
    %306 = vector.load %arg2[%c2_116, %c0_117, %c0_118] : memref<9x16x128xf32, #tpu.memory_space<vmem>>, vector<1x16x128xf32>
    %307 = vector.shape_cast %306 : vector<1x16x128xf32> to vector<16x128xf32>
    %308 = vector.shape_cast %257 : vector<16x128xf32> to vector<1x16x128xf32>
    tpu.vector_store %arg2[%c2_116, %c0_117, %c0_118], %308 {strides = array<i32>} : memref<9x16x128xf32, #tpu.memory_space<vmem>>, vector<1x16x128xf32>,
    %c3_119 = arith.constant 3 : index
    %c0_120 = arith.constant 0 : index
    %c0_121 = arith.constant 0 : index
    %309 = vector.load %arg2[%c3_119, %c0_120, %c0_121] : memref<9x16x128xf32, #tpu.memory_space<vmem>>, vector<1x16x128xf32>
    %310 = vector.shape_cast %309 : vector<1x16x128xf32> to vector<16x128xf32>
    %311 = vector.shape_cast %264 : vector<16x128xf32> to vector<1x16x128xf32>
    tpu.vector_store %arg2[%c3_119, %c0_120, %c0_121], %311 {strides = array<i32>} : memref<9x16x128xf32, #tpu.memory_space<vmem>>, vector<1x16x128xf32>,
    %c4 = arith.constant 4 : index
    %c0_122 = arith.constant 0 : index
    %c0_123 = arith.constant 0 : index
    %312 = vector.load %arg2[%c4, %c0_122, %c0_123] : memref<9x16x128xf32, #tpu.memory_space<vmem>>, vector<1x16x128xf32>
    %313 = vector.shape_cast %312 : vector<1x16x128xf32> to vector<16x128xf32>
    %314 = vector.shape_cast %271 : vector<16x128xf32> to vector<1x16x128xf32>
    tpu.vector_store %arg2[%c4, %c0_122, %c0_123], %314 {strides = array<i32>} : memref<9x16x128xf32, #tpu.memory_space<vmem>>, vector<1x16x128xf32>,
    %c5 = arith.constant 5 : index
    %c0_124 = arith.constant 0 : index
    %c0_125 = arith.constant 0 : index
    %315 = vector.load %arg2[%c5, %c0_124, %c0_125] : memref<9x16x128xf32, #tpu.memory_space<vmem>>, vector<1x16x128xf32>
    %316 = vector.shape_cast %315 : vector<1x16x128xf32> to vector<16x128xf32>
    %317 = vector.shape_cast %278 : vector<16x128xf32> to vector<1x16x128xf32>
    tpu.vector_store %arg2[%c5, %c0_124, %c0_125], %317 {strides = array<i32>} : memref<9x16x128xf32, #tpu.memory_space<vmem>>, vector<1x16x128xf32>,
    %c6 = arith.constant 6 : index
    %c0_126 = arith.constant 0 : index
    %c0_127 = arith.constant 0 : index
    %318 = vector.load %arg2[%c6, %c0_126, %c0_127] : memref<9x16x128xf32, #tpu.memory_space<vmem>>, vector<1x16x128xf32>
    %319 = vector.shape_cast %318 : vector<1x16x128xf32> to vector<16x128xf32>
    %320 = vector.shape_cast %285 : vector<16x128xf32> to vector<1x16x128xf32>
    tpu.vector_store %arg2[%c6, %c0_126, %c0_127], %320 {strides = array<i32>} : memref<9x16x128xf32, #tpu.memory_space<vmem>>, vector<1x16x128xf32>,
    %c7 = arith.constant 7 : index
    %c0_128 = arith.constant 0 : index
    %c0_129 = arith.constant 0 : index
    %321 = vector.load %arg2[%c7, %c0_128, %c0_129] : memref<9x16x128xf32, #tpu.memory_space<vmem>>, vector<1x16x128xf32>
    %322 = vector.shape_cast %321 : vector<1x16x128xf32> to vector<16x128xf32>
    %323 = vector.shape_cast %292 : vector<16x128xf32> to vector<1x16x128xf32>
    tpu.vector_store %arg2[%c7, %c0_128, %c0_129], %323 {strides = array<i32>} : memref<9x16x128xf32, #tpu.memory_space<vmem>>, vector<1x16x128xf32>,
    %c8 = arith.constant 8 : index
    %c0_130 = arith.constant 0 : index
    %c0_131 = arith.constant 0 : index
    %324 = vector.load %arg2[%c8, %c0_130, %c0_131] : memref<9x16x128xf32, #tpu.memory_space<vmem>>, vector<1x16x128xf32>
    %325 = vector.shape_cast %324 : vector<1x16x128xf32> to vector<16x128xf32>
    %326 = vector.shape_cast %299 : vector<16x128xf32> to vector<1x16x128xf32>
    tpu.vector_store %arg2[%c8, %c0_130, %c0_131], %326 {strides = array<i32>} : memref<9x16x128xf32, #tpu.memory_space<vmem>>, vector<1x16x128xf32>,
    return
  }
  func.func @transform_0(%arg0: i32) -> (i32, i32, i32) {
    %c0_i32 = arith.constant 0 : i32
    %c0_i32_0 = arith.constant 0 : i32
    %c0_i32_1 = arith.constant 0 : i32
    %c0_i32_2 = arith.constant 0 : i32
    return %c0_i32, %c0_i32_0, %c0_i32_1 : i32, i32, i32
  }
  func.func @transform_1(%arg0: i32) -> (i32, i32, i32) {
    %c0_i32 = arith.constant 0 : i32
    %c0_i32_0 = arith.constant 0 : i32
    %c0_i32_1 = arith.constant 0 : i32
    %c0_i32_2 = arith.constant 0 : i32
    return %c0_i32, %c0_i32_0, %c0_i32_1 : i32, i32, i32
  }
}

module attributes {stable_mosaic.version = 11 : i64} {
  func.func @_conv_matmul_kernel(%arg0: i32, %arg1: memref<248x408xf32, #tpu.memory_space<vmem>>, %arg2: memref<408x128xf32, #tpu.memory_space<vmem>>, %arg3: memref<248x128xf32, #tpu.memory_space<vmem>>) attributes {dimension_semantics = [#tpu.dimension_semantics<parallel>], iteration_bounds = array<i64: 1>, scalar_prefetch = 0 : i64, scratch_operands = 0 : i64, tpu.core_type = #tpu.core_type<tc>, window_params = [{transform_indices = @transform_0, window_bounds = array<i64: 248, 408>}, {pipeline_mode = #tpu.pipeline_mode<synchronous>, transform_indices = @transform_1, window_bounds = array<i64: 408, 128>}, {transform_indices = @transform_2, window_bounds = array<i64: 248, 128>}]} {
    %c0 = arith.constant 0 : index
    %c0_0 = arith.constant 0 : index
    %0 = vector.load %arg1[%c0, %c0_0] : memref<248x408xf32, #tpu.memory_space<vmem>>, vector<248x408xf32>
    %c0_1 = arith.constant 0 : index
    %c0_2 = arith.constant 0 : index
    %1 = vector.load %arg2[%c0_1, %c0_2] : memref<408x128xf32, #tpu.memory_space<vmem>>, vector<408x128xf32>
    %cst = arith.constant dense<0.000000e+00> : vector<248x128xf32>
    %2 = tpu.matmul %0, %1, %cst {dimension_numbers = #tpu.dot_dimension_numbers<[1], [0], [0], [1], [0, 0, 1, 1], [], []>} : vector<248x408xf32>, vector<408x128xf32>, vector<248x128xf32> -> vector<248x128xf32>
    %c0_3 = arith.constant 0 : index
    %c0_4 = arith.constant 0 : index
    %3 = vector.load %arg3[%c0_3, %c0_4] : memref<248x128xf32, #tpu.memory_space<vmem>>, vector<248x128xf32>
    tpu.vector_store %arg3[%c0_3, %c0_4], %2 {strides = array<i32>} : memref<248x128xf32, #tpu.memory_space<vmem>>, vector<248x128xf32>,
    return
  }
  func.func @transform_0(%arg0: i32) -> (i32, i32) {
    %c0_i32 = arith.constant 0 : i32
    %c0_i32_0 = arith.constant 0 : i32
    return %arg0, %c0_i32 : i32, i32
  }
  func.func @transform_1(%arg0: i32) -> (i32, i32) {
    %c0_i32 = arith.constant 0 : i32
    %c0_i32_0 = arith.constant 0 : i32
    %c0_i32_1 = arith.constant 0 : i32
    return %c0_i32, %c0_i32_0 : i32, i32
  }
  func.func @transform_2(%arg0: i32) -> (i32, i32) {
    %c0_i32 = arith.constant 0 : i32
    %c0_i32_0 = arith.constant 0 : i32
    return %arg0, %c0_i32 : i32, i32
  }
}

module attributes {stable_mosaic.version = 11 : i64} {
  func.func @_conv_matmul_kernel(%arg0: i32, %arg1: memref<168x408xf32, #tpu.memory_space<vmem>>, %arg2: memref<408x128xf32, #tpu.memory_space<vmem>>, %arg3: memref<168x128xf32, #tpu.memory_space<vmem>>) attributes {dimension_semantics = [#tpu.dimension_semantics<parallel>], iteration_bounds = array<i64: 1>, scalar_prefetch = 0 : i64, scratch_operands = 0 : i64, tpu.core_type = #tpu.core_type<tc>, window_params = [{transform_indices = @transform_0, window_bounds = array<i64: 168, 408>}, {pipeline_mode = #tpu.pipeline_mode<synchronous>, transform_indices = @transform_1, window_bounds = array<i64: 408, 128>}, {transform_indices = @transform_2, window_bounds = array<i64: 168, 128>}]} {
    %c0 = arith.constant 0 : index
    %c0_0 = arith.constant 0 : index
    %0 = vector.load %arg1[%c0, %c0_0] : memref<168x408xf32, #tpu.memory_space<vmem>>, vector<168x408xf32>
    %c0_1 = arith.constant 0 : index
    %c0_2 = arith.constant 0 : index
    %1 = vector.load %arg2[%c0_1, %c0_2] : memref<408x128xf32, #tpu.memory_space<vmem>>, vector<408x128xf32>
    %cst = arith.constant dense<0.000000e+00> : vector<168x128xf32>
    %2 = tpu.matmul %0, %1, %cst {dimension_numbers = #tpu.dot_dimension_numbers<[1], [0], [0], [1], [0, 0, 1, 1], [], []>} : vector<168x408xf32>, vector<408x128xf32>, vector<168x128xf32> -> vector<168x128xf32>
    %c0_3 = arith.constant 0 : index
    %c0_4 = arith.constant 0 : index
    %3 = vector.load %arg3[%c0_3, %c0_4] : memref<168x128xf32, #tpu.memory_space<vmem>>, vector<168x128xf32>
    tpu.vector_store %arg3[%c0_3, %c0_4], %2 {strides = array<i32>} : memref<168x128xf32, #tpu.memory_space<vmem>>, vector<168x128xf32>,
    return
  }
  func.func @transform_0(%arg0: i32) -> (i32, i32) {
    %c0_i32 = arith.constant 0 : i32
    %c0_i32_0 = arith.constant 0 : i32
    return %arg0, %c0_i32 : i32, i32
  }
  func.func @transform_1(%arg0: i32) -> (i32, i32) {
    %c0_i32 = arith.constant 0 : i32
    %c0_i32_0 = arith.constant 0 : i32
    %c0_i32_1 = arith.constant 0 : i32
    return %c0_i32, %c0_i32_0 : i32, i32
  }
  func.func @transform_2(%arg0: i32) -> (i32, i32) {
    %c0_i32 = arith.constant 0 : i32
    %c0_i32_0 = arith.constant 0 : i32
    return %arg0, %c0_i32 : i32, i32
  }
}

module attributes {stable_mosaic.version = 11 : i64} {
  func.func @_mlp_kernel(%arg0: i32, %arg1: memref<2x162xf32, #tpu.memory_space<vmem>>, %arg2: memref<162x512xf32, #tpu.memory_space<vmem>>, %arg3: memref<1x512xf32, #tpu.memory_space<vmem>>, %arg4: memref<512x128xf32, #tpu.memory_space<vmem>>, %arg5: memref<1x128xf32, #tpu.memory_space<vmem>>, %arg6: memref<2x128xf32, #tpu.memory_space<vmem>>) attributes {dimension_semantics = [#tpu.dimension_semantics<arbitrary>], iteration_bounds = array<i64: 1>, scalar_prefetch = 0 : i64, scratch_operands = 0 : i64, tpu.core_type = #tpu.core_type<tc>, window_params = [{pipeline_mode = #tpu.pipeline_mode<synchronous>, transform_indices = @transform_0, window_bounds = array<i64: 2, 162>}, {pipeline_mode = #tpu.pipeline_mode<synchronous>, transform_indices = @transform_1, window_bounds = array<i64: 162, 512>}, {pipeline_mode = #tpu.pipeline_mode<synchronous>, transform_indices = @transform_2, window_bounds = array<i64: 1, 512>}, {pipeline_mode = #tpu.pipeline_mode<synchronous>, transform_indices = @transform_3, window_bounds = array<i64: 512, 128>}, {pipeline_mode = #tpu.pipeline_mode<synchronous>, transform_indices = @transform_4, window_bounds = array<i64: 1, 128>}, {pipeline_mode = #tpu.pipeline_mode<synchronous>, transform_indices = @transform_5, window_bounds = array<i64: 2, 128>}]} {
    %c0 = arith.constant 0 : index
    %c0_0 = arith.constant 0 : index
    %0 = vector.load %arg1[%c0, %c0_0] : memref<2x162xf32, #tpu.memory_space<vmem>>, vector<2x162xf32>
    %c0_1 = arith.constant 0 : index
    %c0_2 = arith.constant 0 : index
    %1 = vector.load %arg2[%c0_1, %c0_2] : memref<162x512xf32, #tpu.memory_space<vmem>>, vector<162x512xf32>
    %cst = arith.constant dense<0.000000e+00> : vector<2x512xf32>
    %2 = tpu.matmul %0, %1, %cst {dimension_numbers = #tpu.dot_dimension_numbers<[1], [0], [0], [1], [0, 0, 1, 1], [], []>} : vector<2x162xf32>, vector<162x512xf32>, vector<2x512xf32> -> vector<2x512xf32>
    %c0_3 = arith.constant 0 : index
    %c0_4 = arith.constant 0 : index
    %3 = vector.load %arg3[%c0_3, %c0_4] : memref<1x512xf32, #tpu.memory_space<vmem>>, vector<1x512xf32>
    %4 = vector.broadcast %3 : vector<1x512xf32> to vector<2x512xf32>
    %5 = arith.addf %2, %4 : vector<2x512xf32>
    %cst_5 = arith.constant 0.000000e+00 : f32
    %6 = vector.broadcast %cst_5 : f32 to vector<2x512xf32>
    %7 = arith.maximumf %5, %6 : vector<2x512xf32>
    %c0_6 = arith.constant 0 : index
    %c0_7 = arith.constant 0 : index
    %8 = vector.load %arg4[%c0_6, %c0_7] : memref<512x128xf32, #tpu.memory_space<vmem>>, vector<512x128xf32>
    %cst_8 = arith.constant dense<0.000000e+00> : vector<2x128xf32>
    %9 = tpu.matmul %7, %8, %cst_8 {dimension_numbers = #tpu.dot_dimension_numbers<[1], [0], [0], [1], [0, 0, 1, 1], [], []>} : vector<2x512xf32>, vector<512x128xf32>, vector<2x128xf32> -> vector<2x128xf32>
    %c0_9 = arith.constant 0 : index
    %c0_10 = arith.constant 0 : index
    %10 = vector.load %arg5[%c0_9, %c0_10] : memref<1x128xf32, #tpu.memory_space<vmem>>, vector<1x128xf32>
    %11 = vector.broadcast %10 : vector<1x128xf32> to vector<2x128xf32>
    %12 = arith.addf %9, %11 : vector<2x128xf32>
    %c0_11 = arith.constant 0 : index
    %c0_12 = arith.constant 0 : index
    %13 = vector.load %arg6[%c0_11, %c0_12] : memref<2x128xf32, #tpu.memory_space<vmem>>, vector<2x128xf32>
    tpu.vector_store %arg6[%c0_11, %c0_12], %12 {strides = array<i32>} : memref<2x128xf32, #tpu.memory_space<vmem>>, vector<2x128xf32>,
    return
  }
  func.func @transform_0(%arg0: i32) -> (i32, i32) {
    %c0_i32 = arith.constant 0 : i32
    %c0_i32_0 = arith.constant 0 : i32
    %c0_i32_1 = arith.constant 0 : i32
    return %c0_i32, %c0_i32_0 : i32, i32
  }
  func.func @transform_1(%arg0: i32) -> (i32, i32) {
    %c0_i32 = arith.constant 0 : i32
    %c0_i32_0 = arith.constant 0 : i32
    %c0_i32_1 = arith.constant 0 : i32
    return %c0_i32, %c0_i32_0 : i32, i32
  }
  func.func @transform_2(%arg0: i32) -> (i32, i32) {
    %c0_i32 = arith.constant 0 : i32
    %c0_i32_0 = arith.constant 0 : i32
    %c0_i32_1 = arith.constant 0 : i32
    return %c0_i32, %c0_i32_0 : i32, i32
  }
  func.func @transform_3(%arg0: i32) -> (i32, i32) {
    %c0_i32 = arith.constant 0 : i32
    %c0_i32_0 = arith.constant 0 : i32
    %c0_i32_1 = arith.constant 0 : i32
    return %c0_i32, %c0_i32_0 : i32, i32
  }
  func.func @transform_4(%arg0: i32) -> (i32, i32) {
    %c0_i32 = arith.constant 0 : i32
    %c0_i32_0 = arith.constant 0 : i32
    %c0_i32_1 = arith.constant 0 : i32
    return %c0_i32, %c0_i32_0 : i32, i32
  }
  func.func @transform_5(%arg0: i32) -> (i32, i32) {
    %c0_i32 = arith.constant 0 : i32
    %c0_i32_0 = arith.constant 0 : i32
    %c0_i32_1 = arith.constant 0 : i32
    return %c0_i32, %c0_i32_0 : i32, i32
  }
}

</mosaic_0001>

<bundles_post_ra>
// kernel: kanc_mlp_forward.7
= control target key start
LH: loop header
LB: loop body
LE: loop exit
PB: predicated region body
PF: predicated region fallthrough
CT: control target
= control target key end

     0   :  { %v495_v6 = vmov 0.0   ;;  %s784_s0 = inlined_call_operand.vmem [shape: f32[1,16,128], index: 0, kind: input, shape index: {}]   ;;  %s785_s1 = inlined_call_operand.vmem [shape: f32[9,16,128], index: 1, kind: output, shape index: {}]  }
   0x1   :  { %v509_v0 = vld [vmem:[%s784_s0] sm:$0xff]  ;;  %v514_v1 = vld [vmem:[%s784_s0 + $0x8] sm:$0xff] }
   0x2   :  { %v10_v2 = vsub.f32 0.0, %v509_v0  ;;  %v11_v3 = vsub.f32 0.0, %v514_v1  ;;  %vm22_vm0 = vcmp.ge.f32.partialorder %v509_v0, -2.2  ;;  %vm24_vm1 = vcmp.lt.f32.partialorder %v509_v0, -1.8 }
   0x3   :  { %vm26_vm2 = vmand %vm22_vm0, %vm24_vm1  ;;  %vm30_vm3 = vcmp.ge.f32.partialorder %v509_v0, -1.8  ;;  %vm32_vm4 = vcmp.lt.f32.partialorder %v509_v0, -1.4  ;;  %vm38_vm5 = vcmp.ge.f32.partialorder %v509_v0, -1.4 }
   0x4   :  { %v12_v4 = vmul.f32 1.442695, %v10_v2  ;;  %v14_v5 = vmul.f32 1.442695, %v11_v3  ;;  %v28_v7 = vsel %vm26_vm2, 1.0, %v495_v6  ;;  %vm34_vm6 = vmand %vm30_vm3, %vm32_vm4  ;;  %vm40_vm7 = vcmp.lt.f32.partialorder %v509_v0, -1.0 }
   0x5   :  { %v36_v8 = vsel %vm34_vm6, 1.0, %v495_v6  ;;  %vm42_vm8 = vmand %vm38_vm5, %vm40_vm7  ;;  %vm46_vm9 = vcmp.ge.f32.partialorder %v509_v0, -1.0  ;;  %vm48_vm10 = vcmp.lt.f32.partialorder %v509_v0, -0.6  ;;  %v529_v9 = vmul.f32 2.5, %v509_v0 }
   0x6   :  { %487 = vpow2.f32 %v12_v4  ;;  %v44_v10 = vsel %vm42_vm8, 1.0, %v495_v6  ;;  %vm50_vm11 = vmand %vm46_vm9, %vm48_vm10  ;;  %v533_v11 = vmul.f32 1.25, %v509_v0  ;;  %v536_v12 = vmul.f32 0.8333333, %v509_v0 }
   0x7   :  { %489 = vpow2.f32 %v14_v5  ;;  %v539_v13 = vsel %vm50_vm11, 1.0, %v495_v6  ;;  %v416_v14 = vadd.f32 5.5, %v529_v9  ;;  %v116_v15 = vsub.f32 -3.5, %v529_v9 }
   0x8   :  { %v418_v16 = vadd.f32 4.5, %v529_v9  ;;  %v126_v17 = vsub.f32 -2.5, %v529_v9  ;;  %v420_v18 = vadd.f32 3.5, %v529_v9  ;;  %v136_v19 = vsub.f32 -1.5, %v529_v9 }
   0x9   :  { %v114_v20 = vmul.f32 %v416_v14, %v28_v7  ;;  %v118_v21 = vmul.f32 %v116_v15, %v36_v8  ;;  %v436_v22 = vadd.f32 2.75, %v533_v11  ;;  %v218_v23 = vsub.f32 -1.25, %v533_v11 }
   0xa   :  { %v124_v24 = vmul.f32 %v418_v16, %v36_v8  ;;  %v128_v25 = vmul.f32 %v126_v17, %v44_v10  ;;  %v134_v26 = vmul.f32 %v420_v18, %v44_v10  ;;  %v138_v27 = vmul.f32 %v136_v19, %v539_v13 }
   0xb   :  { %v120_v28 = vadd.f32 %v118_v21, %v114_v20  ;;  %v438_v29 = vadd.f32 2.25, %v533_v11  ;;  %v228_v30 = vsub.f32 -0.75, %v533_v11  ;;  %v454_v31 = vadd.f32 1.8333334, %v536_v12 }
   0xc   :  { %v130_v32 = vadd.f32 %v128_v25, %v124_v24  ;;  %v553_v33 = vadd.f32 %v138_v27, %v134_v26  ;;  %v310_v34 = vsub.f32 -0.5, %v536_v12  ;;  %vm23_vm12 = vcmp.ge.f32.partialorder %v514_v1, -2.2 }
   0xd   :  { %v216_v35 = vmul.f32 %v436_v22, %v120_v28  ;;  %vm25_vm13 = vcmp.lt.f32.partialorder %v514_v1, -1.8  ;;  %vm31_vm14 = vcmp.ge.f32.partialorder %v514_v1, -1.8  ;;  %vm33_vm15 = vcmp.lt.f32.partialorder %v514_v1, -1.4 }
   0xe   :  { %v220_v36 = vmul.f32 %v218_v23, %v130_v32  ;;  %v226_v37 = vmul.f32 %v438_v29, %v130_v32  ;;  %v230_v38 = vmul.f32 %v228_v30, %v553_v33  ;;  %vm27_vm0 = vmand %vm23_vm12, %vm25_vm13  ;;  %vm39_vm1 = vcmp.ge.f32.partialorder %v514_v1, -1.4 }
   0xf   :  { %v29_v39 = vsel %vm27_vm0, 1.0, %v495_v6  ;;  %vm35_vm2 = vmand %vm31_vm14, %vm33_vm15  ;;  %vm41_vm3 = vcmp.lt.f32.partialorder %v514_v1, -1.0  ;;  %vm47_vm4 = vcmp.ge.f32.partialorder %v514_v1, -1.0  ;;  %vm49_vm5 = vcmp.lt.f32.partialorder %v514_v1, -0.6 }
  0x10   :  { %v222_v40 = vadd.f32 %v220_v36, %v216_v35  ;;  %v566_v41 = vadd.f32 %v230_v38, %v226_v37  ;;  %v37_v42 = vsel %vm35_vm2, 1.0, %v495_v6  ;;  %vm43_vm6 = vmand %vm39_vm1, %vm41_vm3  ;;  %v570_v43 = vmul.f32 2.5, %v514_v1 }
  0x11   :  { %v45_v44 = vsel %vm43_vm6, 1.0, %v495_v6  ;;  %vm51_vm7 = vmand %vm47_vm4, %vm49_vm5  ;;  %v574_v45 = vmul.f32 1.25, %v514_v1  ;;  %v577_v46 = vmul.f32 0.8333333, %v514_v1  ;;  %vm54_vm8 = vcmp.ge.f32.partialorder %v509_v0, -0.6 }
  0x12   :  { %v308_v47 = vmul.f32 %v454_v31, %v222_v40  ;;  %v312_v48 = vmul.f32 %v310_v34, %v566_v41  ;;  %v582_v49 = vsel %vm51_vm7, 1.0, %v495_v6  ;;  %v417_v50 = vadd.f32 5.5, %v570_v43 }
  0x13   :  { %v488_v51 = vpop.eup %487  ;;  %v117_v52 = vsub.f32 -3.5, %v570_v43  ;;  %v419_v53 = vadd.f32 4.5, %v570_v43  ;;  %v127_v54 = vsub.f32 -2.5, %v570_v43  ;;  %v421_v55 = vadd.f32 3.5, %v570_v43 }
  0x14   :  { %v490_v56 = vpop.eup %489  ;;  %v16_v57 = vadd.f32 1.0, %v488_v51  ;;  %v314_v58 = vadd.f32 %v312_v48, %v308_v47  ;;  %v115_v59 = vmul.f32 %v417_v50, %v29_v39  ;;  %v137_v60 = vsub.f32 -1.5, %v570_v43 }
  0x15   :  { %v17_v61 = vadd.f32 1.0, %v490_v56  ;;  %v119_v62 = vmul.f32 %v117_v52, %v37_v42  ;;  %v125_v63 = vmul.f32 %v419_v53, %v37_v42  ;;  %v129_v2 = vmul.f32 %v127_v54, %v45_v44 }
  0x16   :  { %491 = vrcp.f32 %v16_v57  ;;  %470 = vst [vmem:[%s785_s1 + $0x10] sm:$0xff] %v314_v58  ;;  %v135_v3 = vmul.f32 %v421_v55, %v45_v44  ;;  %v139_v4 = vmul.f32 %v137_v60, %v582_v49  ;;  %v437_v5 = vadd.f32 2.75, %v574_v45 }
  0x17   :  { %493 = vrcp.f32 %v17_v61  ;;  %v121_v7 = vadd.f32 %v119_v62, %v115_v59  ;;  %v131_v8 = vadd.f32 %v129_v2, %v125_v63  ;;  %v219_v10 = vsub.f32 -1.25, %v574_v45 }
  0x18   :  { %v141_v14 = vadd.f32 %v139_v4, %v135_v3  ;;  %v439_v15 = vadd.f32 2.25, %v574_v45  ;;  %v229_v16 = vsub.f32 -0.75, %v574_v45  ;;  %v455_v17 = vadd.f32 1.8333334, %v577_v46 }
  0x19   :  { %v217_v18 = vmul.f32 %v437_v5, %v121_v7  ;;  %v221_v19 = vmul.f32 %v219_v10, %v131_v8  ;;  %v311_v20 = vsub.f32 -0.5, %v577_v46  ;;  %vm56_vm9 = vcmp.lt.f32.partialorder %v509_v0, -0.2 }
  0x1a   :  { %v227_v21 = vmul.f32 %v439_v15, %v131_v8  ;;  %v231_v22 = vmul.f32 %v229_v16, %v141_v14  ;;  %vm58_vm10 = vmand %vm54_vm8, %vm56_vm9  ;;  %v422_v23 = vadd.f32 2.5, %v529_v9  ;;  %v146_v24 = vsub.f32 -0.5, %v529_v9 }
  0x1b   :  { %v223_v25 = vadd.f32 %v221_v19, %v217_v18  ;;  %v60_v26 = vsel %vm58_vm10, 1.0, %v495_v6  ;;  %v440_v27 = vadd.f32 1.75, %v533_v11  ;;  %v238_v28 = vsub.f32 -0.25, %v533_v11 }
  0x1c   :  { %v233_v29 = vadd.f32 %v231_v22, %v227_v21  ;;  %v144_v30 = vmul.f32 %v422_v23, %v539_v13  ;;  %v148_v31 = vmul.f32 %v146_v24, %v60_v26  ;;  %v456_v32 = vadd.f32 1.5, %v536_v12 }
  0x1d   :  { %v309_v34 = vmul.f32 %v455_v17, %v223_v25  ;;  %v236_v35 = vmul.f32 %v440_v27, %v553_v33  ;;  %vm55_vm11 = vcmp.ge.f32.partialorder %v514_v1, -0.6  ;;  %v320_v38 = vsub.f32 -0.16666667, %v536_v12 }
  0x1e   :  { %v313_v36 = vmul.f32 %v311_v20, %v233_v29  ;;  %v150_v37 = vadd.f32 %v148_v31, %v144_v30  ;;  %vm57_vm12 = vcmp.lt.f32.partialorder %v514_v1, -0.2  ;;  %v318_v39 = vmul.f32 %v456_v32, %v566_v41 }
  0x1f   :  { %vm59_vm13 = vmand %vm55_vm11, %vm57_vm12  ;;  %v423_v40 = vadd.f32 2.5, %v570_v43  ;;  %v147_v13 = vsub.f32 -0.5, %v570_v43  ;;  %v441_v42 = vadd.f32 1.75, %v574_v45  ;;  %v239_v48 = vsub.f32 -0.25, %v574_v45 }
  0x20   :  { %v315_v44 = vadd.f32 %v313_v36, %v309_v34  ;;  %v240_v47 = vmul.f32 %v238_v28, %v150_v37  ;;  %v61_v33 = vsel %vm59_vm13, 1.0, %v495_v6  ;;  %v457_v53 = vadd.f32 1.5, %v577_v46 }
  0x21   :  { %v145_v50 = vmul.f32 %v423_v40, %v582_v49  ;;  %v149_v51 = vmul.f32 %v147_v13, %v61_v33  ;;  %v237_v52 = vmul.f32 %v441_v42, %v141_v14  ;;  %v321_v54 = vsub.f32 -0.16666667, %v577_v46 }
  0x22   :  { %471 = vst [vmem:[%s785_s1 + $0x18] sm:$0xff] %v315_v44  ;;  %v242_v41 = vadd.f32 %v240_v47, %v236_v35  ;;  %vm62_vm14 = vcmp.ge.f32.partialorder %v509_v0, -0.2  ;;  %vm64_vm15 = vcmp.lt.f32.partialorder %v509_v0, 0.2  ;;  %v424_v49 = vadd.f32 1.5, %v529_v9 }
  0x23   :  { %v492_v55 = vpop.eup %491  ;;  %v151_v56 = vadd.f32 %v149_v51, %v145_v50  ;;  %vm66_vm0 = vmand %vm62_vm14, %vm64_vm15  ;;  %v156_v57 = vsub.f32 0.5, %v529_v9  ;;  %v442_v58 = vadd.f32 1.25, %v533_v11  ;;  %v248_v63 = vsub.f32 0.25, %v533_v11 }
  0x24   :  { %v494_v59 = vpop.eup %493  ;;  %v19_v60 = vmul.f32 %v492_v55, %v509_v0  ;;  %v322_v61 = vmul.f32 %v320_v38, %v242_v41  ;;  %v68_v62 = vsel %vm66_vm0, 1.0, %v495_v6  ;;  %v154_v4 = vmul.f32 %v424_v49, %v60_v26 }
  0x25   :  { %v21_v2 = vmul.f32 %v494_v59, %v514_v1  ;;  %v241_v3 = vmul.f32 %v239_v48, %v151_v56  ;;  %v158_v5 = vmul.f32 %v156_v57, %v68_v62  ;;  %v319_v8 = vmul.f32 %v457_v53, %v233_v29 }
  0x26   :  { %386 = vst [vmem:[%s785_s1] sm:$0xff] %v19_v60  ;;  %v324_v7 = vadd.f32 %v322_v61, %v318_v39  ;;  %v246_v10 = vmul.f32 %v442_v58, %v150_v37  ;;  %v458_v14 = vadd.f32 1.1666666, %v536_v12  ;;  %vm63_vm1 = vcmp.ge.f32.partialorder %v514_v1, -0.2 }
  0x27   :  { %387 = vst [vmem:[%s785_s1 + $0x8] sm:$0xff] %v21_v2  ;;  %v243_v15 = vadd.f32 %v241_v3, %v237_v52  ;;  %v160_v16 = vadd.f32 %v158_v5, %v154_v4  ;;  %vm65_vm2 = vcmp.lt.f32.partialorder %v514_v1, 0.2  ;;  %v425_v17 = vadd.f32 1.5, %v570_v43 }
  0x28   :  { %472 = vst [vmem:[%s785_s1 + $0x20] sm:$0xff] %v324_v7  ;;  %vm67_vm3 = vmand %vm63_vm1, %vm65_vm2  ;;  %v157_v18 = vsub.f32 0.5, %v570_v43  ;;  %v443_v19 = vadd.f32 1.25, %v574_v45  ;;  %v330_v22 = vsub.f32 0.16666667, %v536_v12  ;;  %v249_v26 = vsub.f32 0.25, %v574_v45 }
  0x29   :  { %v323_v20 = vmul.f32 %v321_v54, %v243_v15  ;;  %v250_v21 = vmul.f32 %v248_v63, %v160_v16  ;;  %v69_v23 = vsel %vm67_vm3, 1.0, %v495_v6  ;;  %v155_v24 = vmul.f32 %v425_v17, %v61_v33 }
  0x2a   :  { %v159_v25 = vmul.f32 %v157_v18, %v69_v23  ;;  %v459_v27 = vadd.f32 1.1666666, %v577_v46  ;;  %v328_v30 = vmul.f32 %v458_v14, %v242_v41  ;;  %vm70_vm4 = vcmp.ge.f32.partialorder %v509_v0, 0.2 }
  0x2b   :  { %v325_v28 = vadd.f32 %v323_v20, %v319_v8  ;;  %v252_v29 = vadd.f32 %v250_v21, %v246_v10  ;;  %v247_v32 = vmul.f32 %v443_v19, %v151_v56  ;;  %vm72_vm5 = vcmp.lt.f32.partialorder %v509_v0, 0.6 }
  0x2c   :  { %v161_v31 = vadd.f32 %v159_v25, %v155_v24  ;;  %v426_v34 = vadd.f32 0.5, %v529_v9  ;;  %v331_v36 = vsub.f32 0.16666667, %v577_v46  ;;  %vm74_vm6 = vmand %vm70_vm4, %vm72_vm5  ;;  %v166_v37 = vsub.f32 1.5, %v529_v9 }
  0x2d   :  { %473 = vst [vmem:[%s785_s1 + $0x28] sm:$0xff] %v325_v28  ;;  %v332_v35 = vmul.f32 %v330_v22, %v252_v29  ;;  %v444_v38 = vadd.f32 0.75, %v533_v11  ;;  %v329_v40 = vmul.f32 %v459_v27, %v243_v15  ;;  %v76_v13 = vsel %vm74_vm6, 1.0, %v495_v6 }
  0x2e   :  { %v251_v39 = vmul.f32 %v249_v26, %v161_v31  ;;  %v164_v42 = vmul.f32 %v426_v34, %v68_v62  ;;  %v168_v47 = vmul.f32 %v166_v37, %v76_v13  ;;  %v258_v33 = vsub.f32 0.75, %v533_v11 }
  0x2f   :  { %v334_v44 = vadd.f32 %v332_v35, %v328_v30  ;;  %v460_v48 = vadd.f32 0.8333333, %v536_v12  ;;  %v256_v51 = vmul.f32 %v444_v38, %v160_v16  ;;  %vm71_vm7 = vcmp.ge.f32.partialorder %v514_v1, 0.2 }
  0x30   :  { %v253_v50 = vadd.f32 %v251_v39, %v247_v32  ;;  %vm73_vm8 = vcmp.lt.f32.partialorder %v514_v1, 0.6  ;;  %v170_v52 = vadd.f32 %v168_v47, %v164_v42  ;;  %v427_v53 = vadd.f32 0.5, %v570_v43 }
  0x31   :  { %474 = vst [vmem:[%s785_s1 + $0x30] sm:$0xff] %v334_v44  ;;  %vm75_vm9 = vmand %vm71_vm7, %vm73_vm8  ;;  %v167_v41 = vsub.f32 1.5, %v570_v43  ;;  %v445_v54 = vadd.f32 0.75, %v574_v45  ;;  %v340_v56 = vsub.f32 0.5, %v536_v12  ;;  %v461_v57 = vadd.f32 0.8333333, %v577_v46 }
  0x32   :  { %v333_v55 = vmul.f32 %v331_v36, %v253_v50  ;;  %v77_v49 = vsel %vm75_vm9, 1.0, %v495_v6  ;;  %v260_v58 = vmul.f32 %v258_v33, %v170_v52  ;;  %v165_v59 = vmul.f32 %v427_v53, %v69_v23 }
  0x33   :  { %v169_v60 = vmul.f32 %v167_v41, %v77_v49  ;;  %v259_v61 = vsub.f32 0.75, %v574_v45  ;;  %v338_v63 = vmul.f32 %v460_v48, %v252_v29  ;;  %v257_v2 = vmul.f32 %v445_v54, %v161_v31 }
  0x34   :  { %v335_v62 = vadd.f32 %v333_v55, %v329_v40  ;;  %vm78_vm10 = vcmp.ge.f32.partialorder %v509_v0, 0.6  ;;  %v262_v3 = vadd.f32 %v260_v58, %v256_v51  ;;  %vm80_vm11 = vcmp.lt.f32.partialorder %v509_v0, 1.0 }
  0x35   :  { %v171_v4 = vadd.f32 %v169_v60, %v165_v59  ;;  %v428_v5 = vadd.f32 -0.5, %v529_v9  ;;  %v339_v7 = vmul.f32 %v461_v57, %v253_v50  ;;  %v341_v8 = vsub.f32 0.5, %v577_v46  ;;  %vm82_vm12 = vmand %vm78_vm10, %vm80_vm11 }
  0x36   :  { %475 = vst [vmem:[%s785_s1 + $0x38] sm:$0xff] %v335_v62  ;;  %v176_v10 = vsub.f32 2.5, %v529_v9  ;;  %v446_v14 = vadd.f32 0.25, %v533_v11  ;;  %v342_v15 = vmul.f32 %v340_v56, %v262_v3  ;;  %v84_v17 = vsel %vm82_vm12, 1.0, %v495_v6 }
  0x37   :  { %v261_v16 = vmul.f32 %v259_v61, %v171_v4  ;;  %v174_v18 = vmul.f32 %v428_v5, %v76_v13  ;;  %v268_v21 = vsub.f32 1.25, %v533_v11  ;;  %v462_v22 = vadd.f32 0.5, %v536_v12 }
  0x38   :  { %v178_v19 = vmul.f32 %v176_v10, %v84_v17  ;;  %v266_v20 = vmul.f32 %v446_v14, %v170_v52  ;;  %v344_v23 = vadd.f32 %v342_v15, %v338_v63  ;;  %vm79_vm13 = vcmp.ge.f32.partialorder %v514_v1, 0.6 }
  0x39   :  { %v263_v24 = vadd.f32 %v261_v16, %v257_v2  ;;  %vm81_vm14 = vcmp.lt.f32.partialorder %v514_v1, 1.0  ;;  %v429_v26 = vadd.f32 -0.5, %v570_v43  ;;  %v177_v27 = vsub.f32 2.5, %v570_v43 }
  0x3a   :  { %v180_v25 = vadd.f32 %v178_v19, %v174_v18  ;;  %vm83_vm15 = vmand %vm79_vm13, %vm81_vm14  ;;  %v447_v28 = vadd.f32 0.25, %v574_v45  ;;  %476 = vst [vmem:[%s785_s1 + $0x40] sm:$0xff] %v344_v23  ;;  %v350_v30 = vsub.f32 0.8333333, %v536_v12  ;;  %v463_v32 = vadd.f32 0.5, %v577_v46 }
  0x3b   :  { %v343_v29 = vmul.f32 %v341_v8, %v263_v24  ;;  %v85_v31 = vsel %vm83_vm15, 1.0, %v495_v6  ;;  %v175_v35 = vmul.f32 %v429_v26, %v77_v49  ;;  %v269_v37 = vsub.f32 1.25, %v574_v45 }
  0x3c   :  { %v270_v34 = vmul.f32 %v268_v21, %v180_v25  ;;  %v179_v36 = vmul.f32 %v177_v27, %v85_v31  ;;  %v348_v39 = vmul.f32 %v462_v22, %v262_v3  ;;  %v267_v40 = vmul.f32 %v447_v28, %v171_v4 }
  0x3d   :  { %v345_v38 = vadd.f32 %v343_v29, %v339_v7  ;;  %vm86_vm0 = vcmp.ge.f32.partialorder %v509_v0, 1.0  ;;  %vm88_vm1 = vcmp.lt.f32.partialorder %v509_v0, 1.4  ;;  %v430_v44 = vadd.f32 -1.5, %v529_v9 }
  0x3e   :  { %v272_v13 = vadd.f32 %v270_v34, %v266_v20  ;;  %v181_v42 = vadd.f32 %v179_v36, %v175_v35  ;;  %v349_v47 = vmul.f32 %v463_v32, %v263_v24  ;;  %v351_v33 = vsub.f32 0.8333333, %v577_v46  ;;  %vm90_vm2 = vmand %vm86_vm0, %vm88_vm1 }
  0x3f   :  { %477 = vst [vmem:[%s785_s1 + $0x48] sm:$0xff] %v345_v38  ;;  %v186_v48 = vsub.f32 3.5, %v529_v9  ;;  %v448_v50 = vadd.f32 -0.25, %v533_v11  ;;  %v92_v53 = vsel %vm90_vm2, 1.0, %v495_v6  ;;  %v184_v41 = vmul.f32 %v430_v44, %v84_v17 }
  0x40   :  { %v352_v51 = vmul.f32 %v350_v30, %v272_v13  ;;  %v271_v52 = vmul.f32 %v269_v37, %v181_v42  ;;  %v278_v56 = vsub.f32 1.75, %v533_v11  ;;  %v464_v49 = vadd.f32 0.16666667, %v536_v12 }
  0x41   :  { %v188_v54 = vmul.f32 %v186_v48, %v92_v53  ;;  %v276_v55 = vmul.f32 %v448_v50, %v180_v25  ;;  %vm87_vm3 = vcmp.ge.f32.partialorder %v514_v1, 1.0  ;;  %vm89_vm4 = vcmp.lt.f32.partialorder %v514_v1, 1.4 }
  0x42   :  { %v354_v57 = vadd.f32 %v352_v51, %v348_v39  ;;  %v273_v58 = vadd.f32 %v271_v52, %v267_v40  ;;  %vm91_vm5 = vmand %vm87_vm3, %vm89_vm4  ;;  %v431_v60 = vadd.f32 -1.5, %v570_v43  ;;  %v187_v61 = vsub.f32 3.5, %v570_v43 }
  0x43   :  { %v190_v59 = vadd.f32 %v188_v54, %v184_v41  ;;  %v449_v62 = vadd.f32 -0.25, %v574_v45  ;;  %v360_v2 = vsub.f32 1.1666666, %v536_v12  ;;  %v93_v3 = vsel %vm91_vm5, 1.0, %v495_v6 }
  0x44   :  { %478 = vst [vmem:[%s785_s1 + $0x50] sm:$0xff] %v354_v57  ;;  %v353_v63 = vmul.f32 %v351_v33, %v273_v58  ;;  %v465_v4 = vadd.f32 0.16666667, %v577_v46  ;;  %v185_v7 = vmul.f32 %v431_v60, %v85_v31  ;;  %v189_v8 = vmul.f32 %v187_v61, %v93_v3 }
  0x45   :  { %v280_v5 = vmul.f32 %v278_v56, %v190_v59  ;;  %v279_v10 = vsub.f32 1.75, %v574_v45  ;;  %v358_v15 = vmul.f32 %v464_v49, %v272_v13  ;;  %v277_v16 = vmul.f32 %v449_v62, %v181_v42 }
  0x46   :  { %v355_v14 = vadd.f32 %v353_v63, %v349_v47  ;;  %vm94_vm6 = vcmp.ge.f32.partialorder %v509_v0, 1.4  ;;  %v191_v18 = vadd.f32 %v189_v8, %v185_v7  ;;  %vm96_vm7 = vcmp.lt.f32.partialorder %v509_v0, 1.8 }
  0x47   :  { %v282_v17 = vadd.f32 %v280_v5, %v276_v55  ;;  %v432_v19 = vadd.f32 -2.5, %v529_v9  ;;  %v359_v20 = vmul.f32 %v465_v4, %v273_v58  ;;  %v361_v21 = vsub.f32 1.1666666, %v577_v46  ;;  %vm98_vm8 = vmand %vm94_vm6, %vm96_vm7 }
  0x48   :  { %479 = vst [vmem:[%s785_s1 + $0x58] sm:$0xff] %v355_v14  ;;  %v196_v22 = vsub.f32 4.5, %v529_v9  ;;  %v450_v23 = vadd.f32 -0.75, %v533_v11  ;;  %v281_v25 = vmul.f32 %v279_v10, %v191_v18  ;;  %v100_v26 = vsel %vm98_vm8, 1.0, %v495_v6 }
  0x49   :  { %v362_v24 = vmul.f32 %v360_v2, %v282_v17  ;;  %v194_v27 = vmul.f32 %v432_v19, %v92_v53  ;;  %v288_v30 = vsub.f32 2.25, %v533_v11  ;;  %v466_v31 = vadd.f32 -0.16666667, %v536_v12 }
  0x4a   :  { %v198_v28 = vmul.f32 %v196_v22, %v100_v26  ;;  %v286_v29 = vmul.f32 %v450_v23, %v190_v59  ;;  %v283_v34 = vadd.f32 %v281_v25, %v277_v16  ;;  %vm95_vm9 = vcmp.ge.f32.partialorder %v514_v1, 1.4 }
  0x4b   :  { %v364_v32 = vadd.f32 %v362_v24, %v358_v15  ;;  %vm97_vm10 = vcmp.lt.f32.partialorder %v514_v1, 1.8  ;;  %v433_v36 = vadd.f32 -2.5, %v570_v43  ;;  %v197_v37 = vsub.f32 4.5, %v570_v43 }
  0x4c   :  { %v200_v35 = vadd.f32 %v198_v28, %v194_v27  ;;  %vm99_vm11 = vmand %vm95_vm9, %vm97_vm10  ;;  %v451_v38 = vadd.f32 -0.75, %v574_v45  ;;  %v363_v39 = vmul.f32 %v361_v21, %v283_v34  ;;  %v370_v40 = vsub.f32 1.5, %v536_v12 }
  0x4d   :  { %480 = vst [vmem:[%s785_s1 + $0x60] sm:$0xff] %v364_v32  ;;  %v101_v13 = vsel %vm99_vm11, 1.0, %v495_v6  ;;  %v467_v42 = vadd.f32 -0.16666667, %v577_v46  ;;  %v195_v47 = vmul.f32 %v433_v36, %v93_v3  ;;  %v289_v48 = vsub.f32 2.25, %v574_v45 }
  0x4e   :  { %v290_v44 = vmul.f32 %v288_v30, %v200_v35  ;;  %v199_v33 = vmul.f32 %v197_v37, %v101_v13  ;;  %v365_v50 = vadd.f32 %v363_v39, %v359_v20  ;;  %v368_v51 = vmul.f32 %v466_v31, %v282_v17 }
  0x4f   :  { %v287_v52 = vmul.f32 %v451_v38, %v191_v18  ;;  %vm102_vm12 = vcmp.ge.f32.partialorder %v509_v0, 1.8  ;;  %vm104_vm13 = vcmp.lt.f32.partialorder %v509_v0, 2.2  ;;  %v434_v54 = vadd.f32 -3.5, %v529_v9 }
  0x50   :  { %v292_v53 = vadd.f32 %v290_v44, %v286_v29  ;;  %v201_v41 = vadd.f32 %v199_v33, %v195_v47  ;;  %481 = vst [vmem:[%s785_s1 + $0x68] sm:$0xff] %v365_v50  ;;  %v369_v55 = vmul.f32 %v467_v42, %v283_v34  ;;  %v371_v56 = vsub.f32 1.5, %v577_v46  ;;  %vm106_vm14 = vmand %vm102_vm12, %vm104_vm13 }
  0x51   :  { %v206_v49 = vsub.f32 5.5, %v529_v9  ;;  %v452_v57 = vadd.f32 -1.25, %v533_v11  ;;  %v108_v60 = vsel %vm106_vm14, 1.0, %v495_v6  ;;  %v204_v61 = vmul.f32 %v434_v54, %v100_v26 }
  0x52   :  { %v372_v58 = vmul.f32 %v370_v40, %v292_v53  ;;  %v291_v59 = vmul.f32 %v289_v48, %v201_v41  ;;  %v298_v63 = vsub.f32 2.75, %v533_v11  ;;  %v468_v2 = vadd.f32 -0.5, %v536_v12 }
  0x53   :  { %v208_v0 = vmul.f32 %v206_v49, %v108_v60  ;;  %v296_v62 = vmul.f32 %v452_v57, %v200_v35  ;;  %vm103_vm15 = vcmp.ge.f32.partialorder %v514_v1, 1.8  ;;  %vm105_vm0 = vcmp.lt.f32.partialorder %v514_v1, 2.2 }
  0x54   :  { %v374_v3 = vadd.f32 %v372_v58, %v368_v51  ;;  %v293_v4 = vadd.f32 %v291_v59, %v287_v52  ;;  %vm107_vm1 = vmand %vm103_vm15, %vm105_vm0  ;;  %v435_v5 = vadd.f32 -3.5, %v570_v43  ;;  %v207_v7 = vsub.f32 5.5, %v570_v43 }
  0x55   :  { %v210_v9 = vadd.f32 %v208_v0, %v204_v61  ;;  %v453_v8 = vadd.f32 -1.25, %v574_v45  ;;  %v380_v10 = vsub.f32 1.8333334, %v536_v12  ;;  %v109_v14 = vsel %vm107_vm1, 1.0, %v495_v6 }
  0x56   :  { %482 = vst [vmem:[%s785_s1 + $0x70] sm:$0xff] %v374_v3  ;;  %v373_v11 = vmul.f32 %v371_v56, %v293_v4  ;;  %v205_v16 = vmul.f32 %v435_v5, %v101_v13  ;;  %v209_v1 = vmul.f32 %v207_v7, %v109_v14  ;;  %v299_v17 = vsub.f32 2.75, %v574_v45 }
  0x57   :  { %v300_v15 = vmul.f32 %v298_v63, %v210_v9  ;;  %v378_v19 = vmul.f32 %v468_v2, %v292_v53  ;;  %v297_v21 = vmul.f32 %v453_v8, %v201_v41  ;;  %v469_v22 = vadd.f32 -0.5, %v577_v46 }
  0x58   :  { %v375_v18 = vadd.f32 %v373_v11, %v369_v55  ;;  %v211_v43 = vadd.f32 %v209_v1, %v205_v16  ;;  %v381_v6 = vsub.f32 1.8333334, %v577_v46 }
  0x59   :  { %v302_v20 = vadd.f32 %v300_v15, %v296_v62  ;;  %v379_v26 = vmul.f32 %v469_v22, %v293_v4 }
  0x5a   :  { %483 = vst [vmem:[%s785_s1 + $0x78] sm:$0xff] %v375_v18  ;;  %v301_v12 = vmul.f32 %v299_v17, %v211_v43 }
  0x5b   :  { %v382_v23 = vmul.f32 %v380_v10, %v302_v20 }
  0x5c   :  { %v303_v25 = vadd.f32 %v301_v12, %v297_v21 }
  0x5d   :  { %v384_v24 = vadd.f32 %v382_v23, %v378_v19 }
  0x5e   :  { %v383_v45 = vmul.f32 %v381_v6, %v303_v25 }
  0x5f   :  { %484 = vst [vmem:[%s785_s1 + $0x80] sm:$0xff] %v384_v24 }
  0x60   :  { %v385_v27 = vadd.f32 %v383_v45, %v379_v26 }
  0x62   :  { %485 = vst [vmem:[%s785_s1 + $0x88] sm:$0xff] %v385_v27 }

// kernel: kanc_mlp_forward.8
= control target key start
LH: loop header
LB: loop body
LE: loop exit
PB: predicated region body
PF: predicated region fallthrough
CT: control target
= control target key end

     0   :  { %s1654_s9 = smov 0   ;;  %s2162_s0 = inlined_call_operand.vmem [shape: f32[1360,88], index: 0, kind: input, shape index: {}]   ;;  %s2163_s1 = inlined_call_operand.vmem [shape: f32[88,128], index: 1, kind: input, shape index: {}]   ;;  %s2164_s2 = inlined_call_operand.vmem [shape: f32[1360,128], index: 2, kind: output, shape index: {}]  }
   0x1 LB: > { %s1130_s10 = sadd.s32 4294967295, %s1635_s9   ;;  %p1134_p0 = scmp.ge.s32.totalorder %s1635_s9, 1  ;;  %s1635_s9 = sphi %s1654_s9, %s12_s9  }
   0x2   : > { %p113_p1 = scmp.lt.s32.totalorder %s1635_s9, 3 }
   0x4   : > { %p114_p2 = pnand %p1134_p0, %p113_p1 }
   0x5   : > { %s135_s15 = smul.u32 (!%p114_p2), 85, %s1130_s10 }
   0x6   : > { %117 = sbr.rel (%p114_p2) target bundleno = 397 (0x18d), region = 28 }
   0x7   : > { %p136_p3 = scmp.lt.s32.totalorder (!%p114_p2), %s135_s15, 169 }
   0xb   : > { %v242_v0 = vld [vmem:[%s2163_s1 + $0x50] sm:$0xff]  ;;  %v1637_v1 = vmov 0.0   ;;  %v241_v2 = vld [vmem:[%s2163_s1 + $0x48] sm:$0xff]  ;;  %v240_v3 = vld [vmem:[%s2163_s1 + $0x40] sm:$0xff]  ;;  %s2166_s15 = smov (!%p136_p3, %s135_s15), 169  ;;  %vm243_vm0 = vcmask 719872  }
   0xc   : > { %1320 = vmatprep.subr.mxu0 %v1637_v1  ;;  %1597 = vmatprep.subr.mxu1 %v1637_v1  ;;  %v239_v4 = vld [vmem:[%s2163_s1 + $0x38] sm:$0xff]  ;;  %v238_v5 = vld [vmem:[%s2163_s1 + $0x30] sm:$0xff]  ;;  %v237_v6 = vld [vmem:[%s2163_s1 + $0x28] sm:$0xff]  ;;  %s1135_s28 = sshll.u32 %s2166_s15, 3  ;;  %vm1638_vm1 = vmmov 0  }
   0xd   : > { %1321 = vmatpush3.msra.mxu0 %v242_v0  ;;  %1608 = vmatpush3.msra.mxu1 %v242_v0  ;;  %v236_v7 = vld [vmem:[%s2163_s1 + $0x20] sm:$0xff]  ;;  %v235_v8 = vld [vmem:[%s2163_s1 + $0x18] sm:$0xff]  ;;  %v234_v9 = vld [vmem:[%s2163_s1 + $0x10] sm:$0xff]  ;;  %s1718_s7 = scalar_lea.vmem %s2162_s0, %s1135_s28  ;;  %s2072_s13 = scalar_lea.vmem %s2164_s2, %s1135_s28 }
   0xe   : > { %1322 = vmatprep.subr.mxu0 %v1637_v1  ;;  %1598 = vmatprep.subr.mxu1 %v1637_v1  ;;  %v233_v10 = vld [vmem:[%s2163_s1 + $0x8] sm:$0xff]  ;;  %v232_v11 = vld [vmem:[%s2163_s1] sm:$0xff]  ;;  %v190_v13 = vld [vmem:[%s1718_s7 + $0x158] sm:$0xff] }
   0xf   : > { %1323 = vmatpush3.msra.mxu0 %v241_v2  ;;  %1609 = vmatpush3.msra.mxu1 %v241_v2  ;;  %v147_v12 = vld [vmem:[%s1718_s7] sm:$0xff]  ;;  %v148_v14 = vld [vmem:[%s1718_s7 + $0x8] sm:$0xff]  ;;  %v149_v16 = vld [vmem:[%s1718_s7 + $0x10] sm:$0xff] }
  0x10   : > { %1324 = vmatprep.subr.mxu0 %v1637_v1  ;;  %1599 = vmatprep.subr.mxu1 %v1637_v1  ;;  %v191_v15 = vld [vmem:[%s1718_s7 + $0x160] sm:$0xff]  ;;  %v192_v17 = vld [vmem:[%s1718_s7 + $0x168] sm:$0xff]  ;;  %v150_v18 = vld [vmem:[%s1718_s7 + $0x18] sm:$0xff] }
  0x11   : > { %1325 = vmatpush3.msra.mxu0 %v240_v3  ;;  %1610 = vmatpush3.msra.mxu1 %v240_v3  ;;  %v193_v19 = vld [vmem:[%s1718_s7 + $0x170] sm:$0xff]  ;;  %v151_v20 = vld [vmem:[%s1718_s7 + $0x20] sm:$0xff]  ;;  %v194_v21 = vld [vmem:[%s1718_s7 + $0x178] sm:$0xff] }
  0x12   : > { %1326 = vmatprep.subr.mxu0 %v1637_v1  ;;  %1600 = vmatprep.subr.mxu1 %v1637_v1  ;;  %v152_v22 = vld [vmem:[%s1718_s7 + $0x28] sm:$0xff]  ;;  %v195_v23 = vld [vmem:[%s1718_s7 + $0x180] sm:$0xff]  ;;  %v153_v24 = vld [vmem:[%s1718_s7 + $0x30] sm:$0xff] }
  0x13   : > { %1327 = vmatpush3.msra.mxu0 %v239_v4  ;;  %1611 = vmatpush3.msra.mxu1 %v239_v4  ;;  %v196_v25 = vld [vmem:[%s1718_s7 + $0x188] sm:$0xff]  ;;  %v154_v26 = vld [vmem:[%s1718_s7 + $0x38] sm:$0xff]  ;;  %v197_v27 = vld [vmem:[%s1718_s7 + $0x190] sm:$0xff] }
  0x14   : > { %1328 = vmatprep.subr.mxu0 %v1637_v1  ;;  %1601 = vmatprep.subr.mxu1 %v1637_v1  ;;  %v155_v28 = vld [vmem:[%s1718_s7 + $0x40] sm:$0xff]  ;;  %v198_v29 = vld [vmem:[%s1718_s7 + $0x198] sm:$0xff]  ;;  %v156_v30 = vld [vmem:[%s1718_s7 + $0x48] sm:$0xff] }
  0x15   : > { %1329 = vmatpush3.msra.mxu0 %v238_v5  ;;  %1612 = vmatpush3.msra.mxu1 %v238_v5  ;;  %v199_v31 = vld [vmem:[%s1718_s7 + $0x1a0] sm:$0xff]  ;;  %v157_v32 = vld [vmem:[%s1718_s7 + $0x50] sm:$0xff]  ;;  %v200_v33 = vld [vmem:[%s1718_s7 + $0x1a8] sm:$0xff] }
  0x16   : > { %1330 = vmatprep.subr.mxu0 %v1637_v1  ;;  %1602 = vmatprep.subr.mxu1 %v1637_v1  ;;  %v158_v34 = vld [vmem:[%s1718_s7 + $0x58] sm:$0xff]  ;;  %v201_v35 = vld [vmem:[%s1718_s7 + $0x1b0] sm:$0xff]  ;;  %v159_v36 = vld [vmem:[%s1718_s7 + $0x60] sm:$0xff] }
  0x17   : > { %1331 = vmatpush3.msra.mxu0 %v237_v6  ;;  %1613 = vmatpush3.msra.mxu1 %v237_v6  ;;  %v202_v37 = vld [vmem:[%s1718_s7 + $0x1b8] sm:$0xff]  ;;  %v160_v38 = vld [vmem:[%s1718_s7 + $0x68] sm:$0xff]  ;;  %v203_v39 = vld [vmem:[%s1718_s7 + $0x1c0] sm:$0xff] }
  0x18   : > { %1332 = vmatprep.subr.mxu0 %v1637_v1  ;;  %1603 = vmatprep.subr.mxu1 %v1637_v1  ;;  %v161_v40 = vld [vmem:[%s1718_s7 + $0x70] sm:$0xff]  ;;  %v204_v41 = vld [vmem:[%s1718_s7 + $0x1c8] sm:$0xff]  ;;  %v162_v42 = vld [vmem:[%s1718_s7 + $0x78] sm:$0xff] }
  0x19   : > { %1333 = vmatpush3.msra.mxu0 %v236_v7  ;;  %1614 = vmatpush3.msra.mxu1 %v236_v7  ;;  %v205_v43 = vld [vmem:[%s1718_s7 + $0x1d0] sm:$0xff]  ;;  %v163_v44 = vld [vmem:[%s1718_s7 + $0x80] sm:$0xff]  ;;  %v206_v45 = vld [vmem:[%s1718_s7 + $0x1d8] sm:$0xff] }
  0x1a   : > { %1334 = vmatprep.subr.mxu0 %v1637_v1  ;;  %1604 = vmatprep.subr.mxu1 %v1637_v1  ;;  %v164_v46 = vld [vmem:[%s1718_s7 + $0x88] sm:$0xff]  ;;  %v207_v47 = vld [vmem:[%s1718_s7 + $0x1e0] sm:$0xff]  ;;  %v165_v48 = vld [vmem:[%s1718_s7 + $0x90] sm:$0xff] }
  0x1b   : > { %1335 = vmatpush3.msra.mxu0 %v235_v8  ;;  %1615 = vmatpush3.msra.mxu1 %v235_v8  ;;  %v208_v49 = vld [vmem:[%s1718_s7 + $0x1e8] sm:$0xff]  ;;  %v166_v50 = vld [vmem:[%s1718_s7 + $0x98] sm:$0xff]  ;;  %v209_v51 = vld [vmem:[%s1718_s7 + $0x1f0] sm:$0xff] }
  0x1c   : > { %1336 = vmatprep.subr.mxu0 %v1637_v1  ;;  %1605 = vmatprep.subr.mxu1 %v1637_v1  ;;  %v167_v52 = vld [vmem:[%s1718_s7 + $0xa0] sm:$0xff]  ;;  %v210_v53 = vld [vmem:[%s1718_s7 + $0x1f8] sm:$0xff]  ;;  %v168_v54 = vld [vmem:[%s1718_s7 + $0xa8] sm:$0xff] }
  0x1d   : > { %1337 = vmatpush3.msra.mxu0 %v234_v9  ;;  %1616 = vmatpush3.msra.mxu1 %v234_v9  ;;  %v211_v55 = vld [vmem:[%s1718_s7 + $0x200] sm:$0xff]  ;;  %v169_v56 = vld [vmem:[%s1718_s7 + $0xb0] sm:$0xff]  ;;  %v212_v57 = vld [vmem:[%s1718_s7 + $0x208] sm:$0xff] }
  0x1e   : > { %1338 = vmatprep.subr.mxu0 %v1637_v1  ;;  %1606 = vmatprep.subr.mxu1 %v1637_v1  ;;  %v170_v58 = vld [vmem:[%s1718_s7 + $0xb8] sm:$0xff]  ;;  %v213_v59 = vld [vmem:[%s1718_s7 + $0x210] sm:$0xff]  ;;  %v171_v60 = vld [vmem:[%s1718_s7 + $0xc0] sm:$0xff] }
  0x1f   : > { %1339 = vmatpush3.msra.mxu0 %v233_v10  ;;  %1617 = vmatpush3.msra.mxu1 %v233_v10  ;;  %v214_v61 = vld [vmem:[%s1718_s7 + $0x218] sm:$0xff]  ;;  %v172_v62 = vld [vmem:[%s1718_s7 + $0xc8] sm:$0xff]  ;;  %v215_v63 = vld [vmem:[%s1718_s7 + $0x220] sm:$0xff] }
  0x20   : > { %1340 = vmatprep.subr.mxu0 %v1637_v1  ;;  %1342 = vmatprep.mubr.msk.f32.mxu0 %vm1638_vm1, %v1637_v1  ;;  %v173_v0 = vld [vmem:[%s1718_s7 + $0xd0] sm:$0xff]  ;;  %v216_v2 = vld [vmem:[%s1718_s7 + $0x228] sm:$0xff]  ;;  %v174_v3 = vld [vmem:[%s1718_s7 + $0xd8] sm:$0xff] }
  0x21   : > { %1341 = vmatpush3.msra.mxu0 %v232_v11  ;;  %1607 = vmatprep.subr.mxu1 %v1637_v1  ;;  %v217_v4 = vld [vmem:[%s1718_s7 + $0x230] sm:$0xff]  ;;  %v175_v5 = vld [vmem:[%s1718_s7 + $0xe0] sm:$0xff]  ;;  %v218_v6 = vld [vmem:[%s1718_s7 + $0x238] sm:$0xff] }
  0x22   : > { %1343 = vmatmul.mubr.msk.f32.vlgmr.msra.gmra.mxu0 %vm243_vm0, %v147_v12  ;;  %1618 = vmatpush3.msra.mxu1 %v232_v11  ;;  %v176_v7 = vld [vmem:[%s1718_s7 + $0xe8] sm:$0xff]  ;;  %v219_v8 = vld [vmem:[%s1718_s7 + $0x240] sm:$0xff]  ;;  %v177_v9 = vld [vmem:[%s1718_s7 + $0xf0] sm:$0xff] }
  0x23   : > { %1471 = vmatprep.mubr.msk.f32.mxu1 %vm1638_vm1, %v1637_v1  ;;  %1345 = vmatprep.mubr.msk.f32.mxu0 %vm1638_vm1, %v1637_v1  ;;  %v220_v10 = vld [vmem:[%s1718_s7 + $0x248] sm:$0xff]  ;;  %v178_v11 = vld [vmem:[%s1718_s7 + $0xf8] sm:$0xff]  ;;  %v221_v12 = vld [vmem:[%s1718_s7 + $0x250] sm:$0xff] }
  0x24   : > { %1472 = vmatmul.mubr.msk.f32.vlgmr.msra.gmra.mxu1 %vm243_vm0, %v190_v13  ;;  %v179_v13 = vld [vmem:[%s1718_s7 + $0x100] sm:$0xff] }
  0x25   : > { %1474 = vmatprep.mubr.msk.f32.mxu1 %vm1638_vm1, %v1637_v1 }
  0x26   : > { %1346 = vmatmul.mubr.msk.f32.gmra.mxu0 %vm243_vm0, %v148_v14  ;;  %v222_v14 = vld [vmem:[%s1718_s7 + $0x258] sm:$0xff] }
  0x27   : > { %1348 = vmatprep.mubr.msk.f32.mxu0 %vm1638_vm1, %v1637_v1 }
  0x28   : > { %1475 = vmatmul.mubr.msk.f32.gmra.mxu1 %vm243_vm0, %v191_v15  ;;  %v180_v15 = vld [vmem:[%s1718_s7 + $0x108] sm:$0xff] }
  0x29   : > { %1477 = vmatprep.mubr.msk.f32.mxu1 %vm1638_vm1, %v1637_v1 }
  0x2a   : > { %1349 = vmatmul.mubr.msk.f32.gmra.mxu0 %vm243_vm0, %v149_v16  ;;  %v223_v16 = vld [vmem:[%s1718_s7 + $0x260] sm:$0xff] }
  0x2b   : > { %1351 = vmatprep.mubr.msk.f32.mxu0 %vm1638_vm1, %v1637_v1 }
  0x2c   : > { %1478 = vmatmul.mubr.msk.f32.gmra.mxu1 %vm243_vm0, %v192_v17  ;;  %v181_v17 = vld [vmem:[%s1718_s7 + $0x110] sm:$0xff] }
  0x2d   : > { %1480 = vmatprep.mubr.msk.f32.mxu1 %vm1638_vm1, %v1637_v1 }
  0x2e   : > { %1352 = vmatmul.mubr.msk.f32.gmra.mxu0 %vm243_vm0, %v150_v18  ;;  %v224_v18 = vld [vmem:[%s1718_s7 + $0x268] sm:$0xff] }
  0x2f   : > { %1354 = vmatprep.mubr.msk.f32.mxu0 %vm1638_vm1, %v1637_v1 }
  0x30   : > { %1481 = vmatmul.mubr.msk.f32.gmra.mxu1 %vm243_vm0, %v193_v19  ;;  %v182_v19 = vld [vmem:[%s1718_s7 + $0x118] sm:$0xff] }
  0x31   : > { %1483 = vmatprep.mubr.msk.f32.mxu1 %vm1638_vm1, %v1637_v1 }
  0x32   : > { %1355 = vmatmul.mubr.msk.f32.gmra.mxu0 %vm243_vm0, %v151_v20  ;;  %v225_v20 = vld [vmem:[%s1718_s7 + $0x270] sm:$0xff] }
  0x33   : > { %1357 = vmatprep.mubr.msk.f32.mxu0 %vm1638_vm1, %v1637_v1 }
  0x34   : > { %1484 = vmatmul.mubr.msk.f32.gmra.mxu1 %vm243_vm0, %v194_v21  ;;  %v183_v21 = vld [vmem:[%s1718_s7 + $0x120] sm:$0xff] }
  0x35   : > { %1486 = vmatprep.mubr.msk.f32.mxu1 %vm1638_vm1, %v1637_v1 }
  0x36   : > { %1358 = vmatmul.mubr.msk.f32.gmra.mxu0 %vm243_vm0, %v152_v22  ;;  %v226_v22 = vld [vmem:[%s1718_s7 + $0x278] sm:$0xff] }
  0x37   : > { %1360 = vmatprep.mubr.msk.f32.mxu0 %vm1638_vm1, %v1637_v1 }
  0x38   : > { %1487 = vmatmul.mubr.msk.f32.gmra.mxu1 %vm243_vm0, %v195_v23  ;;  %v184_v23 = vld [vmem:[%s1718_s7 + $0x128] sm:$0xff] }
  0x39   : > { %1489 = vmatprep.mubr.msk.f32.mxu1 %vm1638_vm1, %v1637_v1 }
  0x3a   : > { %1361 = vmatmul.mubr.msk.f32.gmra.mxu0 %vm243_vm0, %v153_v24  ;;  %v227_v24 = vld [vmem:[%s1718_s7 + $0x280] sm:$0xff] }
  0x3b   : > { %1363 = vmatprep.mubr.msk.f32.mxu0 %vm1638_vm1, %v1637_v1 }
  0x3c   : > { %1490 = vmatmul.mubr.msk.f32.gmra.mxu1 %vm243_vm0, %v196_v25  ;;  %v185_v25 = vld [vmem:[%s1718_s7 + $0x130] sm:$0xff] }
  0x3d   : > { %1492 = vmatprep.mubr.msk.f32.mxu1 %vm1638_vm1, %v1637_v1 }
  0x3e   : > { %1364 = vmatmul.mubr.msk.f32.gmra.mxu0 %vm243_vm0, %v154_v26  ;;  %v228_v26 = vld [vmem:[%s1718_s7 + $0x288] sm:$0xff] }
  0x3f   : > { %1366 = vmatprep.mubr.msk.f32.mxu0 %vm1638_vm1, %v1637_v1 }
  0x40   : > { %1493 = vmatmul.mubr.msk.f32.gmra.mxu1 %vm243_vm0, %v197_v27  ;;  %v186_v27 = vld [vmem:[%s1718_s7 + $0x138] sm:$0xff] }
  0x41   : > { %1495 = vmatprep.mubr.msk.f32.mxu1 %vm1638_vm1, %v1637_v1 }
  0x42   : > { %1367 = vmatmul.mubr.msk.f32.gmra.mxu0 %vm243_vm0, %v155_v28  ;;  %v229_v28 = vld [vmem:[%s1718_s7 + $0x290] sm:$0xff] }
  0x43   : > { %1369 = vmatprep.mubr.msk.f32.mxu0 %vm1638_vm1, %v1637_v1 }
  0x44   : > { %1496 = vmatmul.mubr.msk.f32.gmra.mxu1 %vm243_vm0, %v198_v29  ;;  %v187_v29 = vld [vmem:[%s1718_s7 + $0x140] sm:$0xff] }
  0x45   : > { %1498 = vmatprep.mubr.msk.f32.mxu1 %vm1638_vm1, %v1637_v1 }
  0x46   : > { %1370 = vmatmul.mubr.msk.f32.gmra.mxu0 %vm243_vm0, %v156_v30  ;;  %v230_v30 = vld [vmem:[%s1718_s7 + $0x298] sm:$0xff] }
  0x47   : > { %1372 = vmatprep.mubr.msk.f32.mxu0 %vm1638_vm1, %v1637_v1 }
  0x48   : > { %1499 = vmatmul.mubr.msk.f32.gmra.mxu1 %vm243_vm0, %v199_v31  ;;  %v188_v31 = vld [vmem:[%s1718_s7 + $0x148] sm:$0xff] }
  0x49   : > { %1501 = vmatprep.mubr.msk.f32.mxu1 %vm1638_vm1, %v1637_v1 }
  0x4a   : > { %1373 = vmatmul.mubr.msk.f32.gmra.mxu0 %vm243_vm0, %v157_v32  ;;  %v231_v32 = vld [vmem:[%s1718_s7 + $0x2a0] sm:$0xff] }
  0x4b   : > { %1375 = vmatprep.mubr.msk.f32.mxu0 %vm1638_vm1, %v1637_v1 }
  0x4c   : > { %1502 = vmatmul.mubr.msk.f32.gmra.mxu1 %vm243_vm0, %v200_v33  ;;  %v189_v33 = vld [vmem:[%s1718_s7 + $0x150] sm:$0xff] }
  0x4d   : > { %1504 = vmatprep.mubr.msk.f32.mxu1 %vm1638_vm1, %v1637_v1 }
  0x4e   : > { %1376 = vmatmul.mubr.msk.f32.gmra.mxu0 %vm243_vm0, %v158_v34 }
  0x4f   : > { %1378 = vmatprep.mubr.msk.f32.mxu0 %vm1638_vm1, %v1637_v1 }
  0x50   : > { %1505 = vmatmul.mubr.msk.f32.gmra.mxu1 %vm243_vm0, %v201_v35 }
  0x51   : > { %1507 = vmatprep.mubr.msk.f32.mxu1 %vm1638_vm1, %v1637_v1 }
  0x52   : > { %1379 = vmatmul.mubr.msk.f32.gmra.mxu0 %vm243_vm0, %v159_v36 }
  0x53   : > { %1381 = vmatprep.mubr.msk.f32.mxu0 %vm1638_vm1, %v1637_v1 }
  0x54   : > { %1508 = vmatmul.mubr.msk.f32.gmra.mxu1 %vm243_vm0, %v202_v37 }
  0x55   : > { %1510 = vmatprep.mubr.msk.f32.mxu1 %vm1638_vm1, %v1637_v1 }
  0x56   : > { %1382 = vmatmul.mubr.msk.f32.gmra.mxu0 %vm243_vm0, %v160_v38 }
  0x57   : > { %1384 = vmatprep.mubr.msk.f32.mxu0 %vm1638_vm1, %v1637_v1 }
  0x58   : > { %1511 = vmatmul.mubr.msk.f32.gmra.mxu1 %vm243_vm0, %v203_v39 }
  0x59   : > { %1513 = vmatprep.mubr.msk.f32.mxu1 %vm1638_vm1, %v1637_v1 }
  0x5a   : > { %1385 = vmatmul.mubr.msk.f32.gmra.mxu0 %vm243_vm0, %v161_v40 }
  0x5b   : > { %1387 = vmatprep.mubr.msk.f32.mxu0 %vm1638_vm1, %v1637_v1 }
  0x5c   : > { %1514 = vmatmul.mubr.msk.f32.gmra.mxu1 %vm243_vm0, %v204_v41 }
  0x5d   : > { %1516 = vmatprep.mubr.msk.f32.mxu1 %vm1638_vm1, %v1637_v1 }
  0x5e   : > { %1388 = vmatmul.mubr.msk.f32.gmra.mxu0 %vm243_vm0, %v162_v42 }
  0x5f   : > { %1390 = vmatprep.mubr.msk.f32.mxu0 %vm1638_vm1, %v1637_v1 }
  0x60   : > { %1517 = vmatmul.mubr.msk.f32.gmra.mxu1 %vm243_vm0, %v205_v43 }
  0x61   : > { %1519 = vmatprep.mubr.msk.f32.mxu1 %vm1638_vm1, %v1637_v1 }
  0x62   : > { %1391 = vmatmul.mubr.msk.f32.gmra.mxu0 %vm243_vm0, %v163_v44 }
  0x63   : > { %1393 = vmatprep.mubr.msk.f32.mxu0 %vm1638_vm1, %v1637_v1 }
  0x64   : > { %1520 = vmatmul.mubr.msk.f32.gmra.mxu1 %vm243_vm0, %v206_v45 }
  0x65   : > { %1522 = vmatprep.mubr.msk.f32.mxu1 %vm1638_vm1, %v1637_v1 }
  0x66   : > { %1394 = vmatmul.mubr.msk.f32.gmra.mxu0 %vm243_vm0, %v164_v46 }
  0x67   : > { %1396 = vmatprep.mubr.msk.f32.mxu0 %vm1638_vm1, %v1637_v1 }
  0x68   : > { %1523 = vmatmul.mubr.msk.f32.gmra.mxu1 %vm243_vm0, %v207_v47 }
  0x69   : > { %1525 = vmatprep.mubr.msk.f32.mxu1 %vm1638_vm1, %v1637_v1 }
  0x6a   : > { %1397 = vmatmul.mubr.msk.f32.gmra.mxu0 %vm243_vm0, %v165_v48 }
  0x6b   : > { %1399 = vmatprep.mubr.msk.f32.mxu0 %vm1638_vm1, %v1637_v1 }
  0x6c   : > { %1526 = vmatmul.mubr.msk.f32.gmra.mxu1 %vm243_vm0, %v208_v49 }
  0x6d   : > { %1528 = vmatprep.mubr.msk.f32.mxu1 %vm1638_vm1, %v1637_v1 }
  0x6e   : > { %1400 = vmatmul.mubr.msk.f32.gmra.mxu0 %vm243_vm0, %v166_v50 }
  0x6f   : > { %1402 = vmatprep.mubr.msk.f32.mxu0 %vm1638_vm1, %v1637_v1 }
  0x70   : > { %1529 = vmatmul.mubr.msk.f32.gmra.mxu1 %vm243_vm0, %v209_v51 }
  0x71   : > { %1531 = vmatprep.mubr.msk.f32.mxu1 %vm1638_vm1, %v1637_v1 }
  0x72   : > { %1403 = vmatmul.mubr.msk.f32.gmra.mxu0 %vm243_vm0, %v167_v52 }
  0x73   : > { %1405 = vmatprep.mubr.msk.f32.mxu0 %vm1638_vm1, %v1637_v1 }
  0x74   : > { %1532 = vmatmul.mubr.msk.f32.gmra.mxu1 %vm243_vm0, %v210_v53 }
  0x75   : > { %1534 = vmatprep.mubr.msk.f32.mxu1 %vm1638_vm1, %v1637_v1 }
  0x76   : > { %1406 = vmatmul.mubr.msk.f32.gmra.mxu0 %vm243_vm0, %v168_v54 }
  0x77   : > { %1408 = vmatprep.mubr.msk.f32.mxu0 %vm1638_vm1, %v1637_v1 }
  0x78   : > { %1535 = vmatmul.mubr.msk.f32.gmra.mxu1 %vm243_vm0, %v211_v55 }
  0x79   : > { %1537 = vmatprep.mubr.msk.f32.mxu1 %vm1638_vm1, %v1637_v1 }
  0x7a   : > { %1409 = vmatmul.mubr.msk.f32.gmra.mxu0 %vm243_vm0, %v169_v56 }
  0x7b   : > { %1411 = vmatprep.mubr.msk.f32.mxu0 %vm1638_vm1, %v1637_v1 }
  0x7c   : > { %1538 = vmatmul.mubr.msk.f32.gmra.mxu1 %vm243_vm0, %v212_v57 }
  0x7d   : > { %1540 = vmatprep.mubr.msk.f32.mxu1 %vm1638_vm1, %v1637_v1 }
  0x7e   : > { %1412 = vmatmul.mubr.msk.f32.gmra.mxu0 %vm243_vm0, %v170_v58 }
  0x7f   : > { %1414 = vmatprep.mubr.msk.f32.mxu0 %vm1638_vm1, %v1637_v1 }
  0x80   : > { %1541 = vmatmul.mubr.msk.f32.gmra.mxu1 %vm243_vm0, %v213_v59 }
  0x81   : > { %1543 = vmatprep.mubr.msk.f32.mxu1 %vm1638_vm1, %v1637_v1 }
  0x82   : > { %1415 = vmatmul.mubr.msk.f32.gmra.mxu0 %vm243_vm0, %v171_v60 }
  0x83   : > { %1417 = vmatprep.mubr.msk.f32.mxu0 %vm1638_vm1, %v1637_v1 }
  0x84   : > { %1544 = vmatmul.mubr.msk.f32.gmra.mxu1 %vm243_vm0, %v214_v61 }
  0x85   : > { %1546 = vmatprep.mubr.msk.f32.mxu1 %vm1638_vm1, %v1637_v1 }
  0x86   : > { %1418 = vmatmul.mubr.msk.f32.gmra.mxu0 %vm243_vm0, %v172_v62 }
  0x87   : > { %1420 = vmatprep.mubr.msk.f32.mxu0 %vm1638_vm1, %v1637_v1 }
  0x88   : > { %1547 = vmatmul.mubr.msk.f32.gmra.mxu1 %vm243_vm0, %v215_v63 }
  0x89   : > { %1549 = vmatprep.mubr.msk.f32.mxu1 %vm1638_vm1, %v1637_v1 }
  0x8a   : > { %1421 = vmatmul.mubr.msk.f32.gmra.mxu0 %vm243_vm0, %v173_v0 }
  0x8b   : > { %1423 = vmatprep.mubr.msk.f32.mxu0 %vm1638_vm1, %v1637_v1 }
  0x8c   : > { %1550 = vmatmul.mubr.msk.f32.gmra.mxu1 %vm243_vm0, %v216_v2 }
  0x8d   : > { %1552 = vmatprep.mubr.msk.f32.mxu1 %vm1638_vm1, %v1637_v1 }
  0x8e   : > { %1424 = vmatmul.mubr.msk.f32.gmra.mxu0 %vm243_vm0, %v174_v3 }
  0x8f   : > { %1426 = vmatprep.mubr.msk.f32.mxu0 %vm1638_vm1, %v1637_v1 }
  0x90   : > { %1553 = vmatmul.mubr.msk.f32.gmra.mxu1 %vm243_vm0, %v217_v4 }
  0x91   : > { %1555 = vmatprep.mubr.msk.f32.mxu1 %vm1638_vm1, %v1637_v1 }
  0x92   : > { %1427 = vmatmul.mubr.msk.f32.gmra.mxu0 %vm243_vm0, %v175_v5 }
  0x93   : > { %1429 = vmatprep.mubr.msk.f32.mxu0 %vm1638_vm1, %v1637_v1 }
  0x94   : > { %1556 = vmatmul.mubr.msk.f32.gmra.mxu1 %vm243_vm0, %v218_v6 }
  0x95   : > { %1558 = vmatprep.mubr.msk.f32.mxu1 %vm1638_vm1, %v1637_v1 }
  0x96   : > { %1430 = vmatmul.mubr.msk.f32.gmra.mxu0 %vm243_vm0, %v176_v7 }
  0x97   : > { %1432 = vmatprep.mubr.msk.f32.mxu0 %vm1638_vm1, %v1637_v1 }
  0x98   : > { %1559 = vmatmul.mubr.msk.f32.gmra.mxu1 %vm243_vm0, %v219_v8 }
  0x99   : > { %1561 = vmatprep.mubr.msk.f32.mxu1 %vm1638_vm1, %v1637_v1 }
  0x9a   : > { %1433 = vmatmul.mubr.msk.f32.gmra.mxu0 %vm243_vm0, %v177_v9 }
  0x9b   : > { %1435 = vmatprep.mubr.msk.f32.mxu0 %vm1638_vm1, %v1637_v1 }
  0x9c   : > { %1562 = vmatmul.mubr.msk.f32.gmra.mxu1 %vm243_vm0, %v220_v10 }
  0x9d   : > { %1564 = vmatprep.mubr.msk.f32.mxu1 %vm1638_vm1, %v1637_v1 }
  0x9e   : > { %1436 = vmatmul.mubr.msk.f32.gmra.mxu0 %vm243_vm0, %v178_v11 }
  0x9f   : > { %1438 = vmatprep.mubr.msk.f32.mxu0 %vm1638_vm1, %v1637_v1 }
  0xa0   : > { %1565 = vmatmul.mubr.msk.f32.gmra.mxu1 %vm243_vm0, %v221_v12 }
  0xa1   : > { %1567 = vmatprep.mubr.msk.f32.mxu1 %vm1638_vm1, %v1637_v1 }
  0xa2   : > { %1439 = vmatmul.mubr.msk.f32.gmra.mxu0 %vm243_vm0, %v179_v13 }
  0xa3   : > { %1441 = vmatprep.mubr.msk.f32.mxu0 %vm1638_vm1, %v1637_v1 }
  0xa4   : > { %1568 = vmatmul.mubr.msk.f32.gmra.mxu1 %vm243_vm0, %v222_v14 }
  0xa5   : > { %1570 = vmatprep.mubr.msk.f32.mxu1 %vm1638_vm1, %v1637_v1 }
  0xa6   : > { %1442 = vmatmul.mubr.msk.f32.gmra.mxu0 %vm243_vm0, %v180_v15 }
  0xa7   : > { %1444 = vmatprep.mubr.msk.f32.mxu0 %vm1638_vm1, %v1637_v1 }
  0xa8   : > { %1571 = vmatmul.mubr.msk.f32.gmra.mxu1 %vm243_vm0, %v223_v16 }
  0xa9   : > { %1573 = vmatprep.mubr.msk.f32.mxu1 %vm1638_vm1, %v1637_v1 }
  0xaa   : > { %1445 = vmatmul.mubr.msk.f32.gmra.mxu0 %vm243_vm0, %v181_v17 }
  0xab   : > { %1447 = vmatprep.mubr.msk.f32.mxu0 %vm1638_vm1, %v1637_v1 }
  0xac   : > { %1574 = vmatmul.mubr.msk.f32.gmra.mxu1 %vm243_vm0, %v224_v18 }
  0xad   : > { %1576 = vmatprep.mubr.msk.f32.mxu1 %vm1638_vm1, %v1637_v1 }
  0xae   : > { %1448 = vmatmul.mubr.msk.f32.gmra.mxu0 %vm243_vm0, %v182_v19 }
  0xaf   : > { %1450 = vmatprep.mubr.msk.f32.mxu0 %vm1638_vm1, %v1637_v1 }
  0xb0   : > { %1577 = vmatmul.mubr.msk.f32.gmra.mxu1 %vm243_vm0, %v225_v20 }
  0xb1   : > { %1579 = vmatprep.mubr.msk.f32.mxu1 %vm1638_vm1, %v1637_v1 }
  0xb2   : > { %1451 = vmatmul.mubr.msk.f32.gmra.mxu0 %vm243_vm0, %v183_v21 }
  0xb3   : > { %1453 = vmatprep.mubr.msk.f32.mxu0 %vm1638_vm1, %v1637_v1 }
  0xb4   : > { %1580 = vmatmul.mubr.msk.f32.gmra.mxu1 %vm243_vm0, %v226_v22 }
  0xb5   : > { %1582 = vmatprep.mubr.msk.f32.mxu1 %vm1638_vm1, %v1637_v1 }
  0xb6   : > { %1454 = vmatmul.mubr.msk.f32.gmra.mxu0 %vm243_vm0, %v184_v23 }
  0xb7   : > { %1456 = vmatprep.mubr.msk.f32.mxu0 %vm1638_vm1, %v1637_v1 }
  0xb8   : > { %1583 = vmatmul.mubr.msk.f32.gmra.mxu1 %vm243_vm0, %v227_v24 }
  0xb9   : > { %1585 = vmatprep.mubr.msk.f32.mxu1 %vm1638_vm1, %v1637_v1 }
  0xba   : > { %1457 = vmatmul.mubr.msk.f32.gmra.mxu0 %vm243_vm0, %v185_v25 }
  0xbb   : > { %1459 = vmatprep.mubr.msk.f32.mxu0 %vm1638_vm1, %v1637_v1 }
  0xbc   : > { %1586 = vmatmul.mubr.msk.f32.gmra.mxu1 %vm243_vm0, %v228_v26 }
  0xbd   : > { %1588 = vmatprep.mubr.msk.f32.mxu1 %vm1638_vm1, %v1637_v1 }
  0xbe   : > { %1460 = vmatmul.mubr.msk.f32.gmra.mxu0 %vm243_vm0, %v186_v27 }
  0xbf   : > { %1462 = vmatprep.mubr.msk.f32.mxu0 %vm1638_vm1, %v1637_v1 }
  0xc0   : > { %1589 = vmatmul.mubr.msk.f32.gmra.mxu1 %vm243_vm0, %v229_v28 }
  0xc1   : > { %1591 = vmatprep.mubr.msk.f32.mxu1 %vm1638_vm1, %v1637_v1 }
  0xc2   : > { %1463 = vmatmul.mubr.msk.f32.gmra.mxu0 %vm243_vm0, %v187_v29 }
  0xc3   : > { %1465 = vmatprep.mubr.msk.f32.mxu0 %vm1638_vm1, %v1637_v1 }
  0xc4   : > { %1592 = vmatmul.mubr.msk.f32.gmra.mxu1 %vm243_vm0, %v230_v30 }
  0xc5   : > { %1594 = vmatprep.mubr.msk.f32.mxu1 %vm1638_vm1, %v1637_v1 }
  0xc6   : > { %1466 = vmatmul.mubr.msk.f32.gmra.mxu0 %vm243_vm0, %v188_v31 }
  0xc7   : > { %1468 = vmatprep.mubr.msk.f32.mxu0 %vm1638_vm1, %v1637_v1 }
  0xc8   : > { %1595 = vmatmul.mubr.msk.f32.gmra.mxu1 %vm243_vm0, %v231_v32 }
  0xca   : > { %1469 = vmatmul.mubr.msk.f32.gmra.mxu0 %vm243_vm0, %v189_v33 }
  0xe2   : > { %v565_v34 = vpop.f32.mrf.mxu0 }
  0xe3   : > { %989 = vst [vmem:[%s2072_s13] sm:$0xff] %v565_v34 }
  0xe4   : > { %v1344_v1 = vpop.f32.mrf.mxu0  ;;  %v780_v35 = vpop.f32.mrf.mxu1 }
  0xe5   : > { %1032 = vst [vmem:[%s2072_s13 + $0x158] sm:$0xff] %v780_v35 }
  0xe6   : > { %v570_v36 = vpop.f32.mrf.mxu0  ;;  %v1473_v37 = vpop.f32.mrf.mxu1 }
  0xe7   : > { %990 = vst [vmem:[%s2072_s13 + $0x8] sm:$0xff] %v570_v36 }
  0xe8   : > { %v1347_v38 = vpop.f32.mrf.mxu0  ;;  %v785_v39 = vpop.f32.mrf.mxu1 }
  0xe9   : > { %1033 = vst [vmem:[%s2072_s13 + $0x160] sm:$0xff] %v785_v39 }
  0xea   : > { %v575_v40 = vpop.f32.mrf.mxu0  ;;  %v1476_v41 = vpop.f32.mrf.mxu1 }
  0xeb   : > { %991 = vst [vmem:[%s2072_s13 + $0x10] sm:$0xff] %v575_v40 }
  0xec   : > { %v1350_v42 = vpop.f32.mrf.mxu0  ;;  %v790_v43 = vpop.f32.mrf.mxu1 }
  0xed   : > { %1034 = vst [vmem:[%s2072_s13 + $0x168] sm:$0xff] %v790_v43 }
  0xee   : > { %v580_v44 = vpop.f32.mrf.mxu0  ;;  %v1479_v45 = vpop.f32.mrf.mxu1 }
  0xef   : > { %992 = vst [vmem:[%s2072_s13 + $0x18] sm:$0xff] %v580_v44 }
  0xf0   : > { %v1353_v46 = vpop.f32.mrf.mxu0  ;;  %v795_v47 = vpop.f32.mrf.mxu1 }
  0xf1   : > { %1035 = vst [vmem:[%s2072_s13 + $0x170] sm:$0xff] %v795_v47 }
  0xf2   : > { %v585_v48 = vpop.f32.mrf.mxu0  ;;  %v1482_v49 = vpop.f32.mrf.mxu1 }
  0xf3   : > { %993 = vst [vmem:[%s2072_s13 + $0x20] sm:$0xff] %v585_v48 }
  0xf4   : > { %v1356_v50 = vpop.f32.mrf.mxu0  ;;  %v800_v51 = vpop.f32.mrf.mxu1 }
  0xf5   : > { %1036 = vst [vmem:[%s2072_s13 + $0x178] sm:$0xff] %v800_v51 }
  0xf6   : > { %v590_v52 = vpop.f32.mrf.mxu0  ;;  %v1485_v53 = vpop.f32.mrf.mxu1 }
  0xf7   : > { %994 = vst [vmem:[%s2072_s13 + $0x28] sm:$0xff] %v590_v52 }
  0xf8   : > { %v1359_v54 = vpop.f32.mrf.mxu0  ;;  %v805_v55 = vpop.f32.mrf.mxu1 }
  0xf9   : > { %1037 = vst [vmem:[%s2072_s13 + $0x180] sm:$0xff] %v805_v55 }
  0xfa   : > { %v595_v56 = vpop.f32.mrf.mxu0  ;;  %v1488_v57 = vpop.f32.mrf.mxu1 }
  0xfb   : > { %995 = vst [vmem:[%s2072_s13 + $0x30] sm:$0xff] %v595_v56 }
  0xfc   : > { %v1362_v58 = vpop.f32.mrf.mxu0  ;;  %v810_v59 = vpop.f32.mrf.mxu1 }
  0xfd   : > { %1038 = vst [vmem:[%s2072_s13 + $0x188] sm:$0xff] %v810_v59 }
  0xfe   : > { %v600_v60 = vpop.f32.mrf.mxu0  ;;  %v1491_v61 = vpop.f32.mrf.mxu1 }
  0xff   : > { %996 = vst [vmem:[%s2072_s13 + $0x38] sm:$0xff] %v600_v60 }
 0x100   : > { %v1365_v62 = vpop.f32.mrf.mxu0  ;;  %v815_v63 = vpop.f32.mrf.mxu1 }
 0x101   : > { %1039 = vst [vmem:[%s2072_s13 + $0x190] sm:$0xff] %v815_v63 }
 0x102   : > { %v605_v0 = vpop.f32.mrf.mxu0  ;;  %v1494_v2 = vpop.f32.mrf.mxu1 }
 0x103   : > { %997 = vst [vmem:[%s2072_s13 + $0x40] sm:$0xff] %v605_v0 }
 0x104   : > { %v1368_v3 = vpop.f32.mrf.mxu0  ;;  %v820_v4 = vpop.f32.mrf.mxu1 }
 0x105   : > { %1040 = vst [vmem:[%s2072_s13 + $0x198] sm:$0xff] %v820_v4 }
 0x106   : > { %v610_v5 = vpop.f32.mrf.mxu0  ;;  %v1497_v6 = vpop.f32.mrf.mxu1 }
 0x107   : > { %998 = vst [vmem:[%s2072_s13 + $0x48] sm:$0xff] %v610_v5 }
 0x108   : > { %v1371_v7 = vpop.f32.mrf.mxu0  ;;  %v825_v8 = vpop.f32.mrf.mxu1 }
 0x109   : > { %1041 = vst [vmem:[%s2072_s13 + $0x1a0] sm:$0xff] %v825_v8 }
 0x10a   : > { %v615_v9 = vpop.f32.mrf.mxu0  ;;  %v1500_v10 = vpop.f32.mrf.mxu1 }
 0x10b   : > { %999 = vst [vmem:[%s2072_s13 + $0x50] sm:$0xff] %v615_v9 }
 0x10c   : > { %v1374_v11 = vpop.f32.mrf.mxu0  ;;  %v830_v12 = vpop.f32.mrf.mxu1 }
 0x10d   : > { %1042 = vst [vmem:[%s2072_s13 + $0x1a8] sm:$0xff] %v830_v12 }
 0x10e   : > { %v620_v13 = vpop.f32.mrf.mxu0  ;;  %v1503_v14 = vpop.f32.mrf.mxu1 }
 0x10f   : > { %1000 = vst [vmem:[%s2072_s13 + $0x58] sm:$0xff] %v620_v13 }
 0x110   : > { %v1377_v15 = vpop.f32.mrf.mxu0  ;;  %v835_v16 = vpop.f32.mrf.mxu1 }
 0x111   : > { %1043 = vst [vmem:[%s2072_s13 + $0x1b0] sm:$0xff] %v835_v16 }
 0x112   : > { %v625_v17 = vpop.f32.mrf.mxu0  ;;  %v1506_v18 = vpop.f32.mrf.mxu1 }
 0x113   : > { %1001 = vst [vmem:[%s2072_s13 + $0x60] sm:$0xff] %v625_v17 }
 0x114   : > { %v1380_v19 = vpop.f32.mrf.mxu0  ;;  %v840_v20 = vpop.f32.mrf.mxu1 }
 0x115   : > { %1044 = vst [vmem:[%s2072_s13 + $0x1b8] sm:$0xff] %v840_v20 }
 0x116   : > { %v630_v21 = vpop.f32.mrf.mxu0  ;;  %v1509_v22 = vpop.f32.mrf.mxu1 }
 0x117   : > { %1002 = vst [vmem:[%s2072_s13 + $0x68] sm:$0xff] %v630_v21 }
 0x118   : > { %v1383_v23 = vpop.f32.mrf.mxu0  ;;  %v845_v24 = vpop.f32.mrf.mxu1 }
 0x119   : > { %1045 = vst [vmem:[%s2072_s13 + $0x1c0] sm:$0xff] %v845_v24 }
 0x11a   : > { %v635_v25 = vpop.f32.mrf.mxu0  ;;  %v1512_v26 = vpop.f32.mrf.mxu1 }
 0x11b   : > { %1003 = vst [vmem:[%s2072_s13 + $0x70] sm:$0xff] %v635_v25 }
 0x11c   : > { %v1386_v27 = vpop.f32.mrf.mxu0  ;;  %v850_v28 = vpop.f32.mrf.mxu1 }
 0x11d   : > { %1046 = vst [vmem:[%s2072_s13 + $0x1c8] sm:$0xff] %v850_v28 }
 0x11e   : > { %v640_v29 = vpop.f32.mrf.mxu0  ;;  %v1515_v30 = vpop.f32.mrf.mxu1 }
 0x11f   : > { %1004 = vst [vmem:[%s2072_s13 + $0x78] sm:$0xff] %v640_v29 }
 0x120   : > { %v1389_v31 = vpop.f32.mrf.mxu0  ;;  %v855_v32 = vpop.f32.mrf.mxu1 }
 0x121   : > { %1047 = vst [vmem:[%s2072_s13 + $0x1d0] sm:$0xff] %v855_v32 }
 0x122   : > { %v645_v33 = vpop.f32.mrf.mxu0  ;;  %v1518_v34 = vpop.f32.mrf.mxu1 }
 0x123   : > { %1005 = vst [vmem:[%s2072_s13 + $0x80] sm:$0xff] %v645_v33 }
 0x124   : > { %v1392_v1 = vpop.f32.mrf.mxu0  ;;  %v860_v35 = vpop.f32.mrf.mxu1 }
 0x125   : > { %1048 = vst [vmem:[%s2072_s13 + $0x1d8] sm:$0xff] %v860_v35 }
 0x126   : > { %v650_v36 = vpop.f32.mrf.mxu0  ;;  %v1521_v37 = vpop.f32.mrf.mxu1 }
 0x127   : > { %1006 = vst [vmem:[%s2072_s13 + $0x88] sm:$0xff] %v650_v36 }
 0x128   : > { %v1395_v38 = vpop.f32.mrf.mxu0  ;;  %v865_v39 = vpop.f32.mrf.mxu1 }
 0x129   : > { %1049 = vst [vmem:[%s2072_s13 + $0x1e0] sm:$0xff] %v865_v39 }
 0x12a   : > { %v655_v40 = vpop.f32.mrf.mxu0  ;;  %v1524_v41 = vpop.f32.mrf.mxu1 }
 0x12b   : > { %1007 = vst [vmem:[%s2072_s13 + $0x90] sm:$0xff] %v655_v40 }
 0x12c   : > { %v1398_v42 = vpop.f32.mrf.mxu0  ;;  %v870_v43 = vpop.f32.mrf.mxu1 }
 0x12d   : > { %1050 = vst [vmem:[%s2072_s13 + $0x1e8] sm:$0xff] %v870_v43 }
 0x12e   : > { %v660_v44 = vpop.f32.mrf.mxu0  ;;  %v1527_v45 = vpop.f32.mrf.mxu1 }
 0x12f   : > { %1008 = vst [vmem:[%s2072_s13 + $0x98] sm:$0xff] %v660_v44 }
 0x130   : > { %v1401_v46 = vpop.f32.mrf.mxu0  ;;  %v875_v47 = vpop.f32.mrf.mxu1 }
 0x131   : > { %1051 = vst [vmem:[%s2072_s13 + $0x1f0] sm:$0xff] %v875_v47 }
 0x132   : > { %v665_v48 = vpop.f32.mrf.mxu0  ;;  %v1530_v49 = vpop.f32.mrf.mxu1 }
 0x133   : > { %1009 = vst [vmem:[%s2072_s13 + $0xa0] sm:$0xff] %v665_v48 }
 0x134   : > { %v1404_v50 = vpop.f32.mrf.mxu0  ;;  %v880_v51 = vpop.f32.mrf.mxu1 }
 0x135   : > { %1052 = vst [vmem:[%s2072_s13 + $0x1f8] sm:$0xff] %v880_v51 }
 0x136   : > { %v670_v52 = vpop.f32.mrf.mxu0  ;;  %v1533_v53 = vpop.f32.mrf.mxu1 }
 0x137   : > { %1010 = vst [vmem:[%s2072_s13 + $0xa8] sm:$0xff] %v670_v52 }
 0x138   : > { %v1407_v54 = vpop.f32.mrf.mxu0  ;;  %v885_v55 = vpop.f32.mrf.mxu1 }
 0x139   : > { %1053 = vst [vmem:[%s2072_s13 + $0x200] sm:$0xff] %v885_v55 }
 0x13a   : > { %v675_v56 = vpop.f32.mrf.mxu0  ;;  %v1536_v57 = vpop.f32.mrf.mxu1 }
 0x13b   : > { %1011 = vst [vmem:[%s2072_s13 + $0xb0] sm:$0xff] %v675_v56 }
 0x13c   : > { %v1410_v58 = vpop.f32.mrf.mxu0  ;;  %v890_v59 = vpop.f32.mrf.mxu1 }
 0x13d   : > { %1054 = vst [vmem:[%s2072_s13 + $0x208] sm:$0xff] %v890_v59 }
 0x13e   : > { %v680_v60 = vpop.f32.mrf.mxu0  ;;  %v1539_v61 = vpop.f32.mrf.mxu1 }
 0x13f   : > { %1012 = vst [vmem:[%s2072_s13 + $0xb8] sm:$0xff] %v680_v60 }
 0x140   : > { %v1413_v62 = vpop.f32.mrf.mxu0  ;;  %v895_v63 = vpop.f32.mrf.mxu1 }
 0x141   : > { %1055 = vst [vmem:[%s2072_s13 + $0x210] sm:$0xff] %v895_v63 }
 0x142   : > { %v685_v0 = vpop.f32.mrf.mxu0  ;;  %v1542_v2 = vpop.f32.mrf.mxu1 }
 0x143   : > { %1013 = vst [vmem:[%s2072_s13 + $0xc0] sm:$0xff] %v685_v0 }
 0x144   : > { %v1416_v3 = vpop.f32.mrf.mxu0  ;;  %v900_v4 = vpop.f32.mrf.mxu1 }
 0x145   : > { %1056 = vst [vmem:[%s2072_s13 + $0x218] sm:$0xff] %v900_v4 }
 0x146   : > { %v690_v5 = vpop.f32.mrf.mxu0  ;;  %v1545_v6 = vpop.f32.mrf.mxu1 }
 0x147   : > { %1014 = vst [vmem:[%s2072_s13 + $0xc8] sm:$0xff] %v690_v5 }
 0x148   : > { %v1419_v7 = vpop.f32.mrf.mxu0  ;;  %v905_v8 = vpop.f32.mrf.mxu1 }
 0x149   : > { %1057 = vst [vmem:[%s2072_s13 + $0x220] sm:$0xff] %v905_v8 }
 0x14a   : > { %v695_v9 = vpop.f32.mrf.mxu0  ;;  %v1548_v10 = vpop.f32.mrf.mxu1 }
 0x14b   : > { %1015 = vst [vmem:[%s2072_s13 + $0xd0] sm:$0xff] %v695_v9 }
 0x14c   : > { %v1422_v11 = vpop.f32.mrf.mxu0  ;;  %v910_v12 = vpop.f32.mrf.mxu1 }
 0x14d   : > { %1058 = vst [vmem:[%s2072_s13 + $0x228] sm:$0xff] %v910_v12 }
 0x14e   : > { %v700_v13 = vpop.f32.mrf.mxu0  ;;  %v1551_v14 = vpop.f32.mrf.mxu1 }
 0x14f   : > { %1016 = vst [vmem:[%s2072_s13 + $0xd8] sm:$0xff] %v700_v13 }
 0x150   : > { %v1425_v15 = vpop.f32.mrf.mxu0  ;;  %v915_v16 = vpop.f32.mrf.mxu1 }
 0x151   : > { %1059 = vst [vmem:[%s2072_s13 + $0x230] sm:$0xff] %v915_v16 }
 0x152   : > { %v705_v17 = vpop.f32.mrf.mxu0  ;;  %v1554_v18 = vpop.f32.mrf.mxu1 }
 0x153   : > { %1017 = vst [vmem:[%s2072_s13 + $0xe0] sm:$0xff] %v705_v17 }
 0x154   : > { %v1428_v19 = vpop.f32.mrf.mxu0  ;;  %v920_v20 = vpop.f32.mrf.mxu1 }
 0x155   : > { %1060 = vst [vmem:[%s2072_s13 + $0x238] sm:$0xff] %v920_v20 }
 0x156   : > { %v710_v21 = vpop.f32.mrf.mxu0  ;;  %v1557_v22 = vpop.f32.mrf.mxu1 }
 0x157   : > { %1018 = vst [vmem:[%s2072_s13 + $0xe8] sm:$0xff] %v710_v21 }
 0x158   : > { %v1431_v23 = vpop.f32.mrf.mxu0  ;;  %v925_v24 = vpop.f32.mrf.mxu1 }
 0x159   : > { %1061 = vst [vmem:[%s2072_s13 + $0x240] sm:$0xff] %v925_v24 }
 0x15a   : > { %v715_v25 = vpop.f32.mrf.mxu0  ;;  %v1560_v26 = vpop.f32.mrf.mxu1 }
 0x15b   : > { %1019 = vst [vmem:[%s2072_s13 + $0xf0] sm:$0xff] %v715_v25 }
 0x15c   : > { %v1434_v27 = vpop.f32.mrf.mxu0  ;;  %v930_v28 = vpop.f32.mrf.mxu1 }
 0x15d   : > { %1062 = vst [vmem:[%s2072_s13 + $0x248] sm:$0xff] %v930_v28 }
 0x15e   : > { %v720_v29 = vpop.f32.mrf.mxu0  ;;  %v1563_v30 = vpop.f32.mrf.mxu1 }
 0x15f   : > { %1020 = vst [vmem:[%s2072_s13 + $0xf8] sm:$0xff] %v720_v29 }
 0x160   : > { %v1437_v31 = vpop.f32.mrf.mxu0  ;;  %v935_v32 = vpop.f32.mrf.mxu1 }
 0x161   : > { %1063 = vst [vmem:[%s2072_s13 + $0x250] sm:$0xff] %v935_v32 }
 0x162   : > { %v725_v33 = vpop.f32.mrf.mxu0  ;;  %v1566_v34 = vpop.f32.mrf.mxu1 }
 0x163   : > { %1021 = vst [vmem:[%s2072_s13 + $0x100] sm:$0xff] %v725_v33 }
 0x164   : > { %v1440_v1 = vpop.f32.mrf.mxu0  ;;  %v940_v35 = vpop.f32.mrf.mxu1 }
 0x165   : > { %1064 = vst [vmem:[%s2072_s13 + $0x258] sm:$0xff] %v940_v35 }
 0x166   : > { %v730_v36 = vpop.f32.mrf.mxu0  ;;  %v1569_v37 = vpop.f32.mrf.mxu1 }
 0x167   : > { %1022 = vst [vmem:[%s2072_s13 + $0x108] sm:$0xff] %v730_v36 }
 0x168   : > { %v1443_v38 = vpop.f32.mrf.mxu0  ;;  %v945_v39 = vpop.f32.mrf.mxu1 }
 0x169   : > { %1065 = vst [vmem:[%s2072_s13 + $0x260] sm:$0xff] %v945_v39 }
 0x16a   : > { %v735_v40 = vpop.f32.mrf.mxu0  ;;  %v1572_v41 = vpop.f32.mrf.mxu1 }
 0x16b   : > { %1023 = vst [vmem:[%s2072_s13 + $0x110] sm:$0xff] %v735_v40 }
 0x16c   : > { %v1446_v42 = vpop.f32.mrf.mxu0  ;;  %v950_v43 = vpop.f32.mrf.mxu1 }
 0x16d   : > { %1066 = vst [vmem:[%s2072_s13 + $0x268] sm:$0xff] %v950_v43 }
 0x16e   : > { %v740_v44 = vpop.f32.mrf.mxu0  ;;  %v1575_v45 = vpop.f32.mrf.mxu1 }
 0x16f   : > { %1024 = vst [vmem:[%s2072_s13 + $0x118] sm:$0xff] %v740_v44 }
 0x170   : > { %v1449_v46 = vpop.f32.mrf.mxu0  ;;  %v955_v47 = vpop.f32.mrf.mxu1 }
 0x171   : > { %1067 = vst [vmem:[%s2072_s13 + $0x270] sm:$0xff] %v955_v47 }
 0x172   : > { %v745_v48 = vpop.f32.mrf.mxu0  ;;  %v1578_v49 = vpop.f32.mrf.mxu1 }
 0x173   : > { %1025 = vst [vmem:[%s2072_s13 + $0x120] sm:$0xff] %v745_v48 }
 0x174   : > { %v1452_v50 = vpop.f32.mrf.mxu0  ;;  %v960_v51 = vpop.f32.mrf.mxu1 }
 0x175   : > { %1068 = vst [vmem:[%s2072_s13 + $0x278] sm:$0xff] %v960_v51 }
 0x176   : > { %v750_v52 = vpop.f32.mrf.mxu0  ;;  %v1581_v53 = vpop.f32.mrf.mxu1 }
 0x177   : > { %1026 = vst [vmem:[%s2072_s13 + $0x128] sm:$0xff] %v750_v52 }
 0x178   : > { %v1455_v54 = vpop.f32.mrf.mxu0  ;;  %v965_v55 = vpop.f32.mrf.mxu1 }
 0x179   : > { %1069 = vst [vmem:[%s2072_s13 + $0x280] sm:$0xff] %v965_v55 }
 0x17a   : > { %v755_v56 = vpop.f32.mrf.mxu0  ;;  %v1584_v57 = vpop.f32.mrf.mxu1 }
 0x17b   : > { %1027 = vst [vmem:[%s2072_s13 + $0x130] sm:$0xff] %v755_v56 }
 0x17c   : > { %v1458_v58 = vpop.f32.mrf.mxu0  ;;  %v970_v59 = vpop.f32.mrf.mxu1 }
 0x17d   : > { %1070 = vst [vmem:[%s2072_s13 + $0x288] sm:$0xff] %v970_v59 }
 0x17e   : > { %v760_v60 = vpop.f32.mrf.mxu0  ;;  %v1587_v61 = vpop.f32.mrf.mxu1 }
 0x17f   : > { %1028 = vst [vmem:[%s2072_s13 + $0x138] sm:$0xff] %v760_v60 }
 0x180   : > { %v1461_v62 = vpop.f32.mrf.mxu0  ;;  %v975_v63 = vpop.f32.mrf.mxu1 }
 0x181   : > { %1071 = vst [vmem:[%s2072_s13 + $0x290] sm:$0xff] %v975_v63 }
 0x182   : > { %v765_v0 = vpop.f32.mrf.mxu0  ;;  %v1590_v2 = vpop.f32.mrf.mxu1 }
 0x183   : > { %1029 = vst [vmem:[%s2072_s13 + $0x140] sm:$0xff] %v765_v0 }
 0x184   : > { %v1464_v3 = vpop.f32.mrf.mxu0  ;;  %v980_v4 = vpop.f32.mrf.mxu1 }
 0x185   : > { %1072 = vst [vmem:[%s2072_s13 + $0x298] sm:$0xff] %v980_v4 }
 0x186   : > { %v770_v5 = vpop.f32.mrf.mxu0  ;;  %v1593_v6 = vpop.f32.mrf.mxu1 }
 0x187   : > { %1030 = vst [vmem:[%s2072_s13 + $0x148] sm:$0xff] %v770_v5 }
 0x188   : > { %v1467_v7 = vpop.f32.mrf.mxu0  ;;  %v985_v8 = vpop.f32.mrf.mxu1 }
 0x189   : > { %1073 = vst [vmem:[%s2072_s13 + $0x2a0] sm:$0xff] %v985_v8 }
 0x18a   : > { %v775_v9 = vpop.f32.mrf.mxu0  ;;  %v1596_v10 = vpop.f32.mrf.mxu1 }
 0x18b   : > { %1031 = vst [vmem:[%s2072_s13 + $0x150] sm:$0xff] %v775_v9 }
 0x18c   : > { %v1470_v11 = vpop.f32.mrf.mxu0 }
 0x18d PF: > { %s12_s9 = sadd.s32 1, %s1635_s9  }
 0x18e   : > { %p9_p4 = scmp.ge.s32.totalorder %s12_s9, 4  }
 0x190   :  { %11 = sbr.rel (!%p9_p4) target bundleno = 1 (0x1), region = 58 }

// kernel: kanc_mlp_forward.9
= control target key start
LH: loop header
LB: loop body
LE: loop exit
PB: predicated region body
PF: predicated region fallthrough
CT: control target
= control target key end

     0   :  { %v516_v17 = vmov 0.0   ;;  %s819_s0 = inlined_call_operand.vmem [shape: f32[4,16,128], index: 0, kind: input, shape index: {}]   ;;  %s820_s1 = inlined_call_operand.vmem [shape: f32[9,16,128], index: 1, kind: output, shape index: {}]  }
   0x1   :  { %v8_v0 = vld [vmem:[%s819_s0] sm:$0xff]  ;;  %v431_v1 = vld [vmem:[%s819_s0 + $0x10] sm:$0xff]  ;;  %v9_v4 = vld [vmem:[%s819_s0 + $0x8] sm:$0xff] }
   0x2   :  { %v433_v2 = vld [vmem:[%s819_s0 + $0x20] sm:$0xff]  ;;  %v13_v3 = vmax.f32 %v8_v0, %v431_v1  ;;  %v432_v5 = vld [vmem:[%s819_s0 + $0x18] sm:$0xff]  ;;  %v435_v6 = vld [vmem:[%s819_s0 + $0x30] sm:$0xff] }
   0x3   :  { %v14_v7 = vmax.f32 %v9_v4, %v432_v5  ;;  %v434_v8 = vld [vmem:[%s819_s0 + $0x28] sm:$0xff]  ;;  %v436_v10 = vld [vmem:[%s819_s0 + $0x38] sm:$0xff] }
   0x4   :  { %v18_v9 = vmax.f32 %v13_v3, %v433_v2 }
   0x5   :  { %v19_v11 = vmax.f32 %v14_v7, %v434_v8 }
   0x6   :  { %v551_v12 = vmax.f32 %v18_v9, %v435_v6 }
   0x7   :  { %v553_v13 = vmax.f32 %v19_v11, %v436_v10 }
   0x8   :  { %v25_v14 = vsub.f32 0.0, %v551_v12  ;;  %vm37_vm0 = vcmp.ge.f32.partialorder %v551_v12, -2.2  ;;  %vm39_vm1 = vcmp.lt.f32.partialorder %v551_v12, -1.8  ;;  %vm55_vm2 = vcmp.lt.f32.partialorder %v551_v12, -1.0 }
   0x9   :  { %v26_v15 = vsub.f32 0.0, %v553_v13  ;;  %vm41_vm3 = vmand %vm37_vm0, %vm39_vm1  ;;  %vm45_vm4 = vcmp.ge.f32.partialorder %v551_v12, -1.8  ;;  %vm47_vm5 = vcmp.lt.f32.partialorder %v551_v12, -1.4  ;;  %vm61_vm6 = vcmp.ge.f32.partialorder %v551_v12, -1.0 }
   0xa   :  { %v27_v16 = vmul.f32 1.442695, %v25_v14  ;;  %v43_v18 = vsel %vm41_vm3, 1.0, %v516_v17  ;;  %vm49_vm7 = vmand %vm45_vm4, %vm47_vm5  ;;  %vm53_vm8 = vcmp.ge.f32.partialorder %v551_v12, -1.4  ;;  %v566_v19 = vmul.f32 2.5, %v551_v12 }
   0xb   :  { %v29_v20 = vmul.f32 1.442695, %v26_v15  ;;  %v51_v21 = vsel %vm49_vm7, 1.0, %v516_v17  ;;  %vm57_vm9 = vmand %vm53_vm8, %vm55_vm2  ;;  %vm63_vm10 = vcmp.lt.f32.partialorder %v551_v12, -0.6  ;;  %v571_v22 = vmul.f32 1.25, %v551_v12 }
   0xc   :  { %508 = vpow2.f32 %v27_v16  ;;  %v59_v23 = vsel %vm57_vm9, 1.0, %v516_v17  ;;  %vm65_vm11 = vmand %vm61_vm6, %vm63_vm10  ;;  %v437_v24 = vadd.f32 5.5, %v566_v19  ;;  %v131_v25 = vsub.f32 -3.5, %v566_v19 }
   0xd   :  { %510 = vpow2.f32 %v29_v20  ;;  %v577_v26 = vsel %vm65_vm11, 1.0, %v516_v17  ;;  %v439_v27 = vadd.f32 4.5, %v566_v19  ;;  %v141_v28 = vsub.f32 -2.5, %v566_v19 }
   0xe   :  { %v129_v29 = vmul.f32 %v437_v24, %v43_v18  ;;  %v133_v30 = vmul.f32 %v131_v25, %v51_v21  ;;  %v441_v31 = vadd.f32 3.5, %v566_v19  ;;  %v151_v32 = vsub.f32 -1.5, %v566_v19 }
   0xf   :  { %v139_v33 = vmul.f32 %v439_v27, %v51_v21  ;;  %v143_v34 = vmul.f32 %v141_v28, %v59_v23  ;;  %v457_v35 = vadd.f32 2.75, %v571_v22  ;;  %v233_v36 = vsub.f32 -1.25, %v571_v22 }
  0x10   :  { %v135_v37 = vadd.f32 %v133_v30, %v129_v29  ;;  %v149_v38 = vmul.f32 %v441_v31, %v59_v23  ;;  %v153_v39 = vmul.f32 %v151_v32, %v577_v26  ;;  %v459_v40 = vadd.f32 2.25, %v571_v22 }
  0x11   :  { %v145_v41 = vadd.f32 %v143_v34, %v139_v33  ;;  %v243_v42 = vsub.f32 -0.75, %v571_v22  ;;  %v589_v43 = vmul.f32 0.8333333, %v551_v12  ;;  %vm38_vm12 = vcmp.ge.f32.partialorder %v553_v13, -2.2 }
  0x12   :  { %v592_v44 = vadd.f32 %v153_v39, %v149_v38  ;;  %v231_v45 = vmul.f32 %v457_v35, %v135_v37  ;;  %vm40_vm13 = vcmp.lt.f32.partialorder %v553_v13, -1.8  ;;  %vm46_vm14 = vcmp.ge.f32.partialorder %v553_v13, -1.8 }
  0x13   :  { %v235_v46 = vmul.f32 %v233_v36, %v145_v41  ;;  %v241_v47 = vmul.f32 %v459_v40, %v145_v41  ;;  %v475_v48 = vadd.f32 1.8333334, %v589_v43  ;;  %v325_v49 = vsub.f32 -0.5, %v589_v43  ;;  %vm42_vm15 = vmand %vm38_vm12, %vm40_vm13 }
  0x14   :  { %v245_v50 = vmul.f32 %v243_v42, %v592_v44  ;;  %v44_v51 = vsel %vm42_vm15, 1.0, %v516_v17  ;;  %vm48_vm0 = vcmp.lt.f32.partialorder %v553_v13, -1.4  ;;  %vm54_vm1 = vcmp.ge.f32.partialorder %v553_v13, -1.4 }
  0x15   :  { %v237_v52 = vadd.f32 %v235_v46, %v231_v45  ;;  %vm50_vm2 = vmand %vm46_vm14, %vm48_vm0  ;;  %vm56_vm3 = vcmp.lt.f32.partialorder %v553_v13, -1.0  ;;  %vm62_vm4 = vcmp.ge.f32.partialorder %v553_v13, -1.0  ;;  %vm64_vm5 = vcmp.lt.f32.partialorder %v553_v13, -0.6 }
  0x16   :  { %v247_v53 = vadd.f32 %v245_v50, %v241_v47  ;;  %v52_v54 = vsel %vm50_vm2, 1.0, %v516_v17  ;;  %vm58_vm6 = vmand %vm54_vm1, %vm56_vm3  ;;  %v607_v55 = vmul.f32 2.5, %v553_v13  ;;  %v610_v56 = vmul.f32 1.25, %v553_v13 }
  0x17   :  { %v323_v57 = vmul.f32 %v475_v48, %v237_v52  ;;  %v60_v58 = vsel %vm58_vm6, 1.0, %v516_v17  ;;  %vm66_vm7 = vmand %vm62_vm4, %vm64_vm5  ;;  %v614_v59 = vmul.f32 0.8333333, %v553_v13  ;;  %vm69_vm8 = vcmp.ge.f32.partialorder %v551_v12, -0.6 }
  0x18   :  { %v327_v60 = vmul.f32 %v325_v49, %v247_v53  ;;  %v618_v61 = vsel %vm66_vm7, 1.0, %v516_v17  ;;  %v438_v62 = vadd.f32 5.5, %v607_v55  ;;  %v132_v63 = vsub.f32 -3.5, %v607_v55 }
  0x19   :  { %v509_v0 = vpop.eup %508  ;;  %v440_v1 = vadd.f32 4.5, %v607_v55  ;;  %v142_v2 = vsub.f32 -2.5, %v607_v55  ;;  %v442_v3 = vadd.f32 3.5, %v607_v55  ;;  %v152_v4 = vsub.f32 -1.5, %v607_v55 }
  0x1a   :  { %v511_v5 = vpop.eup %510  ;;  %v31_v6 = vadd.f32 1.0, %v509_v0  ;;  %v329_v7 = vadd.f32 %v327_v60, %v323_v57  ;;  %v130_v8 = vmul.f32 %v438_v62, %v44_v51  ;;  %v134_v9 = vmul.f32 %v132_v63, %v52_v54 }
  0x1b   :  { %v32_v10 = vadd.f32 1.0, %v511_v5  ;;  %v140_v11 = vmul.f32 %v440_v1, %v52_v54  ;;  %v144_v14 = vmul.f32 %v142_v2, %v60_v58  ;;  %v150_v15 = vmul.f32 %v442_v3, %v60_v58 }
  0x1c   :  { %512 = vrcp.f32 %v31_v6  ;;  %491 = vst [vmem:[%s820_s1 + $0x10] sm:$0xff] %v329_v7  ;;  %v136_v16 = vadd.f32 %v134_v9, %v130_v8  ;;  %v154_v18 = vmul.f32 %v152_v4, %v618_v61  ;;  %v458_v20 = vadd.f32 2.75, %v610_v56 }
  0x1d   :  { %514 = vrcp.f32 %v32_v10  ;;  %v146_v21 = vadd.f32 %v144_v14, %v140_v11  ;;  %v234_v23 = vsub.f32 -1.25, %v610_v56  ;;  %v460_v24 = vadd.f32 2.25, %v610_v56 }
  0x1e   :  { %v156_v25 = vadd.f32 %v154_v18, %v150_v15  ;;  %v232_v27 = vmul.f32 %v458_v20, %v136_v16  ;;  %v244_v28 = vsub.f32 -0.75, %v610_v56  ;;  %v476_v29 = vadd.f32 1.8333334, %v614_v59 }
  0x1f   :  { %v236_v30 = vmul.f32 %v234_v23, %v146_v21  ;;  %v242_v31 = vmul.f32 %v460_v24, %v146_v21  ;;  %v326_v32 = vsub.f32 -0.5, %v614_v59  ;;  %vm71_vm9 = vcmp.lt.f32.partialorder %v551_v12, -0.2 }
  0x20   :  { %v246_v33 = vmul.f32 %v244_v28, %v156_v25  ;;  %vm73_vm10 = vmand %vm69_vm8, %vm71_vm9  ;;  %v443_v34 = vadd.f32 2.5, %v566_v19  ;;  %v161_v35 = vsub.f32 -0.5, %v566_v19  ;;  %v461_v36 = vadd.f32 1.75, %v571_v22 }
  0x21   :  { %v238_v37 = vadd.f32 %v236_v30, %v232_v27  ;;  %v75_v38 = vsel %vm73_vm10, 1.0, %v516_v17  ;;  %v477_v39 = vadd.f32 1.5, %v589_v43  ;;  %v253_v45 = vsub.f32 -0.25, %v571_v22 }
  0x22   :  { %v248_v40 = vadd.f32 %v246_v33, %v242_v31  ;;  %v159_v41 = vmul.f32 %v443_v34, %v577_v26  ;;  %v163_v42 = vmul.f32 %v161_v35, %v75_v38  ;;  %v251_v47 = vmul.f32 %v461_v36, %v592_v44 }
  0x23   :  { %v324_v46 = vmul.f32 %v476_v29, %v238_v37  ;;  %v333_v48 = vmul.f32 %v477_v39, %v247_v53  ;;  %vm70_vm11 = vcmp.ge.f32.partialorder %v553_v13, -0.6  ;;  %vm72_vm12 = vcmp.lt.f32.partialorder %v553_v13, -0.2 }
  0x24   :  { %v328_v49 = vmul.f32 %v326_v32, %v248_v40  ;;  %v165_v50 = vadd.f32 %v163_v42, %v159_v41  ;;  %v444_v51 = vadd.f32 2.5, %v607_v55  ;;  %v335_v52 = vsub.f32 -0.16666667, %v589_v43  ;;  %vm74_vm13 = vmand %vm70_vm11, %vm72_vm12 }
  0x25   :  { %v162_v26 = vsub.f32 -0.5, %v607_v55  ;;  %v462_v54 = vadd.f32 1.75, %v610_v56  ;;  %v478_v57 = vadd.f32 1.5, %v614_v59  ;;  %v76_v53 = vsel %vm74_vm13, 1.0, %v516_v17 }
  0x26   :  { %v330_v58 = vadd.f32 %v328_v49, %v324_v46  ;;  %v255_v44 = vmul.f32 %v253_v45, %v165_v50  ;;  %v160_v60 = vmul.f32 %v444_v51, %v618_v61  ;;  %v254_v0 = vsub.f32 -0.25, %v610_v56 }
  0x27   :  { %v164_v62 = vmul.f32 %v162_v26, %v76_v53  ;;  %v252_v63 = vmul.f32 %v462_v54, %v156_v25  ;;  %v334_v1 = vmul.f32 %v478_v57, %v248_v40  ;;  %vm77_vm14 = vcmp.ge.f32.partialorder %v551_v12, -0.2 }
  0x28   :  { %492 = vst [vmem:[%s820_s1 + $0x18] sm:$0xff] %v330_v58  ;;  %v257_v2 = vadd.f32 %v255_v44, %v251_v47  ;;  %vm79_vm15 = vcmp.lt.f32.partialorder %v551_v12, 0.2  ;;  %v445_v3 = vadd.f32 1.5, %v566_v19  ;;  %v336_v61 = vsub.f32 -0.16666667, %v614_v59 }
  0x29   :  { %v513_v4 = vpop.eup %512  ;;  %v166_v5 = vadd.f32 %v164_v62, %v160_v60  ;;  %vm81_vm0 = vmand %vm77_vm14, %vm79_vm15  ;;  %v171_v6 = vsub.f32 0.5, %v566_v19  ;;  %v463_v7 = vadd.f32 1.25, %v571_v22  ;;  %v263_v20 = vsub.f32 0.25, %v571_v22 }
  0x2a   :  { %v515_v8 = vpop.eup %514  ;;  %v34_v9 = vmul.f32 %v513_v4, %v551_v12  ;;  %v337_v10 = vmul.f32 %v335_v52, %v257_v2  ;;  %v83_v11 = vsel %vm81_vm0, 1.0, %v516_v17  ;;  %v169_v14 = vmul.f32 %v445_v3, %v75_v38 }
  0x2b   :  { %v36_v15 = vmul.f32 %v515_v8, %v553_v13  ;;  %v256_v16 = vmul.f32 %v254_v0, %v166_v5  ;;  %v173_v18 = vmul.f32 %v171_v6, %v83_v11  ;;  %v261_v23 = vmul.f32 %v463_v7, %v165_v50 }
  0x2c   :  { %401 = vst [vmem:[%s820_s1] sm:$0xff] %v34_v9  ;;  %v339_v21 = vadd.f32 %v337_v10, %v333_v48  ;;  %v479_v24 = vadd.f32 1.1666666, %v589_v43  ;;  %vm78_vm1 = vcmp.ge.f32.partialorder %v553_v13, -0.2  ;;  %vm80_vm2 = vcmp.lt.f32.partialorder %v553_v13, 0.2 }
  0x2d   :  { %402 = vst [vmem:[%s820_s1 + $0x8] sm:$0xff] %v36_v15  ;;  %v258_v25 = vadd.f32 %v256_v16, %v252_v63  ;;  %v175_v27 = vadd.f32 %v173_v18, %v169_v14  ;;  %v446_v28 = vadd.f32 1.5, %v607_v55  ;;  %v345_v29 = vsub.f32 0.16666667, %v589_v43  ;;  %vm82_vm3 = vmand %vm78_vm1, %vm80_vm2 }
  0x2e   :  { %493 = vst [vmem:[%s820_s1 + $0x20] sm:$0xff] %v339_v21  ;;  %v172_v30 = vsub.f32 0.5, %v607_v55  ;;  %v464_v31 = vadd.f32 1.25, %v610_v56  ;;  %v84_v34 = vsel %vm82_vm3, 1.0, %v516_v17  ;;  %v343_v36 = vmul.f32 %v479_v24, %v257_v2 }
  0x2f   :  { %v338_v32 = vmul.f32 %v336_v61, %v258_v25  ;;  %v265_v33 = vmul.f32 %v263_v20, %v175_v27  ;;  %v170_v35 = vmul.f32 %v446_v28, %v76_v53  ;;  %v264_v38 = vsub.f32 0.25, %v610_v56 }
  0x30   :  { %v174_v37 = vmul.f32 %v172_v30, %v84_v34  ;;  %v480_v39 = vadd.f32 1.1666666, %v614_v59  ;;  %vm85_vm4 = vcmp.ge.f32.partialorder %v551_v12, 0.2  ;;  %vm87_vm5 = vcmp.lt.f32.partialorder %v551_v12, 0.6 }
  0x31   :  { %v340_v40 = vadd.f32 %v338_v32, %v334_v1  ;;  %v267_v41 = vadd.f32 %v265_v33, %v261_v23  ;;  %v262_v45 = vmul.f32 %v464_v31, %v166_v5  ;;  %vm89_vm6 = vmand %vm85_vm4, %vm87_vm5  ;;  %v447_v46 = vadd.f32 0.5, %v566_v19 }
  0x32   :  { %v176_v42 = vadd.f32 %v174_v37, %v170_v35  ;;  %v181_v47 = vsub.f32 1.5, %v566_v19  ;;  %v346_v49 = vsub.f32 0.16666667, %v614_v59  ;;  %v91_v50 = vsel %vm89_vm6, 1.0, %v516_v17 }
  0x33   :  { %494 = vst [vmem:[%s820_s1 + $0x28] sm:$0xff] %v340_v40  ;;  %v347_v48 = vmul.f32 %v345_v29, %v267_v41  ;;  %v465_v51 = vadd.f32 0.75, %v571_v22  ;;  %v179_v26 = vmul.f32 %v447_v46, %v83_v11  ;;  %v273_v57 = vsub.f32 0.75, %v571_v22 }
  0x34   :  { %v266_v52 = vmul.f32 %v264_v38, %v176_v42  ;;  %v183_v54 = vmul.f32 %v181_v47, %v91_v50  ;;  %v344_v44 = vmul.f32 %v480_v39, %v258_v25  ;;  %v481_v53 = vadd.f32 0.8333333, %v589_v43 }
  0x35   :  { %v349_v58 = vadd.f32 %v347_v48, %v343_v36  ;;  %vm86_vm7 = vcmp.ge.f32.partialorder %v553_v13, 0.2  ;;  %v271_v63 = vmul.f32 %v465_v51, %v175_v27  ;;  %vm88_vm8 = vcmp.lt.f32.partialorder %v553_v13, 0.6 }
  0x36   :  { %v268_v60 = vadd.f32 %v266_v52, %v262_v45  ;;  %v185_v62 = vadd.f32 %v183_v54, %v179_v26  ;;  %v355_v0 = vsub.f32 0.5, %v589_v43  ;;  %vm90_vm9 = vmand %vm86_vm7, %vm88_vm8  ;;  %v448_v1 = vadd.f32 0.5, %v607_v55 }
  0x37   :  { %495 = vst [vmem:[%s820_s1 + $0x30] sm:$0xff] %v349_v58  ;;  %v182_v2 = vsub.f32 1.5, %v607_v55  ;;  %v466_v3 = vadd.f32 0.75, %v610_v56  ;;  %v92_v61 = vsel %vm90_vm9, 1.0, %v516_v17  ;;  %v482_v6 = vadd.f32 0.8333333, %v614_v59 }
  0x38   :  { %v348_v4 = vmul.f32 %v346_v49, %v268_v60  ;;  %v275_v5 = vmul.f32 %v273_v57, %v185_v62  ;;  %v353_v7 = vmul.f32 %v481_v53, %v267_v41  ;;  %v180_v8 = vmul.f32 %v448_v1, %v84_v34 }
  0x39   :  { %v184_v9 = vmul.f32 %v182_v2, %v92_v61  ;;  %v274_v10 = vsub.f32 0.75, %v610_v56  ;;  %v272_v15 = vmul.f32 %v466_v3, %v176_v42  ;;  %vm93_vm10 = vcmp.ge.f32.partialorder %v551_v12, 0.6 }
  0x3a   :  { %v350_v11 = vadd.f32 %v348_v4, %v344_v44  ;;  %v277_v14 = vadd.f32 %v275_v5, %v271_v63  ;;  %vm95_vm11 = vcmp.lt.f32.partialorder %v551_v12, 1.0  ;;  %v449_v18 = vadd.f32 -0.5, %v566_v19 }
  0x3b   :  { %v186_v16 = vadd.f32 %v184_v9, %v180_v8  ;;  %v191_v20 = vsub.f32 2.5, %v566_v19  ;;  %v354_v23 = vmul.f32 %v482_v6, %v268_v60  ;;  %v356_v24 = vsub.f32 0.5, %v614_v59  ;;  %vm97_vm12 = vmand %vm93_vm10, %vm95_vm11 }
  0x3c   :  { %496 = vst [vmem:[%s820_s1 + $0x38] sm:$0xff] %v350_v11  ;;  %v357_v21 = vmul.f32 %v355_v0, %v277_v14  ;;  %v467_v25 = vadd.f32 0.25, %v571_v22  ;;  %v99_v28 = vsel %vm97_vm12, 1.0, %v516_v17  ;;  %v189_v29 = vmul.f32 %v449_v18, %v91_v50 }
  0x3d   :  { %v276_v27 = vmul.f32 %v274_v10, %v186_v16  ;;  %v483_v30 = vadd.f32 0.5, %v589_v43  ;;  %v193_v32 = vmul.f32 %v191_v20, %v99_v28  ;;  %v283_v33 = vsub.f32 1.25, %v571_v22 }
  0x3e   :  { %v359_v31 = vadd.f32 %v357_v21, %v353_v7  ;;  %v365_v34 = vsub.f32 0.8333333, %v589_v43  ;;  %vm94_vm13 = vcmp.ge.f32.partialorder %v553_v13, 0.6  ;;  %vm96_vm14 = vcmp.lt.f32.partialorder %v553_v13, 1.0 }
  0x3f   :  { %v278_v35 = vadd.f32 %v276_v27, %v272_v15  ;;  %v450_v36 = vadd.f32 -0.5, %v607_v55  ;;  %v195_v37 = vadd.f32 %v193_v32, %v189_v29  ;;  %v281_v38 = vmul.f32 %v467_v25, %v185_v62  ;;  %vm98_vm15 = vmand %vm94_vm13, %vm96_vm14 }
  0x40   :  { %497 = vst [vmem:[%s820_s1 + $0x40] sm:$0xff] %v359_v31  ;;  %v192_v39 = vsub.f32 2.5, %v607_v55  ;;  %v468_v40 = vadd.f32 0.25, %v610_v56  ;;  %v363_v42 = vmul.f32 %v483_v30, %v277_v14  ;;  %v100_v45 = vsel %vm98_vm15, 1.0, %v516_v17 }
  0x41   :  { %v358_v41 = vmul.f32 %v356_v24, %v278_v35  ;;  %v190_v46 = vmul.f32 %v450_v36, %v92_v61  ;;  %v285_v47 = vmul.f32 %v283_v33, %v195_v37  ;;  %v284_v49 = vsub.f32 1.25, %v610_v56 }
  0x42   :  { %v194_v48 = vmul.f32 %v192_v39, %v100_v45  ;;  %v484_v50 = vadd.f32 0.5, %v614_v59  ;;  %v282_v52 = vmul.f32 %v468_v40, %v186_v16  ;;  %vm101_vm0 = vcmp.ge.f32.partialorder %v551_v12, 1.0 }
  0x43   :  { %v360_v51 = vadd.f32 %v358_v41, %v354_v23  ;;  %vm103_vm1 = vcmp.lt.f32.partialorder %v551_v12, 1.4  ;;  %v287_v26 = vadd.f32 %v285_v47, %v281_v38  ;;  %v451_v57 = vadd.f32 -1.5, %v566_v19 }
  0x44   :  { %v196_v54 = vadd.f32 %v194_v48, %v190_v46  ;;  %vm105_vm2 = vmand %vm101_vm0, %vm103_vm1  ;;  %v201_v58 = vsub.f32 3.5, %v566_v19  ;;  %v366_v44 = vsub.f32 0.8333333, %v614_v59  ;;  %v469_v60 = vadd.f32 -0.25, %v571_v22 }
  0x45   :  { %498 = vst [vmem:[%s820_s1 + $0x48] sm:$0xff] %v360_v51  ;;  %v107_v53 = vsel %vm105_vm2, 1.0, %v516_v17  ;;  %v293_v62 = vsub.f32 1.75, %v571_v22  ;;  %v367_v63 = vmul.f32 %v365_v34, %v287_v26  ;;  %v199_v1 = vmul.f32 %v451_v57, %v99_v28 }
  0x46   :  { %v286_v0 = vmul.f32 %v284_v49, %v196_v54  ;;  %v203_v2 = vmul.f32 %v201_v58, %v107_v53  ;;  %v364_v3 = vmul.f32 %v484_v50, %v278_v35  ;;  %v291_v4 = vmul.f32 %v469_v60, %v195_v37 }
  0x47   :  { %v485_v5 = vadd.f32 0.16666667, %v589_v43  ;;  %vm102_vm3 = vcmp.ge.f32.partialorder %v553_v13, 1.0  ;;  %v369_v61 = vadd.f32 %v367_v63, %v363_v42  ;;  %vm104_vm4 = vcmp.lt.f32.partialorder %v553_v13, 1.4 }
  0x48   :  { %v288_v6 = vadd.f32 %v286_v0, %v282_v52  ;;  %v205_v7 = vadd.f32 %v203_v2, %v199_v1  ;;  %v375_v8 = vsub.f32 1.1666666, %v589_v43  ;;  %vm106_vm5 = vmand %vm102_vm3, %vm104_vm4  ;;  %v452_v9 = vadd.f32 -1.5, %v607_v55 }
  0x49   :  { %v202_v10 = vsub.f32 3.5, %v607_v55  ;;  %v470_v11 = vadd.f32 -0.25, %v610_v56  ;;  %499 = vst [vmem:[%s820_s1 + $0x50] sm:$0xff] %v369_v61  ;;  %v108_v16 = vsel %vm106_vm5, 1.0, %v516_v17  ;;  %v486_v18 = vadd.f32 0.16666667, %v614_v59 }
  0x4a   :  { %v368_v14 = vmul.f32 %v366_v44, %v288_v6  ;;  %v295_v15 = vmul.f32 %v293_v62, %v205_v7  ;;  %v373_v20 = vmul.f32 %v485_v5, %v287_v26  ;;  %v200_v21 = vmul.f32 %v452_v9, %v100_v45 }
  0x4b   :  { %v204_v23 = vmul.f32 %v202_v10, %v108_v16  ;;  %v294_v24 = vsub.f32 1.75, %v610_v56  ;;  %v292_v28 = vmul.f32 %v470_v11, %v196_v54  ;;  %vm109_vm6 = vcmp.ge.f32.partialorder %v551_v12, 1.4 }
  0x4c   :  { %v370_v25 = vadd.f32 %v368_v14, %v364_v3  ;;  %v297_v27 = vadd.f32 %v295_v15, %v291_v4  ;;  %vm111_vm7 = vcmp.lt.f32.partialorder %v551_v12, 1.8  ;;  %v453_v30 = vadd.f32 -2.5, %v566_v19 }
  0x4d   :  { %v206_v29 = vadd.f32 %v204_v23, %v200_v21  ;;  %v211_v31 = vsub.f32 4.5, %v566_v19  ;;  %v374_v33 = vmul.f32 %v486_v18, %v288_v6  ;;  %v376_v34 = vsub.f32 1.1666666, %v614_v59  ;;  %vm113_vm8 = vmand %vm109_vm6, %vm111_vm7 }
  0x4e   :  { %500 = vst [vmem:[%s820_s1 + $0x58] sm:$0xff] %v370_v25  ;;  %v377_v32 = vmul.f32 %v375_v8, %v297_v27  ;;  %v471_v35 = vadd.f32 -0.75, %v571_v22  ;;  %v115_v37 = vsel %vm113_vm8, 1.0, %v516_v17  ;;  %v209_v38 = vmul.f32 %v453_v30, %v107_v53 }
  0x4f   :  { %v296_v36 = vmul.f32 %v294_v24, %v206_v29  ;;  %v487_v39 = vadd.f32 -0.16666667, %v589_v43  ;;  %v213_v41 = vmul.f32 %v211_v31, %v115_v37  ;;  %v303_v42 = vsub.f32 2.25, %v571_v22 }
  0x50   :  { %v379_v40 = vadd.f32 %v377_v32, %v373_v20  ;;  %v385_v45 = vsub.f32 1.5, %v589_v43  ;;  %vm110_vm9 = vcmp.ge.f32.partialorder %v553_v13, 1.4  ;;  %vm112_vm10 = vcmp.lt.f32.partialorder %v553_v13, 1.8 }
  0x51   :  { %v298_v46 = vadd.f32 %v296_v36, %v292_v28  ;;  %v454_v47 = vadd.f32 -2.5, %v607_v55  ;;  %v215_v48 = vadd.f32 %v213_v41, %v209_v38  ;;  %v301_v49 = vmul.f32 %v471_v35, %v205_v7  ;;  %vm114_vm11 = vmand %vm110_vm9, %vm112_vm10 }
  0x52   :  { %501 = vst [vmem:[%s820_s1 + $0x60] sm:$0xff] %v379_v40  ;;  %v212_v50 = vsub.f32 4.5, %v607_v55  ;;  %v472_v51 = vadd.f32 -0.75, %v610_v56  ;;  %v383_v26 = vmul.f32 %v487_v39, %v297_v27  ;;  %v116_v54 = vsel %vm114_vm11, 1.0, %v516_v17 }
  0x53   :  { %v378_v52 = vmul.f32 %v376_v34, %v298_v46  ;;  %v210_v57 = vmul.f32 %v454_v47, %v108_v16  ;;  %v305_v58 = vmul.f32 %v303_v42, %v215_v48  ;;  %v304_v53 = vsub.f32 2.25, %v610_v56 }
  0x54   :  { %v214_v44 = vmul.f32 %v212_v50, %v116_v54  ;;  %v488_v60 = vadd.f32 -0.16666667, %v614_v59  ;;  %v302_v63 = vmul.f32 %v472_v51, %v206_v29  ;;  %vm117_vm12 = vcmp.ge.f32.partialorder %v551_v12, 1.8 }
  0x55   :  { %v380_v62 = vadd.f32 %v378_v52, %v374_v33  ;;  %vm119_vm13 = vcmp.lt.f32.partialorder %v551_v12, 2.2  ;;  %v307_v0 = vadd.f32 %v305_v58, %v301_v49  ;;  %v455_v2 = vadd.f32 -3.5, %v566_v19 }
  0x56   :  { %v216_v1 = vadd.f32 %v214_v44, %v210_v57  ;;  %vm121_vm14 = vmand %vm117_vm12, %vm119_vm13  ;;  %v221_v3 = vsub.f32 5.5, %v566_v19  ;;  %v386_v4 = vsub.f32 1.5, %v614_v59  ;;  %v473_v61 = vadd.f32 -1.25, %v571_v22 }
  0x57   :  { %502 = vst [vmem:[%s820_s1 + $0x68] sm:$0xff] %v380_v62  ;;  %v123_v5 = vsel %vm121_vm14, 1.0, %v516_v17  ;;  %v313_v6 = vsub.f32 2.75, %v571_v22  ;;  %v387_v12 = vmul.f32 %v385_v45, %v307_v0  ;;  %v219_v8 = vmul.f32 %v455_v2, %v115_v37 }
  0x58   :  { %v306_v7 = vmul.f32 %v304_v53, %v216_v1  ;;  %v223_v9 = vmul.f32 %v221_v3, %v123_v5  ;;  %v384_v10 = vmul.f32 %v488_v60, %v298_v46  ;;  %v311_v11 = vmul.f32 %v473_v61, %v215_v48 }
  0x59   :  { %v489_v19 = vadd.f32 -0.5, %v589_v43  ;;  %vm118_vm15 = vcmp.ge.f32.partialorder %v553_v13, 1.8  ;;  %v389_v14 = vadd.f32 %v387_v12, %v383_v26  ;;  %vm120_vm0 = vcmp.lt.f32.partialorder %v553_v13, 2.2 }
  0x5a   :  { %v308_v15 = vadd.f32 %v306_v7, %v302_v63  ;;  %v225_v16 = vadd.f32 %v223_v9, %v219_v8  ;;  %vm122_vm1 = vmand %vm118_vm15, %vm120_vm0  ;;  %v456_v18 = vadd.f32 -3.5, %v607_v55  ;;  %v222_v22 = vsub.f32 5.5, %v607_v55 }
  0x5b   :  { %v474_v20 = vadd.f32 -1.25, %v610_v56  ;;  %503 = vst [vmem:[%s820_s1 + $0x70] sm:$0xff] %v389_v14  ;;  %v395_v24 = vsub.f32 1.8333334, %v589_v43  ;;  %v124_v25 = vsel %vm122_vm1, 1.0, %v516_v17  ;;  %v314_v13 = vsub.f32 2.75, %v610_v56 }
  0x5c   :  { %v388_v21 = vmul.f32 %v386_v4, %v308_v15  ;;  %v315_v23 = vmul.f32 %v313_v6, %v225_v16  ;;  %v220_v27 = vmul.f32 %v456_v18, %v116_v54  ;;  %v224_v28 = vmul.f32 %v222_v22, %v124_v25 }
  0x5d   :  { %v393_v31 = vmul.f32 %v489_v19, %v307_v0  ;;  %v312_v32 = vmul.f32 %v474_v20, %v216_v1  ;;  %v490_v33 = vadd.f32 -0.5, %v614_v59  ;;  %v396_v43 = vsub.f32 1.8333334, %v614_v59 }
  0x5e   :  { %v390_v29 = vadd.f32 %v388_v21, %v384_v10  ;;  %v317_v30 = vadd.f32 %v315_v23, %v311_v11  ;;  %v226_v55 = vadd.f32 %v224_v28, %v220_v27 }
  0x5f   :  { %v394_v37 = vmul.f32 %v490_v33, %v308_v15 }
  0x60   :  { %504 = vst [vmem:[%s820_s1 + $0x78] sm:$0xff] %v390_v29  ;;  %v397_v34 = vmul.f32 %v395_v24, %v317_v30  ;;  %v316_v35 = vmul.f32 %v314_v13, %v226_v55 }
  0x62   :  { %v399_v17 = vadd.f32 %v397_v34, %v393_v31  ;;  %v318_v36 = vadd.f32 %v316_v35, %v312_v32 }
  0x64   :  { %505 = vst [vmem:[%s820_s1 + $0x80] sm:$0xff] %v399_v17  ;;  %v398_v56 = vmul.f32 %v396_v43, %v318_v36 }
  0x66   :  { %v400_v38 = vadd.f32 %v398_v56, %v394_v37 }
  0x68   :  { %506 = vst [vmem:[%s820_s1 + $0x88] sm:$0xff] %v400_v38 }

// kernel: kanc_mlp_forward.10
= control target key start
LH: loop header
LB: loop body
LE: loop exit
PB: predicated region body
PF: predicated region fallthrough
CT: control target
= control target key end

     0   :  { %v787_v0 = vmov 0.0   ;;  %vm186_vm0 = vcmask 195584   ;;  %s1503_s1 = inlined_call_operand.vmem [shape: f32[408,128], index: 1, kind: input, shape index: {}]   ;;  %s1504_s0 = inlined_call_operand.vmem [shape: f32[248,408], index: 0, kind: input, shape index: {}]   ;;  %s1505_s2 = inlined_call_operand.vmem [shape: f32[248,128], index: 2, kind: output, shape index: {}]  }
   0x1   :  { %280 = vmatprep.subr.mxu0 %v787_v0  ;;  %v150_v1 = vld [vmem:[%s1503_s1 + $0x78] sm:$0xff]  ;;  %v149_v2 = vld [vmem:[%s1503_s1 + $0x70] sm:$0xff]  ;;  %500 = vmatprep.subr.mxu1 %v787_v0  ;;  %v148_v3 = vld [vmem:[%s1503_s1 + $0x68] sm:$0xff] }
   0x2   :  { %281 = vmatpush1.msra.mxu0 %v150_v1  ;;  %v147_v4 = vld [vmem:[%s1503_s1 + $0x60] sm:$0xff]  ;;  %v182_v5 = vld [vmem:[%s1503_s1 + $0x178] sm:$0xff]  ;;  %v181_v6 = vld [vmem:[%s1503_s1 + $0x170] sm:$0xff] }
   0x3   :  { %282 = vmatprep.subr.mxu0 %v787_v0  ;;  %501 = vmatpush1.msra.mxu1 %v182_v5  ;;  %v146_v7 = vld [vmem:[%s1503_s1 + $0x58] sm:$0xff]  ;;  %v180_v8 = vld [vmem:[%s1503_s1 + $0x168] sm:$0xff]  ;;  %v145_v9 = vld [vmem:[%s1503_s1 + $0x50] sm:$0xff] }
   0x4   :  { %283 = vmatpush1.msra.mxu0 %v149_v2  ;;  %502 = vmatprep.subr.mxu1 %v787_v0  ;;  %v179_v10 = vld [vmem:[%s1503_s1 + $0x160] sm:$0xff]  ;;  %v144_v11 = vld [vmem:[%s1503_s1 + $0x48] sm:$0xff]  ;;  %v178_v12 = vld [vmem:[%s1503_s1 + $0x158] sm:$0xff] }
   0x5   :  { %284 = vmatprep.subr.mxu0 %v787_v0  ;;  %503 = vmatpush1.msra.mxu1 %v181_v6  ;;  %v143_v13 = vld [vmem:[%s1503_s1 + $0x40] sm:$0xff]  ;;  %v177_v14 = vld [vmem:[%s1503_s1 + $0x150] sm:$0xff]  ;;  %v142_v15 = vld [vmem:[%s1503_s1 + $0x38] sm:$0xff] }
   0x6   :  { %285 = vmatpush1.msra.mxu0 %v148_v3  ;;  %504 = vmatprep.subr.mxu1 %v787_v0  ;;  %v176_v16 = vld [vmem:[%s1503_s1 + $0x148] sm:$0xff]  ;;  %v141_v17 = vld [vmem:[%s1503_s1 + $0x30] sm:$0xff]  ;;  %v175_v18 = vld [vmem:[%s1503_s1 + $0x140] sm:$0xff] }
   0x7   :  { %286 = vmatprep.subr.mxu0 %v787_v0  ;;  %505 = vmatpush1.msra.mxu1 %v180_v8  ;;  %v140_v19 = vld [vmem:[%s1503_s1 + $0x28] sm:$0xff]  ;;  %v174_v20 = vld [vmem:[%s1503_s1 + $0x138] sm:$0xff]  ;;  %v139_v21 = vld [vmem:[%s1503_s1 + $0x20] sm:$0xff] }
   0x8   :  { %287 = vmatpush1.msra.mxu0 %v147_v4  ;;  %506 = vmatprep.subr.mxu1 %v787_v0  ;;  %v173_v22 = vld [vmem:[%s1503_s1 + $0x130] sm:$0xff]  ;;  %v138_v23 = vld [vmem:[%s1503_s1 + $0x18] sm:$0xff]  ;;  %v172_v24 = vld [vmem:[%s1503_s1 + $0x128] sm:$0xff] }
   0x9   :  { %288 = vmatprep.subr.mxu0 %v787_v0  ;;  %507 = vmatpush1.msra.mxu1 %v179_v10  ;;  %v137_v25 = vld [vmem:[%s1503_s1 + $0x10] sm:$0xff]  ;;  %v171_v26 = vld [vmem:[%s1503_s1 + $0x120] sm:$0xff]  ;;  %v136_v27 = vld [vmem:[%s1503_s1 + $0x8] sm:$0xff] }
   0xa   :  { %289 = vmatpush1.msra.mxu0 %v146_v7  ;;  %508 = vmatprep.subr.mxu1 %v787_v0  ;;  %v170_v28 = vld [vmem:[%s1503_s1 + $0x118] sm:$0xff]  ;;  %v135_v29 = vld [vmem:[%s1503_s1] sm:$0xff]  ;;  %v169_v30 = vld [vmem:[%s1503_s1 + $0x110] sm:$0xff] }
   0xb   :  { %290 = vmatprep.subr.mxu0 %v787_v0  ;;  %509 = vmatpush1.msra.mxu1 %v178_v12  ;;  %v166_v31 = vld [vmem:[%s1503_s1 + $0xf8] sm:$0xff]  ;;  %v168_v32 = vld [vmem:[%s1503_s1 + $0x108] sm:$0xff]  ;;  %v165_v33 = vld [vmem:[%s1503_s1 + $0xf0] sm:$0xff] }
   0xc   :  { %291 = vmatpush1.msra.mxu0 %v145_v9  ;;  %510 = vmatprep.subr.mxu1 %v787_v0  ;;  %v167_v34 = vld [vmem:[%s1503_s1 + $0x100] sm:$0xff]  ;;  %v164_v35 = vld [vmem:[%s1503_s1 + $0xe8] sm:$0xff]  ;;  %v185_v36 = vld [vmem:[%s1503_s1 + $0x190] sm:$0xff] }
   0xd   :  { %292 = vmatprep.subr.mxu0 %v787_v0  ;;  %511 = vmatpush1.msra.mxu1 %v177_v14  ;;  %v163_v37 = vld [vmem:[%s1503_s1 + $0xe0] sm:$0xff]  ;;  %v184_v38 = vld [vmem:[%s1503_s1 + $0x188] sm:$0xff]  ;;  %v162_v39 = vld [vmem:[%s1503_s1 + $0xd8] sm:$0xff] }
   0xe   :  { %293 = vmatpush1.msra.mxu0 %v144_v11  ;;  %512 = vmatprep.subr.mxu1 %v787_v0  ;;  %v183_v40 = vld [vmem:[%s1503_s1 + $0x180] sm:$0xff]  ;;  %v14_v41 = vld [vmem:[%s1504_s0 + $0x18] sm:$0xff]  ;;  %v161_v42 = vld [vmem:[%s1503_s1 + $0xd0] sm:$0xff] }
   0xf   :  { %294 = vmatprep.subr.mxu0 %v787_v0  ;;  %513 = vmatpush1.msra.mxu1 %v176_v16  ;;  %v13_v43 = vld [vmem:[%s1504_s0 + $0x10] sm:$0xff]  ;;  %v12_v44 = vld [vmem:[%s1504_s0 + $0x8] sm:$0xff]  ;;  %v18_v46 = vld [vmem:[%s1504_s0 + $0x38] sm:$0xff] }
  0x10   :  { %295 = vmatpush1.msra.mxu0 %v143_v13  ;;  %514 = vmatprep.subr.mxu1 %v787_v0  ;;  %v160_v45 = vld [vmem:[%s1503_s1 + $0xc8] sm:$0xff]  ;;  %v159_v47 = vld [vmem:[%s1503_s1 + $0xc0] sm:$0xff]  ;;  %v17_v48 = vld [vmem:[%s1504_s0 + $0x30] sm:$0xff] }
  0x11   :  { %296 = vmatprep.subr.mxu0 %v787_v0  ;;  %515 = vmatpush1.msra.mxu1 %v175_v18  ;;  %v22_v49 = vld [vmem:[%s1504_s0 + $0x58] sm:$0xff]  ;;  %v157_v51 = vld [vmem:[%s1503_s1 + $0xb0] sm:$0xff]  ;;  %v156_v54 = vld [vmem:[%s1503_s1 + $0xa8] sm:$0xff] }
  0x12   :  { %297 = vmatpush1.msra.mxu0 %v142_v15  ;;  %516 = vmatprep.subr.mxu1 %v787_v0  ;;  %v158_v50 = vld [vmem:[%s1503_s1 + $0xb8] sm:$0xff]  ;;  %v21_v52 = vld [vmem:[%s1504_s0 + $0x50] sm:$0xff]  ;;  %v155_v55 = vld [vmem:[%s1503_s1 + $0xa0] sm:$0xff] }
  0x13   :  { %298 = vmatprep.subr.mxu0 %v787_v0  ;;  %517 = vmatpush1.msra.mxu1 %v174_v20  ;;  %v26_v53 = vld [vmem:[%s1504_s0 + $0x78] sm:$0xff]  ;;  %v25_v56 = vld [vmem:[%s1504_s0 + $0x70] sm:$0xff]  ;;  %v152_v62 = vld [vmem:[%s1503_s1 + $0x88] sm:$0xff] }
  0x14   :  { %299 = vmatpush1.msra.mxu0 %v141_v17  ;;  %518 = vmatprep.subr.mxu1 %v787_v0  ;;  %v30_v57 = vld [vmem:[%s1504_s0 + $0x98] sm:$0xff]  ;;  %v153_v59 = vld [vmem:[%s1503_s1 + $0x90] sm:$0xff]  ;;  %v151_v63 = vld [vmem:[%s1503_s1 + $0x80] sm:$0xff] }
  0x15   :  { %300 = vmatprep.subr.mxu0 %v787_v0  ;;  %519 = vmatpush1.msra.mxu1 %v173_v22  ;;  %v154_v58 = vld [vmem:[%s1503_s1 + $0x98] sm:$0xff]  ;;  %v29_v60 = vld [vmem:[%s1504_s0 + $0x90] sm:$0xff]  ;;  %v11_v2 = vld [vmem:[%s1504_s0] sm:$0xff] }
  0x16   :  { %301 = vmatpush1.msra.mxu0 %v140_v19  ;;  %520 = vmatprep.subr.mxu1 %v787_v0  ;;  %v34_v61 = vld [vmem:[%s1504_s0 + $0xb8] sm:$0xff]  ;;  %v33_v1 = vld [vmem:[%s1504_s0 + $0xb0] sm:$0xff]  ;;  %v16_v4 = vld [vmem:[%s1504_s0 + $0x28] sm:$0xff] }
  0x17   :  { %302 = vmatprep.subr.mxu0 %v787_v0  ;;  %521 = vmatpush1.msra.mxu1 %v172_v24  ;;  %v38_v3 = vld [vmem:[%s1504_s0 + $0xd8] sm:$0xff]  ;;  %v37_v5 = vld [vmem:[%s1504_s0 + $0xd0] sm:$0xff]  ;;  %v15_v6 = vld [vmem:[%s1504_s0 + $0x20] sm:$0xff] }
  0x18   :  { %303 = vmatpush1.msra.mxu0 %v139_v21  ;;  %522 = vmatprep.subr.mxu1 %v787_v0  ;;  %v20_v7 = vld [vmem:[%s1504_s0 + $0x48] sm:$0xff]  ;;  %v41_v8 = vld [vmem:[%s1504_s0 + $0xf0] sm:$0xff]  ;;  %v19_v9 = vld [vmem:[%s1504_s0 + $0x40] sm:$0xff] }
  0x19   :  { %304 = vmatprep.subr.mxu0 %v787_v0  ;;  %523 = vmatpush1.msra.mxu1 %v171_v26  ;;  %v46_v10 = vld [vmem:[%s1504_s0 + $0x118] sm:$0xff]  ;;  %v24_v11 = vld [vmem:[%s1504_s0 + $0x68] sm:$0xff]  ;;  %v45_v12 = vld [vmem:[%s1504_s0 + $0x110] sm:$0xff] }
  0x1a   :  { %305 = vmatpush1.msra.mxu0 %v138_v23  ;;  %524 = vmatprep.subr.mxu1 %v787_v0  ;;  %v23_v13 = vld [vmem:[%s1504_s0 + $0x60] sm:$0xff]  ;;  %v50_v14 = vld [vmem:[%s1504_s0 + $0x138] sm:$0xff]  ;;  %v28_v15 = vld [vmem:[%s1504_s0 + $0x88] sm:$0xff] }
  0x1b   :  { %306 = vmatprep.subr.mxu0 %v787_v0  ;;  %525 = vmatpush1.msra.mxu1 %v170_v28  ;;  %v49_v16 = vld [vmem:[%s1504_s0 + $0x130] sm:$0xff]  ;;  %v27_v17 = vld [vmem:[%s1504_s0 + $0x80] sm:$0xff]  ;;  %v54_v18 = vld [vmem:[%s1504_s0 + $0x158] sm:$0xff] }
  0x1c   :  { %307 = vmatpush1.msra.mxu0 %v137_v25  ;;  %526 = vmatprep.subr.mxu1 %v787_v0  ;;  %v32_v19 = vld [vmem:[%s1504_s0 + $0xa8] sm:$0xff]  ;;  %v53_v20 = vld [vmem:[%s1504_s0 + $0x150] sm:$0xff]  ;;  %v31_v21 = vld [vmem:[%s1504_s0 + $0xa0] sm:$0xff] }
  0x1d   :  { %308 = vmatprep.subr.mxu0 %v787_v0  ;;  %527 = vmatpush1.msra.mxu1 %v169_v30  ;;  %v58_v22 = vld [vmem:[%s1504_s0 + $0x178] sm:$0xff]  ;;  %v36_v23 = vld [vmem:[%s1504_s0 + $0xc8] sm:$0xff]  ;;  %v57_v24 = vld [vmem:[%s1504_s0 + $0x170] sm:$0xff] }
  0x1e   :  { %309 = vmatpush1.msra.mxu0 %v136_v27  ;;  %528 = vmatprep.subr.mxu1 %v787_v0  ;;  %v35_v25 = vld [vmem:[%s1504_s0 + $0xc0] sm:$0xff]  ;;  %v62_v26 = vld [vmem:[%s1504_s0 + $0x198] sm:$0xff]  ;;  %v40_v27 = vld [vmem:[%s1504_s0 + $0xe8] sm:$0xff] }
  0x1f   :  { %310 = vmatprep.subr.mxu0 %v787_v0  ;;  %529 = vmatpush1.msra.mxu1 %v168_v32  ;;  %v61_v28 = vld [vmem:[%s1504_s0 + $0x190] sm:$0xff]  ;;  %v66_v30 = vld [vmem:[%s1504_s0 + $0x1b8] sm:$0xff] }
  0x20   :  { %311 = vmatpush1.msra.mxu0 %v135_v29  ;;  %530 = vmatprep.subr.mxu1 %v787_v0  ;;  %v39_v29 = vld [vmem:[%s1504_s0 + $0xe0] sm:$0xff]  ;;  %v65_v32 = vld [vmem:[%s1504_s0 + $0x1b0] sm:$0xff] }
  0x21   :  { %312 = vmatprep.subr.mxu0 %v787_v0  ;;  %531 = vmatpush1.msra.mxu1 %v167_v34  ;;  %v70_v34 = vld [vmem:[%s1504_s0 + $0x1d8] sm:$0xff] }
  0x22   :  { %313 = vmatpush2.msra.mxu0 %v166_v31  ;;  %558 = vmatprep.subr.mxu1 %v787_v0  ;;  %v44_v31 = vld [vmem:[%s1504_s0 + $0x108] sm:$0xff] }
  0x23   :  { %314 = vmatprep.subr.mxu0 %v787_v0  ;;  %559 = vmatpush2.msra.mxu1 %v185_v36  ;;  %v69_v36 = vld [vmem:[%s1504_s0 + $0x1d0] sm:$0xff] }
  0x24   :  { %315 = vmatpush2.msra.mxu0 %v165_v33  ;;  %560 = vmatprep.subr.mxu1 %v787_v0  ;;  %v43_v33 = vld [vmem:[%s1504_s0 + $0x100] sm:$0xff] }
  0x25   :  { %316 = vmatprep.subr.mxu0 %v787_v0  ;;  %561 = vmatpush2.msra.mxu1 %v184_v38  ;;  %v74_v38 = vld [vmem:[%s1504_s0 + $0x1f8] sm:$0xff] }
  0x26   :  { %317 = vmatpush2.msra.mxu0 %v164_v35  ;;  %562 = vmatprep.subr.mxu1 %v787_v0  ;;  %v48_v35 = vld [vmem:[%s1504_s0 + $0x128] sm:$0xff] }
  0x27   :  { %318 = vmatprep.subr.mxu0 %v787_v0  ;;  %563 = vmatpush2.msra.mxu1 %v183_v40  ;;  %v73_v40 = vld [vmem:[%s1504_s0 + $0x1f0] sm:$0xff] }
  0x28   :  { %319 = vmatpush2.msra.mxu0 %v163_v37  ;;  %755 = vmatprep.mubr.msk.f32.mxu1 %vm186_vm0, %v14_v41  ;;  %v47_v37 = vld [vmem:[%s1504_s0 + $0x120] sm:$0xff] }
  0x29   :  { %320 = vmatprep.subr.mxu0 %v787_v0  ;;  %565 = vmatmul.mubr.f32.vlgmr.msra.gmra.mxu1 %v13_v43  ;;  %v51_v41 = vld [vmem:[%s1504_s0 + $0x140] sm:$0xff]  ;;  %v56_v43 = vld [vmem:[%s1504_s0 + $0x168] sm:$0xff] }
  0x2a   :  { %321 = vmatpush2.msra.mxu0 %v162_v39  ;;  %344 = vmatprep.mubr.f32.mxu0 %v12_v44  ;;  %v52_v39 = vld [vmem:[%s1504_s0 + $0x148] sm:$0xff]  ;;  %v77_v44 = vld [vmem:[%s1504_s0 + $0x210] sm:$0xff] }
  0x2b   :  { %322 = vmatprep.subr.mxu0 %v787_v0  ;;  %756 = vmatprep.mubr.msk.f32.mxu1 %vm186_vm0, %v18_v46  ;;  %v82_v46 = vld [vmem:[%s1504_s0 + $0x238] sm:$0xff] }
  0x2c   :  { %323 = vmatpush2.msra.mxu0 %v161_v42  ;;  %v78_v42 = vld [vmem:[%s1504_s0 + $0x218] sm:$0xff] }
  0x2d   :  { %324 = vmatprep.subr.mxu0 %v787_v0  ;;  %570 = vmatmul.mubr.f32.gmra.mxu1 %v17_v48  ;;  %v81_v48 = vld [vmem:[%s1504_s0 + $0x230] sm:$0xff] }
  0x2e   :  { %325 = vmatpush2.msra.mxu0 %v160_v45  ;;  %757 = vmatprep.mubr.msk.f32.mxu1 %vm186_vm0, %v22_v49  ;;  %v55_v45 = vld [vmem:[%s1504_s0 + $0x160] sm:$0xff] }
  0x2f   :  { %326 = vmatprep.subr.mxu0 %v787_v0  ;;  %v59_v49 = vld [vmem:[%s1504_s0 + $0x180] sm:$0xff] }
  0x30   :  { %327 = vmatpush2.msra.mxu0 %v159_v47  ;;  %v60_v47 = vld [vmem:[%s1504_s0 + $0x188] sm:$0xff] }
  0x31   :  { %328 = vmatprep.subr.mxu0 %v787_v0  ;;  %575 = vmatmul.mubr.f32.gmra.mxu1 %v21_v52  ;;  %v85_v52 = vld [vmem:[%s1504_s0 + $0x250] sm:$0xff] }
  0x32   :  { %329 = vmatpush2.msra.mxu0 %v158_v50  ;;  %758 = vmatprep.mubr.msk.f32.mxu1 %vm186_vm0, %v26_v53  ;;  %v86_v50 = vld [vmem:[%s1504_s0 + $0x258] sm:$0xff]  ;;  %v63_v53 = vld [vmem:[%s1504_s0 + $0x1a0] sm:$0xff] }
  0x33   :  { %330 = vmatprep.subr.mxu0 %v787_v0 }
  0x34   :  { %331 = vmatpush2.msra.mxu0 %v157_v51  ;;  %v64_v51 = vld [vmem:[%s1504_s0 + $0x1a8] sm:$0xff] }
  0x35   :  { %332 = vmatprep.subr.mxu0 %v787_v0  ;;  %580 = vmatmul.mubr.f32.gmra.mxu1 %v25_v56  ;;  %v89_v56 = vld [vmem:[%s1504_s0 + $0x270] sm:$0xff] }
  0x36   :  { %333 = vmatpush2.msra.mxu0 %v156_v54  ;;  %759 = vmatprep.mubr.msk.f32.mxu1 %vm186_vm0, %v30_v57  ;;  %v90_v54 = vld [vmem:[%s1504_s0 + $0x278] sm:$0xff]  ;;  %v67_v57 = vld [vmem:[%s1504_s0 + $0x1c0] sm:$0xff] }
  0x37   :  { %334 = vmatprep.subr.mxu0 %v787_v0 }
  0x38   :  { %335 = vmatpush2.msra.mxu0 %v155_v55  ;;  %v68_v55 = vld [vmem:[%s1504_s0 + $0x1c8] sm:$0xff] }
  0x39   :  { %336 = vmatprep.subr.mxu0 %v787_v0  ;;  %585 = vmatmul.mubr.f32.gmra.mxu1 %v29_v60  ;;  %v93_v60 = vld [vmem:[%s1504_s0 + $0x290] sm:$0xff] }
  0x3a   :  { %337 = vmatpush2.msra.mxu0 %v154_v58  ;;  %760 = vmatprep.mubr.msk.f32.mxu1 %vm186_vm0, %v34_v61  ;;  %v94_v58 = vld [vmem:[%s1504_s0 + $0x298] sm:$0xff]  ;;  %v71_v61 = vld [vmem:[%s1504_s0 + $0x1e0] sm:$0xff] }
  0x3b   :  { %338 = vmatprep.subr.mxu0 %v787_v0 }
  0x3c   :  { %339 = vmatpush2.msra.mxu0 %v153_v59  ;;  %v72_v59 = vld [vmem:[%s1504_s0 + $0x1e8] sm:$0xff] }
  0x3d   :  { %340 = vmatprep.subr.mxu0 %v787_v0  ;;  %590 = vmatmul.mubr.f32.gmra.mxu1 %v33_v1  ;;  %v97_v1 = vld [vmem:[%s1504_s0 + $0x2b0] sm:$0xff] }
  0x3e   :  { %341 = vmatpush2.msra.mxu0 %v152_v62  ;;  %761 = vmatprep.mubr.msk.f32.mxu1 %vm186_vm0, %v38_v3  ;;  %v98_v62 = vld [vmem:[%s1504_s0 + $0x2b8] sm:$0xff] }
  0x3f   :  { %342 = vmatprep.subr.mxu0 %v787_v0  ;;  %v42_v0 = vld [vmem:[%s1504_s0 + $0xf8] sm:$0xff] }
  0x40   :  { %343 = vmatpush2.msra.mxu0 %v151_v63  ;;  %v76_v63 = vld [vmem:[%s1504_s0 + $0x208] sm:$0xff]  ;;  %v102_v3 = vld [vmem:[%s1504_s0 + $0x2d8] sm:$0xff] }
  0x41   :  { %345 = vmatmul.mubr.f32.vlgmr.msra.gmra.mxu0 %v11_v2  ;;  %595 = vmatmul.mubr.f32.gmra.mxu1 %v37_v5  ;;  %v75_v2 = vld [vmem:[%s1504_s0 + $0x200] sm:$0xff]  ;;  %v101_v5 = vld [vmem:[%s1504_s0 + $0x2d0] sm:$0xff] }
  0x42   :  { %349 = vmatprep.mubr.f32.mxu0 %v16_v4  ;;  %762 = vmatprep.mubr.msk.f32.mxu1 %vm186_vm0, %v42_v0  ;;  %v80_v4 = vld [vmem:[%s1504_s0 + $0x228] sm:$0xff]  ;;  %v106_v0 = vld [vmem:[%s1504_s0 + $0x2f8] sm:$0xff] }
  0x45   :  { %350 = vmatmul.mubr.f32.gmra.mxu0 %v15_v6  ;;  %600 = vmatmul.mubr.f32.gmra.mxu1 %v41_v8  ;;  %v79_v6 = vld [vmem:[%s1504_s0 + $0x220] sm:$0xff]  ;;  %v105_v8 = vld [vmem:[%s1504_s0 + $0x2f0] sm:$0xff] }
  0x46   :  { %354 = vmatprep.mubr.f32.mxu0 %v20_v7  ;;  %763 = vmatprep.mubr.msk.f32.mxu1 %vm186_vm0, %v46_v10  ;;  %v84_v7 = vld [vmem:[%s1504_s0 + $0x248] sm:$0xff]  ;;  %v110_v10 = vld [vmem:[%s1504_s0 + $0x318] sm:$0xff] }
  0x49   :  { %355 = vmatmul.mubr.f32.gmra.mxu0 %v19_v9  ;;  %605 = vmatmul.mubr.f32.gmra.mxu1 %v45_v12  ;;  %v83_v9 = vld [vmem:[%s1504_s0 + $0x240] sm:$0xff]  ;;  %v109_v12 = vld [vmem:[%s1504_s0 + $0x310] sm:$0xff] }
  0x4a   :  { %359 = vmatprep.mubr.f32.mxu0 %v24_v11  ;;  %764 = vmatprep.mubr.msk.f32.mxu1 %vm186_vm0, %v50_v14  ;;  %v88_v11 = vld [vmem:[%s1504_s0 + $0x268] sm:$0xff]  ;;  %v114_v14 = vld [vmem:[%s1504_s0 + $0x338] sm:$0xff] }
  0x4d   :  { %360 = vmatmul.mubr.f32.gmra.mxu0 %v23_v13  ;;  %610 = vmatmul.mubr.f32.gmra.mxu1 %v49_v16  ;;  %v87_v13 = vld [vmem:[%s1504_s0 + $0x260] sm:$0xff]  ;;  %v113_v16 = vld [vmem:[%s1504_s0 + $0x330] sm:$0xff] }
  0x4e   :  { %364 = vmatprep.mubr.f32.mxu0 %v28_v15  ;;  %765 = vmatprep.mubr.msk.f32.mxu1 %vm186_vm0, %v54_v18  ;;  %v92_v15 = vld [vmem:[%s1504_s0 + $0x288] sm:$0xff]  ;;  %v118_v18 = vld [vmem:[%s1504_s0 + $0x358] sm:$0xff] }
  0x51   :  { %365 = vmatmul.mubr.f32.gmra.mxu0 %v27_v17  ;;  %615 = vmatmul.mubr.f32.gmra.mxu1 %v53_v20  ;;  %v91_v17 = vld [vmem:[%s1504_s0 + $0x280] sm:$0xff]  ;;  %v117_v20 = vld [vmem:[%s1504_s0 + $0x350] sm:$0xff] }
  0x52   :  { %369 = vmatprep.mubr.f32.mxu0 %v32_v19  ;;  %766 = vmatprep.mubr.msk.f32.mxu1 %vm186_vm0, %v58_v22  ;;  %v96_v19 = vld [vmem:[%s1504_s0 + $0x2a8] sm:$0xff]  ;;  %v122_v22 = vld [vmem:[%s1504_s0 + $0x378] sm:$0xff] }
  0x55   :  { %370 = vmatmul.mubr.f32.gmra.mxu0 %v31_v21  ;;  %620 = vmatmul.mubr.f32.gmra.mxu1 %v57_v24  ;;  %v95_v21 = vld [vmem:[%s1504_s0 + $0x2a0] sm:$0xff]  ;;  %v121_v24 = vld [vmem:[%s1504_s0 + $0x370] sm:$0xff] }
  0x56   :  { %374 = vmatprep.mubr.f32.mxu0 %v36_v23  ;;  %767 = vmatprep.mubr.msk.f32.mxu1 %vm186_vm0, %v62_v26  ;;  %v100_v23 = vld [vmem:[%s1504_s0 + $0x2c8] sm:$0xff]  ;;  %v126_v26 = vld [vmem:[%s1504_s0 + $0x398] sm:$0xff] }
  0x59   :  { %375 = vmatmul.mubr.f32.gmra.mxu0 %v35_v25  ;;  %625 = vmatmul.mubr.f32.gmra.mxu1 %v61_v28  ;;  %v99_v25 = vld [vmem:[%s1504_s0 + $0x2c0] sm:$0xff]  ;;  %v125_v28 = vld [vmem:[%s1504_s0 + $0x390] sm:$0xff] }
  0x5a   :  { %379 = vmatprep.mubr.f32.mxu0 %v40_v27  ;;  %768 = vmatprep.mubr.msk.f32.mxu1 %vm186_vm0, %v66_v30  ;;  %v104_v27 = vld [vmem:[%s1504_s0 + $0x2e8] sm:$0xff]  ;;  %v130_v30 = vld [vmem:[%s1504_s0 + $0x3b8] sm:$0xff] }
  0x5d   :  { %380 = vmatmul.mubr.f32.gmra.mxu0 %v39_v29  ;;  %630 = vmatmul.mubr.f32.gmra.mxu1 %v65_v32  ;;  %v103_v29 = vld [vmem:[%s1504_s0 + $0x2e0] sm:$0xff]  ;;  %v129_v32 = vld [vmem:[%s1504_s0 + $0x3b0] sm:$0xff] }
  0x5e   :  { %384 = vmatprep.mubr.f32.mxu0 %v44_v31  ;;  %769 = vmatprep.mubr.msk.f32.mxu1 %vm186_vm0, %v70_v34  ;;  %v108_v31 = vld [vmem:[%s1504_s0 + $0x308] sm:$0xff]  ;;  %v134_v34 = vld [vmem:[%s1504_s0 + $0x3d8] sm:$0xff] }
  0x61   :  { %385 = vmatmul.mubr.f32.gmra.mxu0 %v43_v33  ;;  %635 = vmatmul.mubr.f32.gmra.mxu1 %v69_v36  ;;  %v107_v33 = vld [vmem:[%s1504_s0 + $0x300] sm:$0xff]  ;;  %v133_v36 = vld [vmem:[%s1504_s0 + $0x3d0] sm:$0xff] }
  0x62   :  { %389 = vmatprep.mubr.f32.mxu0 %v48_v35  ;;  %770 = vmatprep.mubr.msk.f32.mxu1 %vm186_vm0, %v74_v38  ;;  %v112_v35 = vld [vmem:[%s1504_s0 + $0x328] sm:$0xff] }
  0x63   :  { %v116_v38 = vld [vmem:[%s1504_s0 + $0x348] sm:$0xff] }
  0x65   :  { %390 = vmatmul.mubr.f32.gmra.mxu0 %v47_v37  ;;  %640 = vmatmul.mubr.f32.gmra.mxu1 %v73_v40  ;;  %v111_v37 = vld [vmem:[%s1504_s0 + $0x320] sm:$0xff]  ;;  %v120_v40 = vld [vmem:[%s1504_s0 + $0x368] sm:$0xff] }
  0x66   :  { %394 = vmatprep.mubr.f32.mxu0 %v52_v39  ;;  %771 = vmatprep.mubr.msk.f32.mxu1 %vm186_vm0, %v78_v42  ;;  %v115_v39 = vld [vmem:[%s1504_s0 + $0x340] sm:$0xff]  ;;  %v124_v42 = vld [vmem:[%s1504_s0 + $0x388] sm:$0xff] }
  0x69   :  { %395 = vmatmul.mubr.f32.gmra.mxu0 %v51_v41  ;;  %645 = vmatmul.mubr.f32.gmra.mxu1 %v77_v44  ;;  %v119_v41 = vld [vmem:[%s1504_s0 + $0x360] sm:$0xff]  ;;  %v128_v44 = vld [vmem:[%s1504_s0 + $0x3a8] sm:$0xff] }
  0x6a   :  { %399 = vmatprep.mubr.f32.mxu0 %v56_v43  ;;  %772 = vmatprep.mubr.msk.f32.mxu1 %vm186_vm0, %v82_v46  ;;  %v123_v43 = vld [vmem:[%s1504_s0 + $0x380] sm:$0xff]  ;;  %v132_v46 = vld [vmem:[%s1504_s0 + $0x3c8] sm:$0xff] }
  0x6d   :  { %400 = vmatmul.mubr.f32.gmra.mxu0 %v55_v45  ;;  %650 = vmatmul.mubr.f32.gmra.mxu1 %v81_v48  ;;  %v127_v45 = vld [vmem:[%s1504_s0 + $0x3a0] sm:$0xff] }
  0x6e   :  { %404 = vmatprep.mubr.f32.mxu0 %v60_v47  ;;  %773 = vmatprep.mubr.msk.f32.mxu1 %vm186_vm0, %v86_v50  ;;  %v131_v47 = vld [vmem:[%s1504_s0 + $0x3c0] sm:$0xff] }
  0x71   :  { %405 = vmatmul.mubr.f32.gmra.mxu0 %v59_v49  ;;  %655 = vmatmul.mubr.f32.gmra.mxu1 %v85_v52 }
  0x72   :  { %409 = vmatprep.mubr.f32.mxu0 %v64_v51  ;;  %774 = vmatprep.mubr.msk.f32.mxu1 %vm186_vm0, %v90_v54 }
  0x75   :  { %410 = vmatmul.mubr.f32.gmra.mxu0 %v63_v53  ;;  %660 = vmatmul.mubr.f32.gmra.mxu1 %v89_v56 }
  0x76   :  { %414 = vmatprep.mubr.f32.mxu0 %v68_v55  ;;  %775 = vmatprep.mubr.msk.f32.mxu1 %vm186_vm0, %v94_v58 }
  0x79   :  { %415 = vmatmul.mubr.f32.gmra.mxu0 %v67_v57  ;;  %665 = vmatmul.mubr.f32.gmra.mxu1 %v93_v60 }
  0x7a   :  { %419 = vmatprep.mubr.f32.mxu0 %v72_v59  ;;  %776 = vmatprep.mubr.msk.f32.mxu1 %vm186_vm0, %v98_v62 }
  0x7d   :  { %420 = vmatmul.mubr.f32.gmra.mxu0 %v71_v61  ;;  %670 = vmatmul.mubr.f32.gmra.mxu1 %v97_v1 }
  0x7e   :  { %424 = vmatprep.mubr.f32.mxu0 %v76_v63  ;;  %777 = vmatprep.mubr.msk.f32.mxu1 %vm186_vm0, %v102_v3 }
  0x81   :  { %425 = vmatmul.mubr.f32.gmra.mxu0 %v75_v2  ;;  %675 = vmatmul.mubr.f32.gmra.mxu1 %v101_v5 }
  0x82   :  { %429 = vmatprep.mubr.f32.mxu0 %v80_v4  ;;  %778 = vmatprep.mubr.msk.f32.mxu1 %vm186_vm0, %v106_v0 }
  0x85   :  { %430 = vmatmul.mubr.f32.gmra.mxu0 %v79_v6  ;;  %680 = vmatmul.mubr.f32.gmra.mxu1 %v105_v8 }
  0x86   :  { %434 = vmatprep.mubr.f32.mxu0 %v84_v7  ;;  %779 = vmatprep.mubr.msk.f32.mxu1 %vm186_vm0, %v110_v10 }
  0x89   :  { %435 = vmatmul.mubr.f32.gmra.mxu0 %v83_v9  ;;  %685 = vmatmul.mubr.f32.gmra.mxu1 %v109_v12 }
  0x8a   :  { %439 = vmatprep.mubr.f32.mxu0 %v88_v11  ;;  %780 = vmatprep.mubr.msk.f32.mxu1 %vm186_vm0, %v114_v14 }
  0x8d   :  { %440 = vmatmul.mubr.f32.gmra.mxu0 %v87_v13  ;;  %690 = vmatmul.mubr.f32.gmra.mxu1 %v113_v16 }
  0x8e   :  { %444 = vmatprep.mubr.f32.mxu0 %v92_v15  ;;  %781 = vmatprep.mubr.msk.f32.mxu1 %vm186_vm0, %v118_v18 }
  0x91   :  { %445 = vmatmul.mubr.f32.gmra.mxu0 %v91_v17  ;;  %695 = vmatmul.mubr.f32.gmra.mxu1 %v117_v20 }
  0x92   :  { %449 = vmatprep.mubr.f32.mxu0 %v96_v19  ;;  %782 = vmatprep.mubr.msk.f32.mxu1 %vm186_vm0, %v122_v22 }
  0x95   :  { %450 = vmatmul.mubr.f32.gmra.mxu0 %v95_v21  ;;  %700 = vmatmul.mubr.f32.gmra.mxu1 %v121_v24 }
  0x96   :  { %454 = vmatprep.mubr.f32.mxu0 %v100_v23  ;;  %783 = vmatprep.mubr.msk.f32.mxu1 %vm186_vm0, %v126_v26 }
  0x99   :  { %455 = vmatmul.mubr.f32.gmra.mxu0 %v99_v25  ;;  %705 = vmatmul.mubr.f32.gmra.mxu1 %v125_v28 }
  0x9a   :  { %459 = vmatprep.mubr.f32.mxu0 %v104_v27  ;;  %784 = vmatprep.mubr.msk.f32.mxu1 %vm186_vm0, %v130_v30 }
  0x9d   :  { %460 = vmatmul.mubr.f32.gmra.mxu0 %v103_v29  ;;  %710 = vmatmul.mubr.f32.gmra.mxu1 %v129_v32 }
  0x9e   :  { %464 = vmatprep.mubr.f32.mxu0 %v108_v31  ;;  %785 = vmatprep.mubr.msk.f32.mxu1 %vm186_vm0, %v134_v34 }
  0xa1   :  { %465 = vmatmul.mubr.f32.gmra.mxu0 %v107_v33  ;;  %715 = vmatmul.mubr.f32.gmra.mxu1 %v133_v36 }
  0xa2   :  { %469 = vmatprep.mubr.f32.mxu0 %v112_v35 }
  0xa5   :  { %470 = vmatmul.mubr.f32.gmra.mxu0 %v111_v37 }
  0xa6   :  { %474 = vmatprep.mubr.f32.mxu0 %v116_v38 }
  0xa9   :  { %475 = vmatmul.mubr.f32.gmra.mxu0 %v115_v39 }
  0xaa   :  { %479 = vmatprep.mubr.f32.mxu0 %v120_v40 }
  0xad   :  { %480 = vmatmul.mubr.f32.gmra.mxu0 %v119_v41 }
  0xae   :  { %484 = vmatprep.mubr.f32.mxu0 %v124_v42 }
  0xb1   :  { %485 = vmatmul.mubr.f32.gmra.mxu0 %v123_v43 }
  0xb2   :  { %489 = vmatprep.mubr.f32.mxu0 %v128_v44 }
  0xb5   :  { %490 = vmatmul.mubr.f32.gmra.mxu0 %v127_v45 }
  0xb6   :  { %494 = vmatprep.mubr.f32.mxu0 %v132_v46 }
  0xb9   :  { %495 = vmatmul.mubr.f32.gmra.mxu0 %v131_v47 }
  0xe9   :  { %v566_v48 = vpop.f32.mrf.mxu1 }
  0xeb   :  { %v568_v49 = vpop.f32.mrf.mxu1 }
  0xed   :  { %v571_v50 = vpop.f32.mrf.mxu1 }
  0xef   :  { %v573_v51 = vpop.f32.mrf.mxu1 }
  0xf1   :  { %v576_v52 = vpop.f32.mrf.mxu1 }
  0xf3   :  { %v578_v53 = vpop.f32.mrf.mxu1 }
  0xf5   :  { %v581_v54 = vpop.f32.mrf.mxu1 }
  0xf7   :  { %v583_v55 = vpop.f32.mrf.mxu1 }
  0xf9   :  { %v586_v56 = vpop.f32.mrf.mxu1 }
  0xfb   :  { %v588_v57 = vpop.f32.mrf.mxu1 }
  0xfd   :  { %v591_v58 = vpop.f32.mrf.mxu1 }
  0xff   :  { %v593_v61 = vpop.f32.mrf.mxu1 }
 0x101   :  { %v346_v59 = vpop.f32.mrf.mxu0  ;;  %v596_v63 = vpop.f32.mrf.mxu1 }
 0x102   :  { %v567_v60 = vadd.f32 %v566_v48, %v346_v59 }
 0x103   :  { %v348_v62 = vpop.f32.mrf.mxu0  ;;  %v598_v3 = vpop.f32.mrf.mxu1 }
 0x104   :  { %720 = vst [vmem:[%s1505_s2] sm:$0xff] %v567_v60 }
 0x105   :  { %v351_v1 = vpop.f32.mrf.mxu0  ;;  %v601_v5 = vpop.f32.mrf.mxu1 }
 0x106   :  { %v572_v2 = vadd.f32 %v571_v50, %v351_v1 }
 0x107   :  { %v353_v4 = vpop.f32.mrf.mxu0  ;;  %v603_v7 = vpop.f32.mrf.mxu1 }
 0x108   :  { %721 = vst [vmem:[%s1505_s2 + $0x8] sm:$0xff] %v572_v2 }
 0x109   :  { %v356_v6 = vpop.f32.mrf.mxu0  ;;  %v606_v9 = vpop.f32.mrf.mxu1 }
 0x10a   :  { %v577_v0 = vadd.f32 %v576_v52, %v356_v6 }
 0x10b   :  { %v358_v8 = vpop.f32.mrf.mxu0  ;;  %v608_v12 = vpop.f32.mrf.mxu1 }
 0x10c   :  { %722 = vst [vmem:[%s1505_s2 + $0x10] sm:$0xff] %v577_v0 }
 0x10d   :  { %v361_v10 = vpop.f32.mrf.mxu0  ;;  %v611_v14 = vpop.f32.mrf.mxu1 }
 0x10e   :  { %v582_v11 = vadd.f32 %v581_v54, %v361_v10 }
 0x10f   :  { %v363_v13 = vpop.f32.mrf.mxu0  ;;  %v613_v17 = vpop.f32.mrf.mxu1 }
 0x110   :  { %723 = vst [vmem:[%s1505_s2 + $0x18] sm:$0xff] %v582_v11 }
 0x111   :  { %v366_v15 = vpop.f32.mrf.mxu0  ;;  %v616_v19 = vpop.f32.mrf.mxu1 }
 0x112   :  { %v587_v16 = vadd.f32 %v586_v56, %v366_v15 }
 0x113   :  { %v368_v18 = vpop.f32.mrf.mxu0  ;;  %v618_v22 = vpop.f32.mrf.mxu1 }
 0x114   :  { %724 = vst [vmem:[%s1505_s2 + $0x20] sm:$0xff] %v587_v16 }
 0x115   :  { %v371_v20 = vpop.f32.mrf.mxu0  ;;  %v621_v24 = vpop.f32.mrf.mxu1 }
 0x116   :  { %v592_v21 = vadd.f32 %v591_v58, %v371_v20 }
 0x117   :  { %v373_v23 = vpop.f32.mrf.mxu0  ;;  %v623_v27 = vpop.f32.mrf.mxu1 }
 0x118   :  { %725 = vst [vmem:[%s1505_s2 + $0x28] sm:$0xff] %v592_v21 }
 0x119   :  { %v376_v25 = vpop.f32.mrf.mxu0  ;;  %v626_v29 = vpop.f32.mrf.mxu1 }
 0x11a   :  { %v597_v26 = vadd.f32 %v596_v63, %v376_v25 }
 0x11b   :  { %v378_v28 = vpop.f32.mrf.mxu0  ;;  %v628_v32 = vpop.f32.mrf.mxu1 }
 0x11c   :  { %726 = vst [vmem:[%s1505_s2 + $0x30] sm:$0xff] %v597_v26 }
 0x11d   :  { %v381_v30 = vpop.f32.mrf.mxu0  ;;  %v631_v34 = vpop.f32.mrf.mxu1 }
 0x11e   :  { %v602_v31 = vadd.f32 %v601_v5, %v381_v30 }
 0x11f   :  { %v383_v33 = vpop.f32.mrf.mxu0  ;;  %v633_v37 = vpop.f32.mrf.mxu1 }
 0x120   :  { %727 = vst [vmem:[%s1505_s2 + $0x38] sm:$0xff] %v602_v31 }
 0x121   :  { %v386_v35 = vpop.f32.mrf.mxu0  ;;  %v636_v39 = vpop.f32.mrf.mxu1 }
 0x122   :  { %v607_v36 = vadd.f32 %v606_v9, %v386_v35 }
 0x123   :  { %v388_v38 = vpop.f32.mrf.mxu0  ;;  %v638_v42 = vpop.f32.mrf.mxu1 }
 0x124   :  { %728 = vst [vmem:[%s1505_s2 + $0x40] sm:$0xff] %v607_v36 }
 0x125   :  { %v391_v40 = vpop.f32.mrf.mxu0  ;;  %v641_v44 = vpop.f32.mrf.mxu1 }
 0x126   :  { %v612_v41 = vadd.f32 %v611_v14, %v391_v40 }
 0x127   :  { %v393_v43 = vpop.f32.mrf.mxu0  ;;  %v643_v47 = vpop.f32.mrf.mxu1 }
 0x128   :  { %729 = vst [vmem:[%s1505_s2 + $0x48] sm:$0xff] %v612_v41 }
 0x129   :  { %v396_v45 = vpop.f32.mrf.mxu0  ;;  %v646_v49 = vpop.f32.mrf.mxu1 }
 0x12a   :  { %v617_v46 = vadd.f32 %v616_v19, %v396_v45 }
 0x12b   :  { %v398_v48 = vpop.f32.mrf.mxu0  ;;  %v648_v52 = vpop.f32.mrf.mxu1 }
 0x12c   :  { %730 = vst [vmem:[%s1505_s2 + $0x50] sm:$0xff] %v617_v46 }
 0x12d   :  { %v401_v50 = vpop.f32.mrf.mxu0  ;;  %v651_v54 = vpop.f32.mrf.mxu1 }
 0x12e   :  { %v622_v51 = vadd.f32 %v621_v24, %v401_v50 }
 0x12f   :  { %v403_v53 = vpop.f32.mrf.mxu0  ;;  %v653_v57 = vpop.f32.mrf.mxu1 }
 0x130   :  { %731 = vst [vmem:[%s1505_s2 + $0x58] sm:$0xff] %v622_v51 }
 0x131   :  { %v406_v55 = vpop.f32.mrf.mxu0  ;;  %v656_v59 = vpop.f32.mrf.mxu1 }
 0x132   :  { %v627_v56 = vadd.f32 %v626_v29, %v406_v55 }
 0x133   :  { %v408_v58 = vpop.f32.mrf.mxu0  ;;  %v658_v62 = vpop.f32.mrf.mxu1 }
 0x134   :  { %732 = vst [vmem:[%s1505_s2 + $0x60] sm:$0xff] %v627_v56 }
 0x135   :  { %v411_v60 = vpop.f32.mrf.mxu0  ;;  %v661_v1 = vpop.f32.mrf.mxu1 }
 0x136   :  { %v632_v61 = vadd.f32 %v631_v34, %v411_v60 }
 0x137   :  { %v413_v63 = vpop.f32.mrf.mxu0  ;;  %v663_v4 = vpop.f32.mrf.mxu1 }
 0x138   :  { %733 = vst [vmem:[%s1505_s2 + $0x68] sm:$0xff] %v632_v61 }
 0x139   :  { %v416_v2 = vpop.f32.mrf.mxu0  ;;  %v666_v6 = vpop.f32.mrf.mxu1 }
 0x13a   :  { %v637_v3 = vadd.f32 %v636_v39, %v416_v2 }
 0x13b   :  { %v418_v5 = vpop.f32.mrf.mxu0  ;;  %v668_v8 = vpop.f32.mrf.mxu1 }
 0x13c   :  { %734 = vst [vmem:[%s1505_s2 + $0x70] sm:$0xff] %v637_v3 }
 0x13d   :  { %v421_v0 = vpop.f32.mrf.mxu0  ;;  %v671_v10 = vpop.f32.mrf.mxu1 }
 0x13e   :  { %v642_v7 = vadd.f32 %v641_v44, %v421_v0 }
 0x13f   :  { %v423_v9 = vpop.f32.mrf.mxu0  ;;  %v673_v13 = vpop.f32.mrf.mxu1 }
 0x140   :  { %735 = vst [vmem:[%s1505_s2 + $0x78] sm:$0xff] %v642_v7 }
 0x141   :  { %v426_v11 = vpop.f32.mrf.mxu0  ;;  %v676_v15 = vpop.f32.mrf.mxu1 }
 0x142   :  { %v647_v12 = vadd.f32 %v646_v49, %v426_v11 }
 0x143   :  { %v428_v14 = vpop.f32.mrf.mxu0  ;;  %v678_v18 = vpop.f32.mrf.mxu1 }
 0x144   :  { %736 = vst [vmem:[%s1505_s2 + $0x80] sm:$0xff] %v647_v12 }
 0x145   :  { %v431_v16 = vpop.f32.mrf.mxu0  ;;  %v681_v20 = vpop.f32.mrf.mxu1 }
 0x146   :  { %v652_v17 = vadd.f32 %v651_v54, %v431_v16 }
 0x147   :  { %v433_v19 = vpop.f32.mrf.mxu0  ;;  %v683_v23 = vpop.f32.mrf.mxu1 }
 0x148   :  { %737 = vst [vmem:[%s1505_s2 + $0x88] sm:$0xff] %v652_v17 }
 0x149   :  { %v436_v21 = vpop.f32.mrf.mxu0  ;;  %v686_v25 = vpop.f32.mrf.mxu1 }
 0x14a   :  { %v657_v22 = vadd.f32 %v656_v59, %v436_v21 }
 0x14b   :  { %v438_v24 = vpop.f32.mrf.mxu0  ;;  %v688_v28 = vpop.f32.mrf.mxu1 }
 0x14c   :  { %738 = vst [vmem:[%s1505_s2 + $0x90] sm:$0xff] %v657_v22 }
 0x14d   :  { %v441_v26 = vpop.f32.mrf.mxu0  ;;  %v691_v30 = vpop.f32.mrf.mxu1 }
 0x14e   :  { %v662_v27 = vadd.f32 %v661_v1, %v441_v26 }
 0x14f   :  { %v443_v29 = vpop.f32.mrf.mxu0  ;;  %v693_v33 = vpop.f32.mrf.mxu1 }
 0x150   :  { %739 = vst [vmem:[%s1505_s2 + $0x98] sm:$0xff] %v662_v27 }
 0x151   :  { %v446_v31 = vpop.f32.mrf.mxu0  ;;  %v696_v35 = vpop.f32.mrf.mxu1 }
 0x152   :  { %v667_v32 = vadd.f32 %v666_v6, %v446_v31 }
 0x153   :  { %v448_v34 = vpop.f32.mrf.mxu0  ;;  %v698_v38 = vpop.f32.mrf.mxu1 }
 0x154   :  { %740 = vst [vmem:[%s1505_s2 + $0xa0] sm:$0xff] %v667_v32 }
 0x155   :  { %v451_v36 = vpop.f32.mrf.mxu0  ;;  %v701_v40 = vpop.f32.mrf.mxu1 }
 0x156   :  { %v672_v37 = vadd.f32 %v671_v10, %v451_v36 }
 0x157   :  { %v453_v39 = vpop.f32.mrf.mxu0  ;;  %v703_v43 = vpop.f32.mrf.mxu1 }
 0x158   :  { %741 = vst [vmem:[%s1505_s2 + $0xa8] sm:$0xff] %v672_v37 }
 0x159   :  { %v456_v41 = vpop.f32.mrf.mxu0  ;;  %v706_v45 = vpop.f32.mrf.mxu1 }
 0x15a   :  { %v677_v42 = vadd.f32 %v676_v15, %v456_v41 }
 0x15b   :  { %v458_v44 = vpop.f32.mrf.mxu0  ;;  %v708_v48 = vpop.f32.mrf.mxu1 }
 0x15c   :  { %742 = vst [vmem:[%s1505_s2 + $0xb0] sm:$0xff] %v677_v42 }
 0x15d   :  { %v461_v46 = vpop.f32.mrf.mxu0  ;;  %v711_v50 = vpop.f32.mrf.mxu1 }
 0x15e   :  { %v682_v47 = vadd.f32 %v681_v20, %v461_v46 }
 0x15f   :  { %v463_v49 = vpop.f32.mrf.mxu0  ;;  %v713_v53 = vpop.f32.mrf.mxu1 }
 0x160   :  { %743 = vst [vmem:[%s1505_s2 + $0xb8] sm:$0xff] %v682_v47 }
 0x161   :  { %v466_v51 = vpop.f32.mrf.mxu0  ;;  %v716_v55 = vpop.f32.mrf.mxu1 }
 0x162   :  { %v687_v52 = vadd.f32 %v686_v25, %v466_v51 }
 0x163   :  { %v468_v54 = vpop.f32.mrf.mxu0  ;;  %v718_v58 = vpop.f32.mrf.mxu1 }
 0x164   :  { %744 = vst [vmem:[%s1505_s2 + $0xc0] sm:$0xff] %v687_v52 }
 0x165   :  { %v471_v56 = vpop.f32.mrf.mxu0 }
 0x166   :  { %v692_v57 = vadd.f32 %v691_v30, %v471_v56 }
 0x167   :  { %v473_v59 = vpop.f32.mrf.mxu0 }
 0x168   :  { %745 = vst [vmem:[%s1505_s2 + $0xc8] sm:$0xff] %v692_v57 }
 0x169   :  { %v476_v60 = vpop.f32.mrf.mxu0 }
 0x16a   :  { %v697_v61 = vadd.f32 %v696_v35, %v476_v60 }
 0x16b   :  { %v478_v62 = vpop.f32.mrf.mxu0 }
 0x16c   :  { %746 = vst [vmem:[%s1505_s2 + $0xd0] sm:$0xff] %v697_v61 }
 0x16d   :  { %v481_v63 = vpop.f32.mrf.mxu0 }
 0x16e   :  { %v702_v1 = vadd.f32 %v701_v40, %v481_v63 }
 0x16f   :  { %v483_v2 = vpop.f32.mrf.mxu0 }
 0x170   :  { %747 = vst [vmem:[%s1505_s2 + $0xd8] sm:$0xff] %v702_v1 }
 0x171   :  { %v486_v3 = vpop.f32.mrf.mxu0 }
 0x172   :  { %v707_v4 = vadd.f32 %v706_v45, %v486_v3 }
 0x173   :  { %v488_v5 = vpop.f32.mrf.mxu0 }
 0x174   :  { %748 = vst [vmem:[%s1505_s2 + $0xe0] sm:$0xff] %v707_v4 }
 0x175   :  { %v491_v6 = vpop.f32.mrf.mxu0 }
 0x176   :  { %v712_v0 = vadd.f32 %v711_v50, %v491_v6 }
 0x177   :  { %v493_v7 = vpop.f32.mrf.mxu0 }
 0x178   :  { %749 = vst [vmem:[%s1505_s2 + $0xe8] sm:$0xff] %v712_v0 }
 0x179   :  { %v496_v8 = vpop.f32.mrf.mxu0 }
 0x17a   :  { %v717_v9 = vadd.f32 %v716_v55, %v496_v8 }
 0x17b   :  { %v498_v10 = vpop.f32.mrf.mxu0 }
 0x17c   :  { %750 = vst [vmem:[%s1505_s2 + $0xf0] sm:$0xff] %v717_v9 }

// kernel: kanc_mlp_forward.12
= control target key start
LH: loop header
LB: loop body
LE: loop exit
PB: predicated region body
PF: predicated region fallthrough
CT: control target
= control target key end

     0   :  { %v597_v0 = vmov 0.0   ;;  %vm146_vm0 = vcmask 195584   ;;  %s1153_s1 = inlined_call_operand.vmem [shape: f32[408,128], index: 1, kind: input, shape index: {}]   ;;  %s1154_s0 = inlined_call_operand.vmem [shape: f32[168,408], index: 0, kind: input, shape index: {}]   ;;  %s1155_s2 = inlined_call_operand.vmem [shape: f32[168,128], index: 2, kind: output, shape index: {}]  }
   0x1   :  { %210 = vmatprep.subr.mxu0 %v597_v0  ;;  %v110_v1 = vld [vmem:[%s1153_s1 + $0x78] sm:$0xff]  ;;  %v109_v2 = vld [vmem:[%s1153_s1 + $0x70] sm:$0xff]  ;;  %380 = vmatprep.subr.mxu1 %v597_v0  ;;  %v108_v3 = vld [vmem:[%s1153_s1 + $0x68] sm:$0xff] }
   0x2   :  { %211 = vmatpush1.msra.mxu0 %v110_v1  ;;  %v107_v4 = vld [vmem:[%s1153_s1 + $0x60] sm:$0xff]  ;;  %v142_v5 = vld [vmem:[%s1153_s1 + $0x178] sm:$0xff]  ;;  %v141_v6 = vld [vmem:[%s1153_s1 + $0x170] sm:$0xff] }
   0x3   :  { %212 = vmatprep.subr.mxu0 %v597_v0  ;;  %381 = vmatpush1.msra.mxu1 %v142_v5  ;;  %v106_v7 = vld [vmem:[%s1153_s1 + $0x58] sm:$0xff]  ;;  %v140_v8 = vld [vmem:[%s1153_s1 + $0x168] sm:$0xff]  ;;  %v105_v9 = vld [vmem:[%s1153_s1 + $0x50] sm:$0xff] }
   0x4   :  { %213 = vmatpush1.msra.mxu0 %v109_v2  ;;  %382 = vmatprep.subr.mxu1 %v597_v0  ;;  %v139_v10 = vld [vmem:[%s1153_s1 + $0x160] sm:$0xff]  ;;  %v104_v11 = vld [vmem:[%s1153_s1 + $0x48] sm:$0xff]  ;;  %v138_v12 = vld [vmem:[%s1153_s1 + $0x158] sm:$0xff] }
   0x5   :  { %214 = vmatprep.subr.mxu0 %v597_v0  ;;  %383 = vmatpush1.msra.mxu1 %v141_v6  ;;  %v103_v13 = vld [vmem:[%s1153_s1 + $0x40] sm:$0xff]  ;;  %v137_v14 = vld [vmem:[%s1153_s1 + $0x150] sm:$0xff]  ;;  %v102_v15 = vld [vmem:[%s1153_s1 + $0x38] sm:$0xff] }
   0x6   :  { %215 = vmatpush1.msra.mxu0 %v108_v3  ;;  %384 = vmatprep.subr.mxu1 %v597_v0  ;;  %v136_v16 = vld [vmem:[%s1153_s1 + $0x148] sm:$0xff]  ;;  %v101_v17 = vld [vmem:[%s1153_s1 + $0x30] sm:$0xff]  ;;  %v135_v18 = vld [vmem:[%s1153_s1 + $0x140] sm:$0xff] }
   0x7   :  { %216 = vmatprep.subr.mxu0 %v597_v0  ;;  %385 = vmatpush1.msra.mxu1 %v140_v8  ;;  %v100_v19 = vld [vmem:[%s1153_s1 + $0x28] sm:$0xff]  ;;  %v134_v20 = vld [vmem:[%s1153_s1 + $0x138] sm:$0xff]  ;;  %v99_v21 = vld [vmem:[%s1153_s1 + $0x20] sm:$0xff] }
   0x8   :  { %217 = vmatpush1.msra.mxu0 %v107_v4  ;;  %386 = vmatprep.subr.mxu1 %v597_v0  ;;  %v133_v22 = vld [vmem:[%s1153_s1 + $0x130] sm:$0xff]  ;;  %v98_v23 = vld [vmem:[%s1153_s1 + $0x18] sm:$0xff]  ;;  %v132_v24 = vld [vmem:[%s1153_s1 + $0x128] sm:$0xff] }
   0x9   :  { %218 = vmatprep.subr.mxu0 %v597_v0  ;;  %387 = vmatpush1.msra.mxu1 %v139_v10  ;;  %v97_v25 = vld [vmem:[%s1153_s1 + $0x10] sm:$0xff]  ;;  %v131_v26 = vld [vmem:[%s1153_s1 + $0x120] sm:$0xff]  ;;  %v96_v27 = vld [vmem:[%s1153_s1 + $0x8] sm:$0xff] }
   0xa   :  { %219 = vmatpush1.msra.mxu0 %v106_v7  ;;  %388 = vmatprep.subr.mxu1 %v597_v0  ;;  %v130_v28 = vld [vmem:[%s1153_s1 + $0x118] sm:$0xff]  ;;  %v95_v29 = vld [vmem:[%s1153_s1] sm:$0xff]  ;;  %v129_v30 = vld [vmem:[%s1153_s1 + $0x110] sm:$0xff] }
   0xb   :  { %220 = vmatprep.subr.mxu0 %v597_v0  ;;  %389 = vmatpush1.msra.mxu1 %v138_v12  ;;  %v126_v31 = vld [vmem:[%s1153_s1 + $0xf8] sm:$0xff]  ;;  %v128_v32 = vld [vmem:[%s1153_s1 + $0x108] sm:$0xff]  ;;  %v125_v33 = vld [vmem:[%s1153_s1 + $0xf0] sm:$0xff] }
   0xc   :  { %221 = vmatpush1.msra.mxu0 %v105_v9  ;;  %390 = vmatprep.subr.mxu1 %v597_v0  ;;  %v127_v34 = vld [vmem:[%s1153_s1 + $0x100] sm:$0xff]  ;;  %v124_v35 = vld [vmem:[%s1153_s1 + $0xe8] sm:$0xff]  ;;  %v145_v36 = vld [vmem:[%s1153_s1 + $0x190] sm:$0xff] }
   0xd   :  { %222 = vmatprep.subr.mxu0 %v597_v0  ;;  %391 = vmatpush1.msra.mxu1 %v137_v14  ;;  %v123_v37 = vld [vmem:[%s1153_s1 + $0xe0] sm:$0xff]  ;;  %v144_v38 = vld [vmem:[%s1153_s1 + $0x188] sm:$0xff]  ;;  %v122_v39 = vld [vmem:[%s1153_s1 + $0xd8] sm:$0xff] }
   0xe   :  { %223 = vmatpush1.msra.mxu0 %v104_v11  ;;  %392 = vmatprep.subr.mxu1 %v597_v0  ;;  %v143_v40 = vld [vmem:[%s1153_s1 + $0x180] sm:$0xff]  ;;  %v14_v41 = vld [vmem:[%s1154_s0 + $0x18] sm:$0xff]  ;;  %v121_v42 = vld [vmem:[%s1153_s1 + $0xd0] sm:$0xff] }
   0xf   :  { %224 = vmatprep.subr.mxu0 %v597_v0  ;;  %393 = vmatpush1.msra.mxu1 %v136_v16  ;;  %v13_v43 = vld [vmem:[%s1154_s0 + $0x10] sm:$0xff]  ;;  %v12_v44 = vld [vmem:[%s1154_s0 + $0x8] sm:$0xff]  ;;  %v18_v46 = vld [vmem:[%s1154_s0 + $0x38] sm:$0xff] }
  0x10   :  { %225 = vmatpush1.msra.mxu0 %v103_v13  ;;  %394 = vmatprep.subr.mxu1 %v597_v0  ;;  %v120_v45 = vld [vmem:[%s1153_s1 + $0xc8] sm:$0xff]  ;;  %v119_v47 = vld [vmem:[%s1153_s1 + $0xc0] sm:$0xff]  ;;  %v17_v48 = vld [vmem:[%s1154_s0 + $0x30] sm:$0xff] }
  0x11   :  { %226 = vmatprep.subr.mxu0 %v597_v0  ;;  %395 = vmatpush1.msra.mxu1 %v135_v18  ;;  %v22_v49 = vld [vmem:[%s1154_s0 + $0x58] sm:$0xff]  ;;  %v117_v51 = vld [vmem:[%s1153_s1 + $0xb0] sm:$0xff]  ;;  %v116_v54 = vld [vmem:[%s1153_s1 + $0xa8] sm:$0xff] }
  0x12   :  { %227 = vmatpush1.msra.mxu0 %v102_v15  ;;  %396 = vmatprep.subr.mxu1 %v597_v0  ;;  %v118_v50 = vld [vmem:[%s1153_s1 + $0xb8] sm:$0xff]  ;;  %v21_v52 = vld [vmem:[%s1154_s0 + $0x50] sm:$0xff]  ;;  %v115_v55 = vld [vmem:[%s1153_s1 + $0xa0] sm:$0xff] }
  0x13   :  { %228 = vmatprep.subr.mxu0 %v597_v0  ;;  %397 = vmatpush1.msra.mxu1 %v134_v20  ;;  %v26_v53 = vld [vmem:[%s1154_s0 + $0x78] sm:$0xff]  ;;  %v25_v56 = vld [vmem:[%s1154_s0 + $0x70] sm:$0xff]  ;;  %v112_v62 = vld [vmem:[%s1153_s1 + $0x88] sm:$0xff] }
  0x14   :  { %229 = vmatpush1.msra.mxu0 %v101_v17  ;;  %398 = vmatprep.subr.mxu1 %v597_v0  ;;  %v30_v57 = vld [vmem:[%s1154_s0 + $0x98] sm:$0xff]  ;;  %v113_v59 = vld [vmem:[%s1153_s1 + $0x90] sm:$0xff]  ;;  %v111_v63 = vld [vmem:[%s1153_s1 + $0x80] sm:$0xff] }
  0x15   :  { %230 = vmatprep.subr.mxu0 %v597_v0  ;;  %399 = vmatpush1.msra.mxu1 %v133_v22  ;;  %v114_v58 = vld [vmem:[%s1153_s1 + $0x98] sm:$0xff]  ;;  %v29_v60 = vld [vmem:[%s1154_s0 + $0x90] sm:$0xff]  ;;  %v11_v2 = vld [vmem:[%s1154_s0] sm:$0xff] }
  0x16   :  { %231 = vmatpush1.msra.mxu0 %v100_v19  ;;  %400 = vmatprep.subr.mxu1 %v597_v0  ;;  %v34_v61 = vld [vmem:[%s1154_s0 + $0xb8] sm:$0xff]  ;;  %v33_v1 = vld [vmem:[%s1154_s0 + $0xb0] sm:$0xff]  ;;  %v16_v4 = vld [vmem:[%s1154_s0 + $0x28] sm:$0xff] }
  0x17   :  { %232 = vmatprep.subr.mxu0 %v597_v0  ;;  %401 = vmatpush1.msra.mxu1 %v132_v24  ;;  %v38_v3 = vld [vmem:[%s1154_s0 + $0xd8] sm:$0xff]  ;;  %v37_v5 = vld [vmem:[%s1154_s0 + $0xd0] sm:$0xff]  ;;  %v15_v6 = vld [vmem:[%s1154_s0 + $0x20] sm:$0xff] }
  0x18   :  { %233 = vmatpush1.msra.mxu0 %v99_v21  ;;  %402 = vmatprep.subr.mxu1 %v597_v0  ;;  %v20_v7 = vld [vmem:[%s1154_s0 + $0x48] sm:$0xff]  ;;  %v41_v8 = vld [vmem:[%s1154_s0 + $0xf0] sm:$0xff]  ;;  %v19_v9 = vld [vmem:[%s1154_s0 + $0x40] sm:$0xff] }
  0x19   :  { %234 = vmatprep.subr.mxu0 %v597_v0  ;;  %403 = vmatpush1.msra.mxu1 %v131_v26  ;;  %v46_v10 = vld [vmem:[%s1154_s0 + $0x118] sm:$0xff]  ;;  %v24_v11 = vld [vmem:[%s1154_s0 + $0x68] sm:$0xff]  ;;  %v45_v12 = vld [vmem:[%s1154_s0 + $0x110] sm:$0xff] }
  0x1a   :  { %235 = vmatpush1.msra.mxu0 %v98_v23  ;;  %404 = vmatprep.subr.mxu1 %v597_v0  ;;  %v23_v13 = vld [vmem:[%s1154_s0 + $0x60] sm:$0xff]  ;;  %v50_v14 = vld [vmem:[%s1154_s0 + $0x138] sm:$0xff]  ;;  %v28_v15 = vld [vmem:[%s1154_s0 + $0x88] sm:$0xff] }
  0x1b   :  { %236 = vmatprep.subr.mxu0 %v597_v0  ;;  %405 = vmatpush1.msra.mxu1 %v130_v28  ;;  %v49_v16 = vld [vmem:[%s1154_s0 + $0x130] sm:$0xff]  ;;  %v27_v17 = vld [vmem:[%s1154_s0 + $0x80] sm:$0xff]  ;;  %v54_v18 = vld [vmem:[%s1154_s0 + $0x158] sm:$0xff] }
  0x1c   :  { %237 = vmatpush1.msra.mxu0 %v97_v25  ;;  %406 = vmatprep.subr.mxu1 %v597_v0  ;;  %v32_v19 = vld [vmem:[%s1154_s0 + $0xa8] sm:$0xff]  ;;  %v53_v20 = vld [vmem:[%s1154_s0 + $0x150] sm:$0xff]  ;;  %v31_v21 = vld [vmem:[%s1154_s0 + $0xa0] sm:$0xff] }
  0x1d   :  { %238 = vmatprep.subr.mxu0 %v597_v0  ;;  %407 = vmatpush1.msra.mxu1 %v129_v30  ;;  %v58_v22 = vld [vmem:[%s1154_s0 + $0x178] sm:$0xff]  ;;  %v36_v23 = vld [vmem:[%s1154_s0 + $0xc8] sm:$0xff]  ;;  %v57_v24 = vld [vmem:[%s1154_s0 + $0x170] sm:$0xff] }
  0x1e   :  { %239 = vmatpush1.msra.mxu0 %v96_v27  ;;  %408 = vmatprep.subr.mxu1 %v597_v0  ;;  %v35_v25 = vld [vmem:[%s1154_s0 + $0xc0] sm:$0xff]  ;;  %v62_v26 = vld [vmem:[%s1154_s0 + $0x198] sm:$0xff]  ;;  %v40_v27 = vld [vmem:[%s1154_s0 + $0xe8] sm:$0xff] }
  0x1f   :  { %240 = vmatprep.subr.mxu0 %v597_v0  ;;  %409 = vmatpush1.msra.mxu1 %v128_v32  ;;  %v61_v28 = vld [vmem:[%s1154_s0 + $0x190] sm:$0xff]  ;;  %v66_v30 = vld [vmem:[%s1154_s0 + $0x1b8] sm:$0xff] }
  0x20   :  { %241 = vmatpush1.msra.mxu0 %v95_v29  ;;  %410 = vmatprep.subr.mxu1 %v597_v0  ;;  %v39_v29 = vld [vmem:[%s1154_s0 + $0xe0] sm:$0xff]  ;;  %v65_v32 = vld [vmem:[%s1154_s0 + $0x1b0] sm:$0xff] }
  0x21   :  { %242 = vmatprep.subr.mxu0 %v597_v0  ;;  %411 = vmatpush1.msra.mxu1 %v127_v34  ;;  %v70_v34 = vld [vmem:[%s1154_s0 + $0x1d8] sm:$0xff] }
  0x22   :  { %243 = vmatpush2.msra.mxu0 %v126_v31  ;;  %438 = vmatprep.subr.mxu1 %v597_v0  ;;  %v44_v31 = vld [vmem:[%s1154_s0 + $0x108] sm:$0xff] }
  0x23   :  { %244 = vmatprep.subr.mxu0 %v597_v0  ;;  %439 = vmatpush2.msra.mxu1 %v145_v36  ;;  %v69_v36 = vld [vmem:[%s1154_s0 + $0x1d0] sm:$0xff] }
  0x24   :  { %245 = vmatpush2.msra.mxu0 %v125_v33  ;;  %440 = vmatprep.subr.mxu1 %v597_v0  ;;  %v43_v33 = vld [vmem:[%s1154_s0 + $0x100] sm:$0xff] }
  0x25   :  { %246 = vmatprep.subr.mxu0 %v597_v0  ;;  %441 = vmatpush2.msra.mxu1 %v144_v38  ;;  %v74_v38 = vld [vmem:[%s1154_s0 + $0x1f8] sm:$0xff] }
  0x26   :  { %247 = vmatpush2.msra.mxu0 %v124_v35  ;;  %442 = vmatprep.subr.mxu1 %v597_v0  ;;  %v48_v35 = vld [vmem:[%s1154_s0 + $0x128] sm:$0xff] }
  0x27   :  { %248 = vmatprep.subr.mxu0 %v597_v0  ;;  %443 = vmatpush2.msra.mxu1 %v143_v40  ;;  %v73_v40 = vld [vmem:[%s1154_s0 + $0x1f0] sm:$0xff] }
  0x28   :  { %249 = vmatpush2.msra.mxu0 %v123_v37  ;;  %575 = vmatprep.mubr.msk.f32.mxu1 %vm146_vm0, %v14_v41  ;;  %v47_v37 = vld [vmem:[%s1154_s0 + $0x120] sm:$0xff] }
  0x29   :  { %250 = vmatprep.subr.mxu0 %v597_v0  ;;  %445 = vmatmul.mubr.f32.vlgmr.msra.gmra.mxu1 %v13_v43  ;;  %v51_v41 = vld [vmem:[%s1154_s0 + $0x140] sm:$0xff]  ;;  %v56_v43 = vld [vmem:[%s1154_s0 + $0x168] sm:$0xff] }
  0x2a   :  { %251 = vmatpush2.msra.mxu0 %v122_v39  ;;  %274 = vmatprep.mubr.f32.mxu0 %v12_v44  ;;  %v52_v39 = vld [vmem:[%s1154_s0 + $0x148] sm:$0xff]  ;;  %v77_v44 = vld [vmem:[%s1154_s0 + $0x210] sm:$0xff] }
  0x2b   :  { %252 = vmatprep.subr.mxu0 %v597_v0  ;;  %576 = vmatprep.mubr.msk.f32.mxu1 %vm146_vm0, %v18_v46  ;;  %v82_v46 = vld [vmem:[%s1154_s0 + $0x238] sm:$0xff] }
  0x2c   :  { %253 = vmatpush2.msra.mxu0 %v121_v42  ;;  %v78_v42 = vld [vmem:[%s1154_s0 + $0x218] sm:$0xff] }
  0x2d   :  { %254 = vmatprep.subr.mxu0 %v597_v0  ;;  %450 = vmatmul.mubr.f32.gmra.mxu1 %v17_v48  ;;  %v81_v48 = vld [vmem:[%s1154_s0 + $0x230] sm:$0xff] }
  0x2e   :  { %255 = vmatpush2.msra.mxu0 %v120_v45  ;;  %577 = vmatprep.mubr.msk.f32.mxu1 %vm146_vm0, %v22_v49  ;;  %v55_v45 = vld [vmem:[%s1154_s0 + $0x160] sm:$0xff] }
  0x2f   :  { %256 = vmatprep.subr.mxu0 %v597_v0  ;;  %v59_v49 = vld [vmem:[%s1154_s0 + $0x180] sm:$0xff] }
  0x30   :  { %257 = vmatpush2.msra.mxu0 %v119_v47  ;;  %v60_v47 = vld [vmem:[%s1154_s0 + $0x188] sm:$0xff] }
  0x31   :  { %258 = vmatprep.subr.mxu0 %v597_v0  ;;  %455 = vmatmul.mubr.f32.gmra.mxu1 %v21_v52  ;;  %v85_v52 = vld [vmem:[%s1154_s0 + $0x250] sm:$0xff] }
  0x32   :  { %259 = vmatpush2.msra.mxu0 %v118_v50  ;;  %578 = vmatprep.mubr.msk.f32.mxu1 %vm146_vm0, %v26_v53  ;;  %v86_v50 = vld [vmem:[%s1154_s0 + $0x258] sm:$0xff]  ;;  %v63_v53 = vld [vmem:[%s1154_s0 + $0x1a0] sm:$0xff] }
  0x33   :  { %260 = vmatprep.subr.mxu0 %v597_v0 }
  0x34   :  { %261 = vmatpush2.msra.mxu0 %v117_v51  ;;  %v64_v51 = vld [vmem:[%s1154_s0 + $0x1a8] sm:$0xff] }
  0x35   :  { %262 = vmatprep.subr.mxu0 %v597_v0  ;;  %460 = vmatmul.mubr.f32.gmra.mxu1 %v25_v56  ;;  %v89_v56 = vld [vmem:[%s1154_s0 + $0x270] sm:$0xff] }
  0x36   :  { %263 = vmatpush2.msra.mxu0 %v116_v54  ;;  %579 = vmatprep.mubr.msk.f32.mxu1 %vm146_vm0, %v30_v57  ;;  %v90_v54 = vld [vmem:[%s1154_s0 + $0x278] sm:$0xff]  ;;  %v67_v57 = vld [vmem:[%s1154_s0 + $0x1c0] sm:$0xff] }
  0x37   :  { %264 = vmatprep.subr.mxu0 %v597_v0 }
  0x38   :  { %265 = vmatpush2.msra.mxu0 %v115_v55  ;;  %v68_v55 = vld [vmem:[%s1154_s0 + $0x1c8] sm:$0xff] }
  0x39   :  { %266 = vmatprep.subr.mxu0 %v597_v0  ;;  %465 = vmatmul.mubr.f32.gmra.mxu1 %v29_v60  ;;  %v93_v60 = vld [vmem:[%s1154_s0 + $0x290] sm:$0xff] }
  0x3a   :  { %267 = vmatpush2.msra.mxu0 %v114_v58  ;;  %580 = vmatprep.mubr.msk.f32.mxu1 %vm146_vm0, %v34_v61  ;;  %v94_v58 = vld [vmem:[%s1154_s0 + $0x298] sm:$0xff]  ;;  %v71_v61 = vld [vmem:[%s1154_s0 + $0x1e0] sm:$0xff] }
  0x3b   :  { %268 = vmatprep.subr.mxu0 %v597_v0 }
  0x3c   :  { %269 = vmatpush2.msra.mxu0 %v113_v59  ;;  %v72_v59 = vld [vmem:[%s1154_s0 + $0x1e8] sm:$0xff] }
  0x3d   :  { %270 = vmatprep.subr.mxu0 %v597_v0  ;;  %470 = vmatmul.mubr.f32.gmra.mxu1 %v33_v1  ;;  %v80_v1 = vld [vmem:[%s1154_s0 + $0x228] sm:$0xff] }
  0x3e   :  { %271 = vmatpush2.msra.mxu0 %v112_v62  ;;  %581 = vmatprep.mubr.msk.f32.mxu1 %vm146_vm0, %v38_v3  ;;  %v76_v62 = vld [vmem:[%s1154_s0 + $0x208] sm:$0xff] }
  0x3f   :  { %272 = vmatprep.subr.mxu0 %v597_v0  ;;  %v42_v0 = vld [vmem:[%s1154_s0 + $0xf8] sm:$0xff]  ;;  %v84_v3 = vld [vmem:[%s1154_s0 + $0x248] sm:$0xff] }
  0x40   :  { %273 = vmatpush2.msra.mxu0 %v111_v63  ;;  %v75_v63 = vld [vmem:[%s1154_s0 + $0x200] sm:$0xff] }
  0x41   :  { %275 = vmatmul.mubr.f32.vlgmr.msra.gmra.mxu0 %v11_v2  ;;  %475 = vmatmul.mubr.f32.gmra.mxu1 %v37_v5  ;;  %v79_v2 = vld [vmem:[%s1154_s0 + $0x220] sm:$0xff]  ;;  %v88_v5 = vld [vmem:[%s1154_s0 + $0x268] sm:$0xff] }
  0x42   :  { %279 = vmatprep.mubr.f32.mxu0 %v16_v4  ;;  %582 = vmatprep.mubr.msk.f32.mxu1 %vm146_vm0, %v42_v0  ;;  %v83_v4 = vld [vmem:[%s1154_s0 + $0x240] sm:$0xff]  ;;  %v92_v0 = vld [vmem:[%s1154_s0 + $0x288] sm:$0xff] }
  0x45   :  { %280 = vmatmul.mubr.f32.gmra.mxu0 %v15_v6  ;;  %480 = vmatmul.mubr.f32.gmra.mxu1 %v41_v8  ;;  %v87_v6 = vld [vmem:[%s1154_s0 + $0x260] sm:$0xff] }
  0x46   :  { %284 = vmatprep.mubr.f32.mxu0 %v20_v7  ;;  %583 = vmatprep.mubr.msk.f32.mxu1 %vm146_vm0, %v46_v10  ;;  %v91_v7 = vld [vmem:[%s1154_s0 + $0x280] sm:$0xff] }
  0x49   :  { %285 = vmatmul.mubr.f32.gmra.mxu0 %v19_v9  ;;  %485 = vmatmul.mubr.f32.gmra.mxu1 %v45_v12 }
  0x4a   :  { %289 = vmatprep.mubr.f32.mxu0 %v24_v11  ;;  %584 = vmatprep.mubr.msk.f32.mxu1 %vm146_vm0, %v50_v14 }
  0x4d   :  { %290 = vmatmul.mubr.f32.gmra.mxu0 %v23_v13  ;;  %490 = vmatmul.mubr.f32.gmra.mxu1 %v49_v16 }
  0x4e   :  { %294 = vmatprep.mubr.f32.mxu0 %v28_v15  ;;  %585 = vmatprep.mubr.msk.f32.mxu1 %vm146_vm0, %v54_v18 }
  0x51   :  { %295 = vmatmul.mubr.f32.gmra.mxu0 %v27_v17  ;;  %495 = vmatmul.mubr.f32.gmra.mxu1 %v53_v20 }
  0x52   :  { %299 = vmatprep.mubr.f32.mxu0 %v32_v19  ;;  %586 = vmatprep.mubr.msk.f32.mxu1 %vm146_vm0, %v58_v22 }
  0x55   :  { %300 = vmatmul.mubr.f32.gmra.mxu0 %v31_v21  ;;  %500 = vmatmul.mubr.f32.gmra.mxu1 %v57_v24 }
  0x56   :  { %304 = vmatprep.mubr.f32.mxu0 %v36_v23  ;;  %587 = vmatprep.mubr.msk.f32.mxu1 %vm146_vm0, %v62_v26 }
  0x59   :  { %305 = vmatmul.mubr.f32.gmra.mxu0 %v35_v25  ;;  %505 = vmatmul.mubr.f32.gmra.mxu1 %v61_v28 }
  0x5a   :  { %309 = vmatprep.mubr.f32.mxu0 %v40_v27  ;;  %588 = vmatprep.mubr.msk.f32.mxu1 %vm146_vm0, %v66_v30 }
  0x5d   :  { %310 = vmatmul.mubr.f32.gmra.mxu0 %v39_v29  ;;  %510 = vmatmul.mubr.f32.gmra.mxu1 %v65_v32 }
  0x5e   :  { %314 = vmatprep.mubr.f32.mxu0 %v44_v31  ;;  %589 = vmatprep.mubr.msk.f32.mxu1 %vm146_vm0, %v70_v34 }
  0x61   :  { %315 = vmatmul.mubr.f32.gmra.mxu0 %v43_v33  ;;  %515 = vmatmul.mubr.f32.gmra.mxu1 %v69_v36 }
  0x62   :  { %319 = vmatprep.mubr.f32.mxu0 %v48_v35  ;;  %590 = vmatprep.mubr.msk.f32.mxu1 %vm146_vm0, %v74_v38 }
  0x65   :  { %320 = vmatmul.mubr.f32.gmra.mxu0 %v47_v37  ;;  %520 = vmatmul.mubr.f32.gmra.mxu1 %v73_v40 }
  0x66   :  { %324 = vmatprep.mubr.f32.mxu0 %v52_v39  ;;  %591 = vmatprep.mubr.msk.f32.mxu1 %vm146_vm0, %v78_v42 }
  0x69   :  { %325 = vmatmul.mubr.f32.gmra.mxu0 %v51_v41  ;;  %525 = vmatmul.mubr.f32.gmra.mxu1 %v77_v44 }
  0x6a   :  { %329 = vmatprep.mubr.f32.mxu0 %v56_v43  ;;  %592 = vmatprep.mubr.msk.f32.mxu1 %vm146_vm0, %v82_v46 }
  0x6d   :  { %330 = vmatmul.mubr.f32.gmra.mxu0 %v55_v45  ;;  %530 = vmatmul.mubr.f32.gmra.mxu1 %v81_v48 }
  0x6e   :  { %334 = vmatprep.mubr.f32.mxu0 %v60_v47  ;;  %593 = vmatprep.mubr.msk.f32.mxu1 %vm146_vm0, %v86_v50 }
  0x71   :  { %335 = vmatmul.mubr.f32.gmra.mxu0 %v59_v49  ;;  %535 = vmatmul.mubr.f32.gmra.mxu1 %v85_v52 }
  0x72   :  { %339 = vmatprep.mubr.f32.mxu0 %v64_v51  ;;  %594 = vmatprep.mubr.msk.f32.mxu1 %vm146_vm0, %v90_v54 }
  0x75   :  { %340 = vmatmul.mubr.f32.gmra.mxu0 %v63_v53  ;;  %540 = vmatmul.mubr.f32.gmra.mxu1 %v89_v56 }
  0x76   :  { %344 = vmatprep.mubr.f32.mxu0 %v68_v55  ;;  %595 = vmatprep.mubr.msk.f32.mxu1 %vm146_vm0, %v94_v58 }
  0x79   :  { %345 = vmatmul.mubr.f32.gmra.mxu0 %v67_v57  ;;  %545 = vmatmul.mubr.f32.gmra.mxu1 %v93_v60 }
  0x7a   :  { %349 = vmatprep.mubr.f32.mxu0 %v72_v59 }
  0x7d   :  { %350 = vmatmul.mubr.f32.gmra.mxu0 %v71_v61 }
  0x7e   :  { %354 = vmatprep.mubr.f32.mxu0 %v76_v62 }
  0x81   :  { %355 = vmatmul.mubr.f32.gmra.mxu0 %v75_v63 }
  0x82   :  { %359 = vmatprep.mubr.f32.mxu0 %v80_v1 }
  0x85   :  { %360 = vmatmul.mubr.f32.gmra.mxu0 %v79_v2 }
  0x86   :  { %364 = vmatprep.mubr.f32.mxu0 %v84_v3 }
  0x89   :  { %365 = vmatmul.mubr.f32.gmra.mxu0 %v83_v4 }
  0x8a   :  { %369 = vmatprep.mubr.f32.mxu0 %v88_v5 }
  0x8d   :  { %370 = vmatmul.mubr.f32.gmra.mxu0 %v87_v6 }
  0x8e   :  { %374 = vmatprep.mubr.f32.mxu0 %v92_v0 }
  0x91   :  { %375 = vmatmul.mubr.f32.gmra.mxu0 %v91_v7 }
  0xe9   :  { %v446_v8 = vpop.f32.mrf.mxu1 }
  0xeb   :  { %v448_v9 = vpop.f32.mrf.mxu1 }
  0xed   :  { %v451_v10 = vpop.f32.mrf.mxu1 }
  0xef   :  { %v453_v11 = vpop.f32.mrf.mxu1 }
  0xf1   :  { %v456_v12 = vpop.f32.mrf.mxu1 }
  0xf3   :  { %v458_v13 = vpop.f32.mrf.mxu1 }
  0xf5   :  { %v461_v14 = vpop.f32.mrf.mxu1 }
  0xf7   :  { %v463_v15 = vpop.f32.mrf.mxu1 }
  0xf9   :  { %v466_v16 = vpop.f32.mrf.mxu1 }
  0xfb   :  { %v468_v17 = vpop.f32.mrf.mxu1 }
  0xfd   :  { %v471_v18 = vpop.f32.mrf.mxu1 }
  0xff   :  { %v473_v21 = vpop.f32.mrf.mxu1 }
 0x101   :  { %v276_v19 = vpop.f32.mrf.mxu0  ;;  %v476_v23 = vpop.f32.mrf.mxu1 }
 0x102   :  { %v447_v20 = vadd.f32 %v446_v8, %v276_v19 }
 0x103   :  { %v278_v22 = vpop.f32.mrf.mxu0  ;;  %v478_v26 = vpop.f32.mrf.mxu1 }
 0x104   :  { %550 = vst [vmem:[%s1155_s2] sm:$0xff] %v447_v20 }
 0x105   :  { %v281_v24 = vpop.f32.mrf.mxu0  ;;  %v481_v28 = vpop.f32.mrf.mxu1 }
 0x106   :  { %v452_v25 = vadd.f32 %v451_v10, %v281_v24 }
 0x107   :  { %v283_v27 = vpop.f32.mrf.mxu0  ;;  %v483_v31 = vpop.f32.mrf.mxu1 }
 0x108   :  { %551 = vst [vmem:[%s1155_s2 + $0x8] sm:$0xff] %v452_v25 }
 0x109   :  { %v286_v29 = vpop.f32.mrf.mxu0  ;;  %v486_v33 = vpop.f32.mrf.mxu1 }
 0x10a   :  { %v457_v30 = vadd.f32 %v456_v12, %v286_v29 }
 0x10b   :  { %v288_v32 = vpop.f32.mrf.mxu0  ;;  %v488_v36 = vpop.f32.mrf.mxu1 }
 0x10c   :  { %552 = vst [vmem:[%s1155_s2 + $0x10] sm:$0xff] %v457_v30 }
 0x10d   :  { %v291_v34 = vpop.f32.mrf.mxu0  ;;  %v491_v38 = vpop.f32.mrf.mxu1 }
 0x10e   :  { %v462_v35 = vadd.f32 %v461_v14, %v291_v34 }
 0x10f   :  { %v293_v37 = vpop.f32.mrf.mxu0  ;;  %v493_v41 = vpop.f32.mrf.mxu1 }
 0x110   :  { %553 = vst [vmem:[%s1155_s2 + $0x18] sm:$0xff] %v462_v35 }
 0x111   :  { %v296_v39 = vpop.f32.mrf.mxu0  ;;  %v496_v43 = vpop.f32.mrf.mxu1 }
 0x112   :  { %v467_v40 = vadd.f32 %v466_v16, %v296_v39 }
 0x113   :  { %v298_v42 = vpop.f32.mrf.mxu0  ;;  %v498_v46 = vpop.f32.mrf.mxu1 }
 0x114   :  { %554 = vst [vmem:[%s1155_s2 + $0x20] sm:$0xff] %v467_v40 }
 0x115   :  { %v301_v44 = vpop.f32.mrf.mxu0  ;;  %v501_v48 = vpop.f32.mrf.mxu1 }
 0x116   :  { %v472_v45 = vadd.f32 %v471_v18, %v301_v44 }
 0x117   :  { %v303_v47 = vpop.f32.mrf.mxu0  ;;  %v503_v51 = vpop.f32.mrf.mxu1 }
 0x118   :  { %555 = vst [vmem:[%s1155_s2 + $0x28] sm:$0xff] %v472_v45 }
 0x119   :  { %v306_v49 = vpop.f32.mrf.mxu0  ;;  %v506_v53 = vpop.f32.mrf.mxu1 }
 0x11a   :  { %v477_v50 = vadd.f32 %v476_v23, %v306_v49 }
 0x11b   :  { %v308_v52 = vpop.f32.mrf.mxu0  ;;  %v508_v56 = vpop.f32.mrf.mxu1 }
 0x11c   :  { %556 = vst [vmem:[%s1155_s2 + $0x30] sm:$0xff] %v477_v50 }
 0x11d   :  { %v311_v54 = vpop.f32.mrf.mxu0  ;;  %v511_v58 = vpop.f32.mrf.mxu1 }
 0x11e   :  { %v482_v55 = vadd.f32 %v481_v28, %v311_v54 }
 0x11f   :  { %v313_v57 = vpop.f32.mrf.mxu0  ;;  %v513_v61 = vpop.f32.mrf.mxu1 }
 0x120   :  { %557 = vst [vmem:[%s1155_s2 + $0x38] sm:$0xff] %v482_v55 }
 0x121   :  { %v316_v59 = vpop.f32.mrf.mxu0  ;;  %v516_v63 = vpop.f32.mrf.mxu1 }
 0x122   :  { %v487_v60 = vadd.f32 %v486_v33, %v316_v59 }
 0x123   :  { %v318_v62 = vpop.f32.mrf.mxu0  ;;  %v518_v3 = vpop.f32.mrf.mxu1 }
 0x124   :  { %558 = vst [vmem:[%s1155_s2 + $0x40] sm:$0xff] %v487_v60 }
 0x125   :  { %v321_v1 = vpop.f32.mrf.mxu0  ;;  %v521_v5 = vpop.f32.mrf.mxu1 }
 0x126   :  { %v492_v2 = vadd.f32 %v491_v38, %v321_v1 }
 0x127   :  { %v323_v4 = vpop.f32.mrf.mxu0  ;;  %v523_v7 = vpop.f32.mrf.mxu1 }
 0x128   :  { %559 = vst [vmem:[%s1155_s2 + $0x48] sm:$0xff] %v492_v2 }
 0x129   :  { %v326_v6 = vpop.f32.mrf.mxu0  ;;  %v526_v9 = vpop.f32.mrf.mxu1 }
 0x12a   :  { %v497_v0 = vadd.f32 %v496_v43, %v326_v6 }
 0x12b   :  { %v328_v8 = vpop.f32.mrf.mxu0  ;;  %v528_v12 = vpop.f32.mrf.mxu1 }
 0x12c   :  { %560 = vst [vmem:[%s1155_s2 + $0x50] sm:$0xff] %v497_v0 }
 0x12d   :  { %v331_v10 = vpop.f32.mrf.mxu0  ;;  %v531_v14 = vpop.f32.mrf.mxu1 }
 0x12e   :  { %v502_v11 = vadd.f32 %v501_v48, %v331_v10 }
 0x12f   :  { %v333_v13 = vpop.f32.mrf.mxu0  ;;  %v533_v17 = vpop.f32.mrf.mxu1 }
 0x130   :  { %561 = vst [vmem:[%s1155_s2 + $0x58] sm:$0xff] %v502_v11 }
 0x131   :  { %v336_v15 = vpop.f32.mrf.mxu0  ;;  %v536_v19 = vpop.f32.mrf.mxu1 }
 0x132   :  { %v507_v16 = vadd.f32 %v506_v53, %v336_v15 }
 0x133   :  { %v338_v18 = vpop.f32.mrf.mxu0  ;;  %v538_v22 = vpop.f32.mrf.mxu1 }
 0x134   :  { %562 = vst [vmem:[%s1155_s2 + $0x60] sm:$0xff] %v507_v16 }
 0x135   :  { %v341_v20 = vpop.f32.mrf.mxu0  ;;  %v541_v24 = vpop.f32.mrf.mxu1 }
 0x136   :  { %v512_v21 = vadd.f32 %v511_v58, %v341_v20 }
 0x137   :  { %v343_v23 = vpop.f32.mrf.mxu0  ;;  %v543_v27 = vpop.f32.mrf.mxu1 }
 0x138   :  { %563 = vst [vmem:[%s1155_s2 + $0x68] sm:$0xff] %v512_v21 }
 0x139   :  { %v346_v25 = vpop.f32.mrf.mxu0  ;;  %v546_v29 = vpop.f32.mrf.mxu1 }
 0x13a   :  { %v517_v26 = vadd.f32 %v516_v63, %v346_v25 }
 0x13b   :  { %v348_v28 = vpop.f32.mrf.mxu0  ;;  %v548_v32 = vpop.f32.mrf.mxu1 }
 0x13c   :  { %564 = vst [vmem:[%s1155_s2 + $0x70] sm:$0xff] %v517_v26 }
 0x13d   :  { %v351_v30 = vpop.f32.mrf.mxu0 }
 0x13e   :  { %v522_v31 = vadd.f32 %v521_v5, %v351_v30 }
 0x13f   :  { %v353_v33 = vpop.f32.mrf.mxu0 }
 0x140   :  { %565 = vst [vmem:[%s1155_s2 + $0x78] sm:$0xff] %v522_v31 }
 0x141   :  { %v356_v34 = vpop.f32.mrf.mxu0 }
 0x142   :  { %v527_v35 = vadd.f32 %v526_v9, %v356_v34 }
 0x143   :  { %v358_v36 = vpop.f32.mrf.mxu0 }
 0x144   :  { %566 = vst [vmem:[%s1155_s2 + $0x80] sm:$0xff] %v527_v35 }
 0x145   :  { %v361_v37 = vpop.f32.mrf.mxu0 }
 0x146   :  { %v532_v38 = vadd.f32 %v531_v14, %v361_v37 }
 0x147   :  { %v363_v39 = vpop.f32.mrf.mxu0 }
 0x148   :  { %567 = vst [vmem:[%s1155_s2 + $0x88] sm:$0xff] %v532_v38 }
 0x149   :  { %v366_v40 = vpop.f32.mrf.mxu0 }
 0x14a   :  { %v537_v41 = vadd.f32 %v536_v19, %v366_v40 }
 0x14b   :  { %v368_v42 = vpop.f32.mrf.mxu0 }
 0x14c   :  { %568 = vst [vmem:[%s1155_s2 + $0x90] sm:$0xff] %v537_v41 }
 0x14d   :  { %v371_v43 = vpop.f32.mrf.mxu0 }
 0x14e   :  { %v542_v44 = vadd.f32 %v541_v24, %v371_v43 }
 0x14f   :  { %v373_v45 = vpop.f32.mrf.mxu0 }
 0x150   :  { %569 = vst [vmem:[%s1155_s2 + $0x98] sm:$0xff] %v542_v44 }
 0x151   :  { %v376_v46 = vpop.f32.mrf.mxu0 }
 0x152   :  { %v547_v47 = vadd.f32 %v546_v29, %v376_v46 }
 0x153   :  { %v378_v48 = vpop.f32.mrf.mxu0 }
 0x154   :  { %570 = vst [vmem:[%s1155_s2 + $0xa0] sm:$0xff] %v547_v47 }

// kernel: kanc_mlp_forward.13
= control target key start
LH: loop header
LB: loop body
LE: loop exit
PB: predicated region body
PF: predicated region fallthrough
CT: control target
= control target key end

     0   :  { %vm141_vm0 = vcmask 1041408   ;;  %vm138_vm1 = vcmask 277504   ;;  %s1114_s0 = inlined_call_operand.vmem [shape: f32[2,162], index: 0, kind: input, shape index: {}]   ;;  %s1115_s1 = inlined_call_operand.vmem [shape: f32[162,512], index: 1, kind: input, shape index: {}]   ;;  %s1116_s2 = inlined_call_operand.vmem [shape: f32[1,512], index: 2, kind: input, shape index: {}]   ;;  %s1117_s3 = inlined_call_operand.vmem [shape: f32[512,128], index: 3, kind: input, shape index: {}]   ;;  %s1118_s4 = inlined_call_operand.vmem [shape: f32[1,128], index: 4, kind: input, shape index: {}]   ;;  %s1119_s5 = inlined_call_operand.hbm [shape: f32[2,128], index: 5, kind: output, shape index: {}]  }
   0x1   :  { %v83_v0 = vld [vmem:[%s1115_s1 + $0x1e8] sm:$0xff]  ;;  %v85_v1 = vld [vmem:[%s1115_s1 + $0x1f8] sm:$0xff]  ;;  %v82_v2 = vld [vmem:[%s1115_s1 + $0x1e0] sm:$0xff] }
   0x2   :  { %154 = vmatprep.subr.mxu0 %v83_v0  ;;  %225 = vmatprep.subr.mxu1 %v85_v1  ;;  %v84_v3 = vld [vmem:[%s1115_s1 + $0x1f0] sm:$0xff]  ;;  %v79_v4 = vld [vmem:[%s1115_s1 + $0x1c8] sm:$0xff]  ;;  %v81_v5 = vld [vmem:[%s1115_s1 + $0x1d8] sm:$0xff] }
   0x3   :  { %155 = vmatpush1.msra.mxu0 %v82_v2  ;;  %226 = vmatpush1.msra.mxu1 %v84_v3  ;;  %v78_v6 = vld [vmem:[%s1115_s1 + $0x1c0] sm:$0xff]  ;;  %v80_v7 = vld [vmem:[%s1115_s1 + $0x1d0] sm:$0xff]  ;;  %v75_v8 = vld [vmem:[%s1115_s1 + $0x1a8] sm:$0xff] }
   0x4   :  { %156 = vmatprep.subr.mxu0 %v79_v4  ;;  %227 = vmatprep.subr.mxu1 %v81_v5  ;;  %v77_v9 = vld [vmem:[%s1115_s1 + $0x1b8] sm:$0xff]  ;;  %v74_v10 = vld [vmem:[%s1115_s1 + $0x1a0] sm:$0xff]  ;;  %v76_v11 = vld [vmem:[%s1115_s1 + $0x1b0] sm:$0xff] }
   0x5   :  { %157 = vmatpush1.msra.mxu0 %v78_v6  ;;  %228 = vmatpush1.msra.mxu1 %v80_v7  ;;  %v71_v12 = vld [vmem:[%s1115_s1 + $0x188] sm:$0xff]  ;;  %v73_v13 = vld [vmem:[%s1115_s1 + $0x198] sm:$0xff]  ;;  %v70_v14 = vld [vmem:[%s1115_s1 + $0x180] sm:$0xff] }
   0x6   :  { %158 = vmatprep.subr.mxu0 %v75_v8  ;;  %229 = vmatprep.subr.mxu1 %v77_v9  ;;  %v72_v15 = vld [vmem:[%s1115_s1 + $0x190] sm:$0xff]  ;;  %v67_v16 = vld [vmem:[%s1115_s1 + $0x168] sm:$0xff]  ;;  %v69_v17 = vld [vmem:[%s1115_s1 + $0x178] sm:$0xff] }
   0x7   :  { %159 = vmatpush1.msra.mxu0 %v74_v10  ;;  %230 = vmatpush1.msra.mxu1 %v76_v11  ;;  %v66_v18 = vld [vmem:[%s1115_s1 + $0x160] sm:$0xff]  ;;  %v68_v19 = vld [vmem:[%s1115_s1 + $0x170] sm:$0xff]  ;;  %v63_v20 = vld [vmem:[%s1115_s1 + $0x148] sm:$0xff] }
   0x8   :  { %160 = vmatprep.subr.mxu0 %v71_v12  ;;  %231 = vmatprep.subr.mxu1 %v73_v13  ;;  %v65_v21 = vld [vmem:[%s1115_s1 + $0x158] sm:$0xff]  ;;  %v62_v22 = vld [vmem:[%s1115_s1 + $0x140] sm:$0xff]  ;;  %v64_v23 = vld [vmem:[%s1115_s1 + $0x150] sm:$0xff] }
   0x9   :  { %161 = vmatpush1.msra.mxu0 %v70_v14  ;;  %232 = vmatpush1.msra.mxu1 %v72_v15  ;;  %v59_v24 = vld [vmem:[%s1115_s1 + $0x128] sm:$0xff]  ;;  %v61_v25 = vld [vmem:[%s1115_s1 + $0x138] sm:$0xff]  ;;  %v58_v26 = vld [vmem:[%s1115_s1 + $0x120] sm:$0xff] }
   0xa   :  { %162 = vmatprep.subr.mxu0 %v67_v16  ;;  %233 = vmatprep.subr.mxu1 %v69_v17  ;;  %v60_v27 = vld [vmem:[%s1115_s1 + $0x130] sm:$0xff]  ;;  %v55_v28 = vld [vmem:[%s1115_s1 + $0x108] sm:$0xff]  ;;  %v57_v29 = vld [vmem:[%s1115_s1 + $0x118] sm:$0xff] }
   0xb   :  { %163 = vmatpush1.msra.mxu0 %v66_v18  ;;  %234 = vmatpush1.msra.mxu1 %v68_v19  ;;  %v54_v30 = vld [vmem:[%s1115_s1 + $0x100] sm:$0xff]  ;;  %v56_v31 = vld [vmem:[%s1115_s1 + $0x110] sm:$0xff]  ;;  %v51_v32 = vld [vmem:[%s1115_s1 + $0xe8] sm:$0xff] }
   0xc   :  { %164 = vmatprep.subr.mxu0 %v63_v20  ;;  %235 = vmatprep.subr.mxu1 %v65_v21  ;;  %v53_v33 = vld [vmem:[%s1115_s1 + $0xf8] sm:$0xff]  ;;  %v50_v34 = vld [vmem:[%s1115_s1 + $0xe0] sm:$0xff]  ;;  %v52_v35 = vld [vmem:[%s1115_s1 + $0xf0] sm:$0xff] }
   0xd   :  { %165 = vmatpush1.msra.mxu0 %v62_v22  ;;  %236 = vmatpush1.msra.mxu1 %v64_v23  ;;  %v47_v36 = vld [vmem:[%s1115_s1 + $0xc8] sm:$0xff]  ;;  %v49_v37 = vld [vmem:[%s1115_s1 + $0xd8] sm:$0xff]  ;;  %v46_v38 = vld [vmem:[%s1115_s1 + $0xc0] sm:$0xff] }
   0xe   :  { %166 = vmatprep.subr.mxu0 %v59_v24  ;;  %237 = vmatprep.subr.mxu1 %v61_v25  ;;  %v48_v39 = vld [vmem:[%s1115_s1 + $0xd0] sm:$0xff]  ;;  %v43_v40 = vld [vmem:[%s1115_s1 + $0xa8] sm:$0xff]  ;;  %v45_v41 = vld [vmem:[%s1115_s1 + $0xb8] sm:$0xff] }
   0xf   :  { %167 = vmatpush1.msra.mxu0 %v58_v26  ;;  %238 = vmatpush1.msra.mxu1 %v60_v27  ;;  %v42_v42 = vld [vmem:[%s1115_s1 + $0xa0] sm:$0xff]  ;;  %v44_v43 = vld [vmem:[%s1115_s1 + $0xb0] sm:$0xff]  ;;  %v39_v44 = vld [vmem:[%s1115_s1 + $0x88] sm:$0xff] }
  0x10   :  { %168 = vmatprep.subr.mxu0 %v55_v28  ;;  %239 = vmatprep.subr.mxu1 %v57_v29  ;;  %v41_v45 = vld [vmem:[%s1115_s1 + $0x98] sm:$0xff]  ;;  %v38_v46 = vld [vmem:[%s1115_s1 + $0x80] sm:$0xff]  ;;  %v40_v47 = vld [vmem:[%s1115_s1 + $0x90] sm:$0xff] }
  0x11   :  { %169 = vmatpush1.msra.mxu0 %v54_v30  ;;  %240 = vmatpush1.msra.mxu1 %v56_v31  ;;  %v35_v48 = vld [vmem:[%s1115_s1 + $0x68] sm:$0xff]  ;;  %v37_v49 = vld [vmem:[%s1115_s1 + $0x78] sm:$0xff]  ;;  %v34_v50 = vld [vmem:[%s1115_s1 + $0x60] sm:$0xff] }
  0x12   :  { %170 = vmatprep.subr.mxu0 %v51_v32  ;;  %241 = vmatprep.subr.mxu1 %v53_v33  ;;  %v36_v51 = vld [vmem:[%s1115_s1 + $0x70] sm:$0xff]  ;;  %v31_v52 = vld [vmem:[%s1115_s1 + $0x48] sm:$0xff]  ;;  %v33_v53 = vld [vmem:[%s1115_s1 + $0x58] sm:$0xff] }
  0x13   :  { %171 = vmatpush1.msra.mxu0 %v50_v34  ;;  %242 = vmatpush1.msra.mxu1 %v52_v35  ;;  %v30_v54 = vld [vmem:[%s1115_s1 + $0x40] sm:$0xff]  ;;  %v32_v55 = vld [vmem:[%s1115_s1 + $0x50] sm:$0xff]  ;;  %v27_v56 = vld [vmem:[%s1115_s1 + $0x28] sm:$0xff] }
  0x14   :  { %172 = vmatprep.subr.mxu0 %v47_v36  ;;  %243 = vmatprep.subr.mxu1 %v49_v37  ;;  %v29_v57 = vld [vmem:[%s1115_s1 + $0x38] sm:$0xff]  ;;  %v26_v58 = vld [vmem:[%s1115_s1 + $0x20] sm:$0xff]  ;;  %v28_v59 = vld [vmem:[%s1115_s1 + $0x30] sm:$0xff] }
  0x15   :  { %173 = vmatpush1.msra.mxu0 %v46_v38  ;;  %244 = vmatpush1.msra.mxu1 %v48_v39  ;;  %v23_v60 = vld [vmem:[%s1115_s1 + $0x8] sm:$0xff]  ;;  %v25_v61 = vld [vmem:[%s1115_s1 + $0x18] sm:$0xff]  ;;  %v22_v62 = vld [vmem:[%s1115_s1] sm:$0xff] }
  0x16   :  { %174 = vmatprep.subr.mxu0 %v43_v40  ;;  %245 = vmatprep.subr.mxu1 %v45_v41  ;;  %v24_v63 = vld [vmem:[%s1115_s1 + $0x10] sm:$0xff]  ;;  %v103_v0 = vld [vmem:[%s1115_s1 + $0x288] sm:$0x3]  ;;  %v105_v1 = vld [vmem:[%s1115_s1 + $0x298] sm:$0x3] }
  0x17   :  { %175 = vmatpush1.msra.mxu0 %v42_v42  ;;  %246 = vmatpush1.msra.mxu1 %v44_v43  ;;  %v102_v2 = vld [vmem:[%s1115_s1 + $0x280] sm:$0x3]  ;;  %v104_v3 = vld [vmem:[%s1115_s1 + $0x290] sm:$0x3]  ;;  %v99_v4 = vld [vmem:[%s1115_s1 + $0x268] sm:$0xff] }
  0x18   :  { %176 = vmatprep.subr.mxu0 %v39_v44  ;;  %247 = vmatprep.subr.mxu1 %v41_v45  ;;  %v101_v5 = vld [vmem:[%s1115_s1 + $0x278] sm:$0xff]  ;;  %v98_v6 = vld [vmem:[%s1115_s1 + $0x260] sm:$0xff]  ;;  %v100_v7 = vld [vmem:[%s1115_s1 + $0x270] sm:$0xff] }
  0x19   :  { %177 = vmatpush1.msra.mxu0 %v38_v46  ;;  %248 = vmatpush1.msra.mxu1 %v40_v47  ;;  %v95_v8 = vld [vmem:[%s1115_s1 + $0x248] sm:$0xff]  ;;  %v97_v9 = vld [vmem:[%s1115_s1 + $0x258] sm:$0xff]  ;;  %v94_v10 = vld [vmem:[%s1115_s1 + $0x240] sm:$0xff] }
  0x1a   :  { %178 = vmatprep.subr.mxu0 %v35_v48  ;;  %249 = vmatprep.subr.mxu1 %v37_v49  ;;  %v96_v11 = vld [vmem:[%s1115_s1 + $0x250] sm:$0xff]  ;;  %v526_v12 = vld.sshfl [vmem:[%s1114_s0] sm:$0x33 pattern:$0x76325410]  ;;  %v91_v13 = vld [vmem:[%s1115_s1 + $0x228] sm:$0xff] }
  0x1b   :  { %179 = vmatpush1.msra.mxu0 %v34_v50  ;;  %250 = vmatpush1.msra.mxu1 %v36_v51  ;;  %v93_v14 = vld [vmem:[%s1115_s1 + $0x238] sm:$0xff]  ;;  %v90_v15 = vld [vmem:[%s1115_s1 + $0x220] sm:$0xff]  ;;  %v92_v16 = vld [vmem:[%s1115_s1 + $0x230] sm:$0xff]  ;;  %v136_v19 = vcombine.high %v526_v12, %v526_v12 }
  0x1c   :  { %180 = vmatprep.subr.mxu0 %v31_v52  ;;  %251 = vmatprep.subr.mxu1 %v33_v53  ;;  %v87_v17 = vld [vmem:[%s1115_s1 + $0x208] sm:$0xff]  ;;  %v89_v18 = vld [vmem:[%s1115_s1 + $0x218] sm:$0xff]  ;;  %v86_v20 = vld [vmem:[%s1115_s1 + $0x200] sm:$0xff] }
  0x1d   :  { %181 = vmatpush1.msra.mxu0 %v30_v54  ;;  %252 = vmatpush1.msra.mxu1 %v32_v55  ;;  %v88_v21 = vld [vmem:[%s1115_s1 + $0x210] sm:$0xff]  ;;  %v331_v22 = vld [vmem:[%s1117_s3 + $0xf8] sm:$0xff] }
  0x1e   :  { %182 = vmatprep.subr.mxu0 %v27_v56  ;;  %253 = vmatprep.subr.mxu1 %v29_v57  ;;  %v363_v23 = vld [vmem:[%s1117_s3 + $0x1f8] sm:$0xff]  ;;  %v330_v26 = vld [vmem:[%s1117_s3 + $0xf0] sm:$0xff] }
  0x1f   :  { %183 = vmatpush1.msra.mxu0 %v26_v58  ;;  %254 = vmatpush1.msra.mxu1 %v28_v59  ;;  %v315_v24 = vld [vmem:[%s1117_s3 + $0x78] sm:$0xff]  ;;  %v362_v27 = vld [vmem:[%s1117_s3 + $0x1f0] sm:$0xff] }
  0x20   :  { %184 = vmatprep.subr.mxu0 %v23_v60  ;;  %255 = vmatprep.subr.mxu1 %v25_v61  ;;  %v347_v25 = vld [vmem:[%s1117_s3 + $0x178] sm:$0xff] }
  0x21   :  { %185 = vmatpush1.msra.mxu0 %v22_v62  ;;  %256 = vmatpush1.msra.mxu1 %v24_v63 }
  0x22   :  { %527 = vmatprep.subr.msk.mxu0 %vm141_vm0, %v103_v0  ;;  %530 = vmatprep.subr.msk.mxu1 %vm141_vm0, %v105_v1 }
  0x23   :  { %528 = vmatpush2.msk.msra.mxu0 %vm141_vm0, %v102_v2  ;;  %531 = vmatpush2.msk.msra.mxu1 %vm141_vm0, %v104_v3 }
  0x24   :  { %210 = vmatprep.subr.mxu0 %v99_v4  ;;  %281 = vmatprep.subr.mxu1 %v101_v5 }
  0x25   :  { %211 = vmatpush2.msra.mxu0 %v98_v6  ;;  %282 = vmatpush2.msra.mxu1 %v100_v7 }
  0x26   :  { %212 = vmatprep.subr.mxu0 %v95_v8  ;;  %283 = vmatprep.subr.mxu1 %v97_v9 }
  0x27   :  { %213 = vmatpush2.msra.mxu0 %v94_v10  ;;  %284 = vmatpush2.msra.mxu1 %v96_v11 }
  0x28   :  { %214 = vmatprep.subr.mxu0 %v91_v13  ;;  %285 = vmatprep.subr.mxu1 %v93_v14 }
  0x29   :  { %215 = vmatpush2.msra.mxu0 %v90_v15  ;;  %286 = vmatpush2.msra.mxu1 %v92_v16 }
  0x2a   :  { %216 = vmatprep.subr.mxu0 %v87_v17  ;;  %287 = vmatprep.subr.mxu1 %v89_v18 }
  0x2b   :  { %217 = vmatpush2.msra.mxu0 %v86_v20  ;;  %529 = vmatprep.mubr.msk.f32.mxu0 %vm138_vm1, %v136_v19 }
  0x2c   :  { %288 = vmatpush2.msra.mxu1 %v88_v21  ;;  %532 = vmatprep.mubr.msk.f32.mxu1 %vm138_vm1, %v136_v19 }
  0x2d   :  { %219 = vmatmul.mubr.f32.vlgmr.msra.gmra.mxu0 %v526_v12  ;;  %290 = vmatmul.mubr.f32.vlgmr.msra.gmra.mxu1 %v526_v12 }
  0x2e   :  { %10 = vsyncpa [#allocation3], 0  ;;  %534 = vmatprep.subr.mxu0 %v331_v22  ;;  %569 = vmatprep.subr.mxu1 %v363_v23  ;;  %v314_v28 = vld [vmem:[%s1117_s3 + $0x70] sm:$0xff]  ;;  %v329_v30 = vld [vmem:[%s1117_s3 + $0xe8] sm:$0xff]  ;;  %v108_v22 = vlaneseq  ;;  %s627_s7 = smov [#allocation2]  }
  0x2f   :  { %v346_v29 = vld [vmem:[%s1117_s3 + $0x170] sm:$0xff]  ;;  %535 = vmatpush3.msra.mxu0 %v315_v24  ;;  %570 = vmatpush3.msra.mxu1 %v347_v25  ;;  %v361_v31 = vld [vmem:[%s1117_s3 + $0x1e8] sm:$0xff]  ;;  %v328_v34 = vld [vmem:[%s1117_s3 + $0xe0] sm:$0xff]  ;;  %s518_s8 = sshll.u32 %s627_s7, 4  ;;  %s519_s8 = int_to_ptr.vmem [resolvable:$true] %s518_s8 }
  0x30   :  { %536 = vmatprep.subr.mxu0 %v330_v26  ;;  %571 = vmatprep.subr.mxu1 %v362_v27  ;;  %v313_v32 = vld [vmem:[%s1117_s3 + $0x68] sm:$0xff]  ;;  %v360_v35 = vld [vmem:[%s1117_s3 + $0x1e0] sm:$0xff]  ;;  %v327_v38 = vld [vmem:[%s1117_s3 + $0xd8] sm:$0xff]  ;;  %v109_v23 = vshrl.u32 %v108_v22, 7  ;;  %s605_s9 = scalar_lea.vmem %s519_s8, 32  ;;  %p610_p1 = scmp.lt.s32.totalorder %s519_s8, %s519_s8 }
  0x31   :  { %v345_v33 = vld [vmem:[%s1117_s3 + $0x168] sm:$0xff]  ;;  %537 = vmatpush3.msra.mxu0 %v314_v28  ;;  %572 = vmatpush3.msra.mxu1 %v346_v29  ;;  %v312_v36 = vld [vmem:[%s1117_s3 + $0x60] sm:$0xff]  ;;  %v359_v39 = vld [vmem:[%s1117_s3 + $0x1d8] sm:$0xff]  ;;  %p606_p0 = scmp.ne.s32.totalorder %s519_s8, %s605_s9  ;;  %p611_p2 = scmp.lt.s32.totalorder %s605_s9, %s605_s9 }
  0x32   :  { %538 = vmatprep.subr.mxu0 %v329_v30  ;;  %573 = vmatprep.subr.mxu1 %v361_v31  ;;  %v344_v37 = vld [vmem:[%s1117_s3 + $0x160] sm:$0xff]  ;;  %v311_v40 = vld [vmem:[%s1117_s3 + $0x58] sm:$0xff]  ;;  %v326_v42 = vld [vmem:[%s1117_s3 + $0xd0] sm:$0xff]  ;;  %v118_v24 = vsub.s32 2, %v109_v23  ;;  %v110_v25 = vsub.s32 0, %v109_v23  ;;  %v114_v27 = vsub.s32 1, %v109_v23 }
  0x33   :  { %539 = vmatpush3.msra.mxu0 %v313_v32  ;;  %574 = vmatpush3.msra.mxu1 %v345_v33  ;;  %v343_v41 = vld [vmem:[%s1117_s3 + $0x158] sm:$0xff]  ;;  %v358_v43 = vld [vmem:[%s1117_s3 + $0x1d0] sm:$0xff]  ;;  %v325_v46 = vld [vmem:[%s1117_s3 + $0xc8] sm:$0xff]  ;;  %v122_v28 = vsub.s32 3, %v109_v23  ;;  %p612_p3 = por %p611_p2, %p610_p1 }
  0x34   :  { %540 = vmatprep.subr.mxu0 %v328_v34  ;;  %575 = vmatprep.subr.mxu1 %v360_v35  ;;  %v310_v44 = vld [vmem:[%s1117_s3 + $0x50] sm:$0xff]  ;;  %v357_v47 = vld [vmem:[%s1117_s3 + $0x1c8] sm:$0xff]  ;;  %v324_v50 = vld [vmem:[%s1117_s3 + $0xc0] sm:$0xff] }
  0x35   :  { %541 = vmatpush3.msra.mxu0 %v312_v36  ;;  %576 = vmatpush3.msra.mxu1 %v344_v37  ;;  %v342_v45 = vld [vmem:[%s1117_s3 + $0x150] sm:$0xff]  ;;  %v309_v48 = vld [vmem:[%s1117_s3 + $0x48] sm:$0xff]  ;;  %v356_v51 = vld [vmem:[%s1117_s3 + $0x1c0] sm:$0xff]  ;;  %p613_p4 = pnand %p612_p3, %p606_p0 }
  0x36   :  { %542 = vmatprep.subr.mxu0 %v327_v38  ;;  %577 = vmatprep.subr.mxu1 %v359_v39  ;;  %v341_v49 = vld [vmem:[%s1117_s3 + $0x148] sm:$0xff]  ;;  %v308_v52 = vld [vmem:[%s1117_s3 + $0x40] sm:$0xff]  ;;  %v323_v54 = vld [vmem:[%s1117_s3 + $0xb8] sm:$0xff] }
  0x37   :  { %543 = vmatpush3.msra.mxu0 %v311_v40  ;;  %578 = vmatpush3.msra.mxu1 %v343_v41  ;;  %v340_v53 = vld [vmem:[%s1117_s3 + $0x140] sm:$0xff]  ;;  %v355_v55 = vld [vmem:[%s1117_s3 + $0x1b8] sm:$0xff]  ;;  %v322_v58 = vld [vmem:[%s1117_s3 + $0xb0] sm:$0xff] }
  0x38   :  { %544 = vmatprep.subr.mxu0 %v326_v42  ;;  %579 = vmatprep.subr.mxu1 %v358_v43  ;;  %v307_v56 = vld [vmem:[%s1117_s3 + $0x38] sm:$0xff]  ;;  %v354_v59 = vld [vmem:[%s1117_s3 + $0x1b0] sm:$0xff]  ;;  %v321_v62 = vld [vmem:[%s1117_s3 + $0xa8] sm:$0xff] }
  0x39   :  { %545 = vmatpush3.msra.mxu0 %v310_v44  ;;  %580 = vmatpush3.msra.mxu1 %v342_v45  ;;  %v339_v57 = vld [vmem:[%s1117_s3 + $0x138] sm:$0xff]  ;;  %v306_v60 = vld [vmem:[%s1117_s3 + $0x30] sm:$0xff]  ;;  %v353_v63 = vld [vmem:[%s1117_s3 + $0x1a8] sm:$0xff] }
  0x3a   :  { %546 = vmatprep.subr.mxu0 %v325_v46  ;;  %581 = vmatprep.subr.mxu1 %v357_v47  ;;  %v338_v61 = vld [vmem:[%s1117_s3 + $0x130] sm:$0xff]  ;;  %v305_v0 = vld [vmem:[%s1117_s3 + $0x28] sm:$0xff]  ;;  %v320_v2 = vld [vmem:[%s1117_s3 + $0xa0] sm:$0xff] }
  0x3b   :  { %547 = vmatpush3.msra.mxu0 %v309_v48  ;;  %582 = vmatpush3.msra.mxu1 %v341_v49  ;;  %v337_v1 = vld [vmem:[%s1117_s3 + $0x128] sm:$0xff]  ;;  %v352_v3 = vld [vmem:[%s1117_s3 + $0x1a0] sm:$0xff]  ;;  %v319_v6 = vld [vmem:[%s1117_s3 + $0x98] sm:$0xff] }
  0x3c   :  { %548 = vmatprep.subr.mxu0 %v324_v50  ;;  %583 = vmatprep.subr.mxu1 %v356_v51  ;;  %v304_v4 = vld [vmem:[%s1117_s3 + $0x20] sm:$0xff]  ;;  %v351_v7 = vld [vmem:[%s1117_s3 + $0x198] sm:$0xff]  ;;  %v318_v10 = vld [vmem:[%s1117_s3 + $0x90] sm:$0xff] }
  0x3d   :  { %549 = vmatpush3.msra.mxu0 %v308_v52  ;;  %584 = vmatpush3.msra.mxu1 %v340_v53  ;;  %v336_v5 = vld [vmem:[%s1117_s3 + $0x120] sm:$0xff]  ;;  %v303_v8 = vld [vmem:[%s1117_s3 + $0x18] sm:$0xff]  ;;  %v350_v11 = vld [vmem:[%s1117_s3 + $0x190] sm:$0xff] }
  0x3e   :  { %550 = vmatprep.subr.mxu0 %v323_v54  ;;  %585 = vmatprep.subr.mxu1 %v355_v55  ;;  %v335_v9 = vld [vmem:[%s1117_s3 + $0x118] sm:$0xff]  ;;  %v302_v12 = vld [vmem:[%s1117_s3 + $0x10] sm:$0xff]  ;;  %v317_v14 = vld [vmem:[%s1117_s3 + $0x88] sm:$0xff] }
  0x3f   :  { %551 = vmatpush3.msra.mxu0 %v307_v56  ;;  %586 = vmatpush3.msra.mxu1 %v339_v57  ;;  %v334_v13 = vld [vmem:[%s1117_s3 + $0x110] sm:$0xff]  ;;  %v349_v15 = vld [vmem:[%s1117_s3 + $0x188] sm:$0xff]  ;;  %v316_v18 = vld [vmem:[%s1117_s3 + $0x80] sm:$0xff] }
  0x40   :  { %552 = vmatprep.subr.mxu0 %v322_v58  ;;  %587 = vmatprep.subr.mxu1 %v354_v59  ;;  %v301_v16 = vld [vmem:[%s1117_s3 + $0x8] sm:$0xff]  ;;  %v348_v19 = vld [vmem:[%s1117_s3 + $0x180] sm:$0xff] }
  0x41   :  { %553 = vmatpush3.msra.mxu0 %v306_v60  ;;  %588 = vmatpush3.msra.mxu1 %v338_v61  ;;  %v333_v17 = vld [vmem:[%s1117_s3 + $0x108] sm:$0xff]  ;;  %v300_v20 = vld [vmem:[%s1117_s3] sm:$0xff] }
  0x42   :  { %554 = vmatprep.subr.mxu0 %v321_v62  ;;  %589 = vmatprep.subr.mxu1 %v353_v63  ;;  %v332_v21 = vld [vmem:[%s1117_s3 + $0x100] sm:$0xff] }
  0x43   :  { %555 = vmatpush3.msra.mxu0 %v305_v0  ;;  %590 = vmatpush3.msra.mxu1 %v337_v1  ;;  %v106_v26 = vld [vmem:[%s1116_s2] sm:$0xf] }
  0x44   :  { %556 = vmatprep.subr.mxu0 %v320_v2  ;;  %591 = vmatprep.subr.mxu1 %v352_v3  ;;  %v119_v29 = vrot.slane %v106_v26, %v118_v24  ;;  %v111_v30 = vrot.slane %v106_v26, %v110_v25  ;;  %v115_v31 = vrot.slane %v106_v26, %v114_v27  ;;  %v533_v47 = vld [vmem:[%s1118_s4] ss:$0 sm:$0xff] }
  0x45   :  { %557 = vmatpush3.msra.mxu0 %v304_v4  ;;  %592 = vmatpush3.msra.mxu1 %v336_v5  ;;  %v123_v32 = vrot.slane %v106_v26, %v122_v28 }
  0x46   :  { %558 = vmatprep.subr.mxu0 %v319_v6  ;;  %593 = vmatprep.subr.mxu1 %v351_v7 }
  0x47   :  { %559 = vmatpush3.msra.mxu0 %v303_v8  ;;  %594 = vmatpush3.msra.mxu1 %v335_v9 }
  0x48   :  { %560 = vmatprep.subr.mxu0 %v318_v10  ;;  %595 = vmatprep.subr.mxu1 %v350_v11 }
  0x49   :  { %561 = vmatpush3.msra.mxu0 %v302_v12  ;;  %596 = vmatpush3.msra.mxu1 %v334_v13 }
  0x4a   :  { %562 = vmatprep.subr.mxu0 %v317_v14  ;;  %597 = vmatprep.subr.mxu1 %v349_v15 }
  0x4b   :  { %563 = vmatpush3.msra.mxu0 %v301_v16  ;;  %598 = vmatpush3.msra.mxu1 %v333_v17 }
  0x4c   :  { %564 = vmatprep.subr.mxu0 %v316_v18  ;;  %599 = vmatprep.subr.mxu1 %v348_v19 }
  0x4d   :  { %565 = vmatpush3.msra.mxu0 %v300_v20  ;;  %600 = vmatpush3.msra.mxu1 %v332_v21 }
  0xed   :  { %v220_v33 = vpop.f32.mrf.mxu0  ;;  %v291_v34 = vpop.f32.mrf.mxu1 }
  0xee   :  { %v292_v35 = vadd.f32 %v291_v34, %v119_v29  ;;  %v221_v36 = vadd.f32 %v220_v33, %v111_v30 }
  0xef   :  { %v222_v37 = vpop.f32.mrf.mxu0  ;;  %v293_v38 = vpop.f32.mrf.mxu1 }
  0xf0   :  { %v223_v39 = vadd.f32 %v222_v37, %v115_v31  ;;  %v294_v40 = vadd.f32 %v293_v38, %v123_v32  ;;  %v298_v41 = vmax.f32 %v292_v35, 0.0  ;;  %v296_v44 = vmax.f32 %v221_v36, 0.0 }
  0xf2   :  { %v297_v42 = vmax.f32 %v223_v39, 0.0  ;;  %v299_v43 = vmax.f32 %v294_v40, 0.0 }
  0xf4   :  { %435 = vmatprep.mubr.f32.mxu0 %v297_v42  ;;  %505 = vmatprep.mubr.f32.mxu1 %v299_v43 }
  0xf5   :  { %436 = vmatmul.mubr.f32.vlgmr.msra.gmra.mxu0 %v296_v44  ;;  %506 = vmatmul.mubr.f32.vlgmr.msra.gmra.mxu1 %v298_v41 }
 0x1b5   :  { %v566_v45 = vpop.f32.mrf.mxu0  ;;  %v601_v46 = vpop.f32.mrf.mxu1 }
 0x1b7   :  { %v567_v48 = vpop.f32.mrf.mxu0  ;;  %v602_v49 = vpop.f32.mrf.mxu1 }
 0x1b8   :  { %v568_v50 = vadd.f32 %v567_v48, %v566_v45  ;;  %v603_v52 = vadd.f32 %v602_v49, %v601_v46 }
 0x1ba   :  { %v438_v51 = vadd.f32 %v568_v50, %v533_v47 }
 0x1bc   :  { %v508_v53 = vadd.f32 %v603_v52, %v438_v51 }
 0x1be   :  { %511 = vst [vmem:[#allocation2] sm:$0x3] %v508_v53 }
 0x1bf   :  { %616 = shalt.err (!%p613_p4)
}
 0x1c0   :  { %521 = dma.vmem_to_hbm [thread:$0]  %s519_s8, 32, %s1119_s5, [#allocation3]  }
 0x1c1   :  { %625 = dma.done.wait [#allocation3], 32  }
 0x1c2   :  { %626 = vsyncadd [#allocation3], 4294967264 }
 0x1c3   :  { %525 = vsyncpa [#allocation3], 1 }

</bundles_post_ra>
